<compile_context>
chip_gen: v7x
topology: tpu7x:2x2x1
jax: 0.10.0
libtpu: 0.0.40
codegen_flags: <defaults>
</compile_context>

<pallas_src>
import jax
import jax.numpy as jnp
from jax.experimental import pallas as pl
from jax.experimental.pallas import tpu as pltpu


_VMEM_LIMIT = 32 * 1024 * 1024   # safe scoped-VMEM target on v5e/v6e/v7x
_TILE_CAP_CONV = 512             # rows per conv-GEMM tile (K <= 1152 bf16)
_TILE_CAP_HEAD = 256             # rows per head tile (K = 6272 bf16)


def _pick_tile(m, cap):
    # Full-dim block when small (always layout-legal); otherwise a multiple-of-8
    # cap with Pallas masking the partial last block.
    return m if m <= cap else cap


# ----------------------------------------------------------------------------
# Pallas kernel 1: fused  out = relu(x @ w + b)   (bf16 in, f32 acc, bf16 out)
# ----------------------------------------------------------------------------
def _gemm_bias_relu_kernel(x_ref, w_ref, b_ref, o_ref):
    acc = jnp.dot(x_ref[...], w_ref[...], preferred_element_type=jnp.float32)
    acc = jnp.maximum(acc + b_ref[...], 0.0)
    o_ref[...] = acc.astype(o_ref.dtype)


def pallas_gemm_bias_relu(x, w, b, *, out_dtype=jnp.bfloat16):
    """x: (M, K) bf16, w: (K, N) bf16, b: (1, N) f32 -> (M, N) out_dtype."""
    M, K = x.shape
    K2, N = w.shape
    assert K == K2, (K, K2)
    TM = _pick_tile(M, _TILE_CAP_CONV)
    return pl.pallas_call(
        _gemm_bias_relu_kernel,
        out_shape=jax.ShapeDtypeStruct((M, N), out_dtype),
        grid=(pl.cdiv(M, TM),),
        in_specs=[
            pl.BlockSpec((TM, K), lambda i: (i, 0)),
            pl.BlockSpec((K, N), lambda i: (0, 0)),
            pl.BlockSpec((1, N), lambda i: (0, 0)),
        ],
        out_specs=pl.BlockSpec((TM, N), lambda i: (i, 0)),
        compiler_params=pltpu.CompilerParams(
            dimension_semantics=("parallel",),
            vmem_limit_bytes=_VMEM_LIMIT),
    )(x, w, b)


# ----------------------------------------------------------------------------
# Pallas kernel 2: fused twin MLP head (l1..l4 of BOTH Q branches, one call)
#   x_feat : (B, 6272) bf16  -- conv3 output, natural (H, W, [q1|q2]) flatten
#   a      : (B, A)    bf16
#   output : (B, 2)    f32   -- column 0 = q1, column 1 = q2
# ----------------------------------------------------------------------------
def _twin_head_kernel(x_ref, a_ref, w1f_ref, w1a_ref, b1_ref,
                      w2_ref, b2_ref, w3_ref, b3_ref, w4_ref, b4_ref, o_ref):
    h = jnp.dot(x_ref[...], w1f_ref[...], preferred_element_type=jnp.float32)
    h = h + jnp.dot(a_ref[...], w1a_ref[...], preferred_element_type=jnp.float32)
    h = jnp.maximum(h + b1_ref[...], 0.0)
    h = jnp.maximum(
        jnp.dot(h.astype(jnp.bfloat16), w2_ref[...],
                preferred_element_type=jnp.float32) + b2_ref[...], 0.0)
    h = jnp.maximum(
        jnp.dot(h.astype(jnp.bfloat16), w3_ref[...],
                preferred_element_type=jnp.float32) + b3_ref[...], 0.0)
    q = jnp.dot(h.astype(jnp.bfloat16), w4_ref[...],
                preferred_element_type=jnp.float32) + b4_ref[...]
    o_ref[...] = q.astype(o_ref.dtype)


def pallas_twin_head(x_feat, a, fp):
    B, F = x_feat.shape
    A = a.shape[1]
    N = fp["h_b1"].shape[1]  # 2 * hidden_width
    TB = _pick_tile(B, _TILE_CAP_HEAD)
    return pl.pallas_call(
        _twin_head_kernel,
        out_shape=jax.ShapeDtypeStruct((B, 2), jnp.float32),
        grid=(pl.cdiv(B, TB),),
        in_specs=[
            pl.BlockSpec((TB, F), lambda i: (i, 0)),
            pl.BlockSpec((TB, A), lambda i: (i, 0)),
            pl.BlockSpec((F, N), lambda i: (0, 0)),
            pl.BlockSpec((A, N), lambda i: (0, 0)),
            pl.BlockSpec((1, N), lambda i: (0, 0)),
            pl.BlockSpec((N, N), lambda i: (0, 0)),
            pl.BlockSpec((1, N), lambda i: (0, 0)),
            pl.BlockSpec((N, N), lambda i: (0, 0)),
            pl.BlockSpec((1, N), lambda i: (0, 0)),
            pl.BlockSpec((N, 2), lambda i: (0, 0)),
            pl.BlockSpec((1, 2), lambda i: (0, 0)),
        ],
        out_specs=pl.BlockSpec((TB, 2), lambda i: (i, 0)),
        compiler_params=pltpu.CompilerParams(
            dimension_semantics=("parallel",),
            vmem_limit_bytes=_VMEM_LIMIT),
    )(x_feat, a,
      fp["h_w1f"], fp["h_w1a"], fp["h_b1"],
      fp["h_w2"], fp["h_b2"], fp["h_w3"], fp["h_b3"],
      fp["h_w4"], fp["h_b4"])


# ----------------------------------------------------------------------------
# Conv2d (valid padding, square kernel) = im2col (glue) + fused Pallas GEMM
# ----------------------------------------------------------------------------
def _im2col(x_nhwc, kh, kw, stride):
    B, H, W, C = x_nhwc.shape
    Ho = (H - kh) // stride + 1
    Wo = (W - kw) // stride + 1
    patches = []
    for i in range(kh):
        for j in range(kw):
            patches.append(
                x_nhwc[:, i:i + stride * Ho:stride, j:j + stride * Wo:stride, :])
    p = jnp.stack(patches, axis=3)              # (B, Ho, Wo, kh*kw, C)
    return p.reshape(B, Ho, Wo, kh * kw * C), Ho, Wo


def pallas_conv2d_fused(x_nhwc, w2d, b, kh, kw, stride):
    """w2d: GEMM-ready fused weight (kh*kw*C_in, C_out_total), bf16."""
    B = x_nhwc.shape[0]
    patches, Ho, Wo = _im2col(x_nhwc, kh, kw, stride)
    x2d = patches.reshape(B * Ho * Wo, -1)
    y = pallas_gemm_bias_relu(x2d, w2d, b)
    return y.reshape(B, Ho, Wo, w2d.shape[1])


# ----------------------------------------------------------------------------
# Parameter construction (deterministic, synthetic) -- PyTorch layouts
# ----------------------------------------------------------------------------
def _init_branch(key, in_channels, action_dim, hidden_width, feature_size):
    ks = jax.random.split(key, 14)

    def w(k, shape, fan_in):
        return (jax.random.normal(k, shape, jnp.float32) /
                jnp.sqrt(fan_in)).astype(jnp.float32)

    p = {}
    # CNN encoder (PyTorch Conv2d weight layout: (C_out, C_in, kh, kw))
    p["c1_w"] = w(ks[0], (32, in_channels, 8, 8), in_channels * 64)
    p["c1_b"] = w(ks[1], (32,), in_channels * 64)
    p["c2_w"] = w(ks[2], (64, 32, 4, 4), 32 * 16)
    p["c2_b"] = w(ks[3], (64,), 32 * 16)
    p["c3_w"] = w(ks[4], (64, 64, 3, 3), 64 * 9)
    p["c3_b"] = w(ks[5], (64,), 64 * 9)
    # MLP head (PyTorch Linear weight layout: (out, in))
    p["l1_w"] = w(ks[6], (hidden_width, feature_size + action_dim),
                  feature_size + action_dim)
    p["l1_b"] = w(ks[7], (hidden_width,), feature_size + action_dim)
    p["l2_w"] = w(ks[8], (hidden_width, hidden_width), hidden_width)
    p["l2_b"] = w(ks[9], (hidden_width,), hidden_width)
    p["l3_w"] = w(ks[10], (hidden_width, hidden_width), hidden_width)
    p["l3_b"] = w(ks[11], (hidden_width,), hidden_width)
    p["l4_w"] = w(ks[12], (1, hidden_width), hidden_width)
    p["l4_b"] = w(ks[13], (1,), hidden_width)
    return p


def init_critic_params(key, state_dim, action_dim, hidden_width):
    feature_size = 3136  # 64 * 7 * 7, fixed by CNNEncoder (requires 84x84 input)
    k1, k2 = jax.random.split(key)
    return {
        "q1": _init_branch(k1, state_dim[0], action_dim, hidden_width, feature_size),
        "q2": _init_branch(k2, state_dim[0], action_dim, hidden_width, feature_size),
    }


# ----------------------------------------------------------------------------
# One-time fusion of the two branches into kernel-ready (lane-dense) weights.
# All transposes / the NCHW-flatten permutation are folded in here, once.
# ----------------------------------------------------------------------------
def prepare_fused_params(raw, hidden_width):
    q1, q2 = raw["q1"], raw["q2"]
    Hh = hidden_width
    fp = {}

    # conv1: concat C_out of both branches -> (8*8*Cin, 64)
    cin = q1["c1_w"].shape[1]
    w1 = jnp.concatenate([jnp.transpose(q1["c1_w"], (2, 3, 1, 0)),
                          jnp.transpose(q2["c1_w"], (2, 3, 1, 0))], axis=-1)
    fp["c1_w"] = w1.reshape(8 * 8 * cin, 64).astype(jnp.bfloat16)
    fp["c1_b"] = jnp.concatenate([q1["c1_b"], q2["c1_b"]]).reshape(1, 64).astype(jnp.float32)

    # conv2: block-diagonal over the concatenated 64-channel input -> (4*4*64, 128)
    w2 = jnp.zeros((4, 4, 64, 128), jnp.float32)
    w2 = w2.at[:, :, 0:32, 0:64].set(jnp.transpose(q1["c2_w"], (2, 3, 1, 0)))
    w2 = w2.at[:, :, 32:64, 64:128].set(jnp.transpose(q2["c2_w"], (2, 3, 1, 0)))
    fp["c2_w"] = w2.reshape(4 * 4 * 64, 128).astype(jnp.bfloat16)
    fp["c2_b"] = jnp.concatenate([q1["c2_b"], q2["c2_b"]]).reshape(1, 128).astype(jnp.float32)

    # conv3: block-diagonal over the concatenated 128-channel input -> (3*3*128, 128)
    w3 = jnp.zeros((3, 3, 128, 128), jnp.float32)
    w3 = w3.at[:, :, 0:64, 0:64].set(jnp.transpose(q1["c3_w"], (2, 3, 1, 0)))
    w3 = w3.at[:, :, 64:128, 64:128].set(jnp.transpose(q2["c3_w"], (2, 3, 1, 0)))
    fp["c3_w"] = w3.reshape(3 * 3 * 128, 128).astype(jnp.bfloat16)
    fp["c3_b"] = jnp.concatenate([q1["c3_b"], q2["c3_b"]]).reshape(1, 128).astype(jnp.float32)

    # Head l1: fold torch's (C,H,W)-order flatten into the weight columns.
    # conv3 output is flattened naturally as (H=7, W=7, C=128[q1|q2]) -> 6272 cols.
    def feat_cols(lw):  # lw: (Hh, 3136) with torch column order c*49 + h*7 + w
        return jnp.transpose(lw.reshape(Hh, 64, 7, 7), (2, 3, 1, 0))  # (7,7,64,Hh)

    w1f = jnp.zeros((7, 7, 128, 2 * Hh), jnp.float32)
    w1f = w1f.at[:, :, 0:64, 0:Hh].set(feat_cols(q1["l1_w"][:, :3136]))
    w1f = w1f.at[:, :, 64:128, Hh:2 * Hh].set(feat_cols(q2["l1_w"][:, :3136]))
    fp["h_w1f"] = w1f.reshape(7 * 7 * 128, 2 * Hh).astype(jnp.bfloat16)
    fp["h_w1a"] = jnp.concatenate([q1["l1_w"][:, 3136:].T,
                                   q2["l1_w"][:, 3136:].T], axis=-1).astype(jnp.bfloat16)
    fp["h_b1"] = jnp.concatenate([q1["l1_b"], q2["l1_b"]]).reshape(1, 2 * Hh).astype(jnp.float32)

    def blockdiag(a, b):  # torch (out,in) -> fused (in,out) block-diagonal
        m = jnp.zeros((2 * Hh, 2 * Hh), jnp.float32)
        m = m.at[0:Hh, 0:Hh].set(a.T)
        m = m.at[Hh:, Hh:].set(b.T)
        return m

    fp["h_w2"] = blockdiag(q1["l2_w"], q2["l2_w"]).astype(jnp.bfloat16)
    fp["h_b2"] = jnp.concatenate([q1["l2_b"], q2["l2_b"]]).reshape(1, 2 * Hh).astype(jnp.float32)
    fp["h_w3"] = blockdiag(q1["l3_w"], q2["l3_w"]).astype(jnp.bfloat16)
    fp["h_b3"] = jnp.concatenate([q1["l3_b"], q2["l3_b"]]).reshape(1, 2 * Hh).astype(jnp.float32)

    w4 = jnp.zeros((2 * Hh, 2), jnp.float32)
    w4 = w4.at[0:Hh, 0].set(q1["l4_w"][0])
    w4 = w4.at[Hh:, 1].set(q2["l4_w"][0])
    fp["h_w4"] = w4.astype(jnp.bfloat16)
    fp["h_b4"] = jnp.stack([q1["l4_b"][0], q2["l4_b"][0]]).reshape(1, 2).astype(jnp.float32)
    return fp


# ----------------------------------------------------------------------------
# Critic forward (4 pallas_calls total for both Q branches)
# ----------------------------------------------------------------------------
@jax.jit
def critic_forward(fp, s_nchw, a):
    # PyTorch inputs are NCHW; convert to NHWC and bf16 for the GEMM path.
    s = jnp.transpose(s_nchw, (0, 2, 3, 1)).astype(jnp.bfloat16)
    B = s.shape[0]

    h = pallas_conv2d_fused(s, fp["c1_w"], fp["c1_b"], 8, 8, 4)   # (B,20,20, 64)
    h = pallas_conv2d_fused(h, fp["c2_w"], fp["c2_b"], 4, 4, 2)   # (B, 9, 9,128)
    h = pallas_conv2d_fused(h, fp["c3_w"], fp["c3_b"], 3, 3, 1)   # (B, 7, 7,128)

    # Natural (H, W, [q1 64ch | q2 64ch]) flatten; the NCHW-flatten permutation
    # that torch.nn.Flatten implies is already folded into h_w1f's rows.
    feat = h.reshape(B, 7 * 7 * 128)

    q = pallas_twin_head(feat, a.astype(jnp.bfloat16), fp)        # (B, 2) f32
    return q[:, 0:1], q[:, 1:2]


# ----------------------------------------------------------------------------
if __name__ == "__main__":
    key = jax.random.PRNGKey(0)
    k_param, k_s, k_a = jax.random.split(key, 3)

    # feature_size=3136 in the reference module requires 84x84 spatial input.
    batch = 2
    state_dim = (4, 84, 84)
    action_dim = 4
    hidden_width = 32

    raw_params = init_critic_params(k_param, state_dim, action_dim, hidden_width)
    fused_params = prepare_fused_params(raw_params, hidden_width)

    s = jax.random.normal(k_s, (batch,) + state_dim, jnp.float32)  # NCHW
    a = jax.random.normal(k_a, (batch, action_dim), jnp.float32)

    q1, q2 = critic_forward(fused_params, s, a)
    jax.block_until_ready((q1, q2))
    assert q1.shape == (batch, 1) and q2.shape == (batch, 1)
    assert bool(jnp.all(jnp.isfinite(q1))) and bool(jnp.all(jnp.isfinite(q2)))
    print("KERNEL_OK")
</pallas_src>

<mosaic_0001>
module attributes {stable_mosaic.version = 11 : i64} {
  func.func @_gemm_bias_relu_kernel(%arg0: i32, %arg1: memref<512x256xbf16, #tpu.memory_space<vmem>>, %arg2: memref<256x64xbf16, #tpu.memory_space<vmem>>, %arg3: memref<1x64xf32, #tpu.memory_space<vmem>>, %arg4: memref<512x64xbf16, #tpu.memory_space<vmem>>) attributes {dimension_semantics = [#tpu.dimension_semantics<parallel>], iteration_bounds = array<i64: 2>, scalar_prefetch = 0 : i64, scratch_operands = 0 : i64, tpu.core_type = #tpu.core_type<tc>, window_params = [{transform_indices = @transform_0, window_bounds = array<i64: 512, 256>}, {pipeline_mode = #tpu.pipeline_mode<synchronous>, transform_indices = @transform_1, window_bounds = array<i64: 256, 64>}, {pipeline_mode = #tpu.pipeline_mode<synchronous>, transform_indices = @transform_2, window_bounds = array<i64: 1, 64>}, {transform_indices = @transform_3, window_bounds = array<i64: 512, 64>}]} {
    %c0 = arith.constant 0 : index
    %c0_0 = arith.constant 0 : index
    %0 = vector.load %arg1[%c0, %c0_0] : memref<512x256xbf16, #tpu.memory_space<vmem>>, vector<512x256xbf16>
    %c0_1 = arith.constant 0 : index
    %c0_2 = arith.constant 0 : index
    %1 = vector.load %arg2[%c0_1, %c0_2] : memref<256x64xbf16, #tpu.memory_space<vmem>>, vector<256x64xbf16>
    %cst = arith.constant dense<0.000000e+00> : vector<512x64xf32>
    %2 = tpu.matmul %0, %1, %cst {dimension_numbers = #tpu.dot_dimension_numbers<[1], [0], [0], [1], [0, 0, 1, 1], [], []>} : vector<512x256xbf16>, vector<256x64xbf16>, vector<512x64xf32> -> vector<512x64xf32>
    %c0_3 = arith.constant 0 : index
    %c0_4 = arith.constant 0 : index
    %3 = vector.load %arg3[%c0_3, %c0_4] : memref<1x64xf32, #tpu.memory_space<vmem>>, vector<1x64xf32>
    %4 = vector.broadcast %3 : vector<1x64xf32> to vector<512x64xf32>
    %5 = arith.addf %2, %4 : vector<512x64xf32>
    %cst_5 = arith.constant 0.000000e+00 : f32
    %6 = vector.broadcast %cst_5 : f32 to vector<512x64xf32>
    %7 = arith.maximumf %5, %6 : vector<512x64xf32>
    %8 = arith.truncf %7 : vector<512x64xf32> to vector<512x64xbf16>
    %c0_6 = arith.constant 0 : index
    %c0_7 = arith.constant 0 : index
    %9 = vector.load %arg4[%c0_6, %c0_7] : memref<512x64xbf16, #tpu.memory_space<vmem>>, vector<512x64xbf16>
    tpu.vector_store %arg4[%c0_6, %c0_7], %8 {strides = array<i32>} : memref<512x64xbf16, #tpu.memory_space<vmem>>, vector<512x64xbf16>,
    return
  }
  func.func @transform_0(%arg0: i32) -> (i32, i32) {
    %c0_i32 = arith.constant 0 : i32
    %c0_i32_0 = arith.constant 0 : i32
    return %arg0, %c0_i32 : i32, i32
  }
  func.func @transform_1(%arg0: i32) -> (i32, i32) {
    %c0_i32 = arith.constant 0 : i32
    %c0_i32_0 = arith.constant 0 : i32
    %c0_i32_1 = arith.constant 0 : i32
    return %c0_i32, %c0_i32_0 : i32, i32
  }
  func.func @transform_2(%arg0: i32) -> (i32, i32) {
    %c0_i32 = arith.constant 0 : i32
    %c0_i32_0 = arith.constant 0 : i32
    %c0_i32_1 = arith.constant 0 : i32
    return %c0_i32, %c0_i32_0 : i32, i32
  }
  func.func @transform_3(%arg0: i32) -> (i32, i32) {
    %c0_i32 = arith.constant 0 : i32
    %c0_i32_0 = arith.constant 0 : i32
    return %arg0, %c0_i32 : i32, i32
  }
}

module attributes {stable_mosaic.version = 11 : i64} {
  func.func @_gemm_bias_relu_kernel(%arg0: i32, %arg1: memref<162x1024xbf16, #tpu.memory_space<vmem>>, %arg2: memref<1024x128xbf16, #tpu.memory_space<vmem>>, %arg3: memref<1x128xf32, #tpu.memory_space<vmem>>, %arg4: memref<162x128xbf16, #tpu.memory_space<vmem>>) attributes {dimension_semantics = [#tpu.dimension_semantics<parallel>], iteration_bounds = array<i64: 1>, scalar_prefetch = 0 : i64, scratch_operands = 0 : i64, tpu.core_type = #tpu.core_type<tc>, window_params = [{transform_indices = @transform_0, window_bounds = array<i64: 162, 1024>}, {pipeline_mode = #tpu.pipeline_mode<synchronous>, transform_indices = @transform_1, window_bounds = array<i64: 1024, 128>}, {pipeline_mode = #tpu.pipeline_mode<synchronous>, transform_indices = @transform_2, window_bounds = array<i64: 1, 128>}, {transform_indices = @transform_3, window_bounds = array<i64: 162, 128>}]} {
    %c0 = arith.constant 0 : index
    %c0_0 = arith.constant 0 : index
    %0 = vector.load %arg1[%c0, %c0_0] : memref<162x1024xbf16, #tpu.memory_space<vmem>>, vector<162x1024xbf16>
    %c0_1 = arith.constant 0 : index
    %c0_2 = arith.constant 0 : index
    %1 = vector.load %arg2[%c0_1, %c0_2] : memref<1024x128xbf16, #tpu.memory_space<vmem>>, vector<1024x128xbf16>
    %cst = arith.constant dense<0.000000e+00> : vector<162x128xf32>
    %2 = tpu.matmul %0, %1, %cst {dimension_numbers = #tpu.dot_dimension_numbers<[1], [0], [0], [1], [0, 0, 1, 1], [], []>} : vector<162x1024xbf16>, vector<1024x128xbf16>, vector<162x128xf32> -> vector<162x128xf32>
    %c0_3 = arith.constant 0 : index
    %c0_4 = arith.constant 0 : index
    %3 = vector.load %arg3[%c0_3, %c0_4] : memref<1x128xf32, #tpu.memory_space<vmem>>, vector<1x128xf32>
    %4 = vector.broadcast %3 : vector<1x128xf32> to vector<162x128xf32>
    %5 = arith.addf %2, %4 : vector<162x128xf32>
    %cst_5 = arith.constant 0.000000e+00 : f32
    %6 = vector.broadcast %cst_5 : f32 to vector<162x128xf32>
    %7 = arith.maximumf %5, %6 : vector<162x128xf32>
    %8 = arith.truncf %7 : vector<162x128xf32> to vector<162x128xbf16>
    %c0_6 = arith.constant 0 : index
    %c0_7 = arith.constant 0 : index
    %9 = vector.load %arg4[%c0_6, %c0_7] : memref<162x128xbf16, #tpu.memory_space<vmem>>, vector<162x128xbf16>
    tpu.vector_store %arg4[%c0_6, %c0_7], %8 {strides = array<i32>} : memref<162x128xbf16, #tpu.memory_space<vmem>>, vector<162x128xbf16>,
    return
  }
  func.func @transform_0(%arg0: i32) -> (i32, i32) {
    %c0_i32 = arith.constant 0 : i32
    %c0_i32_0 = arith.constant 0 : i32
    return %arg0, %c0_i32 : i32, i32
  }
  func.func @transform_1(%arg0: i32) -> (i32, i32) {
    %c0_i32 = arith.constant 0 : i32
    %c0_i32_0 = arith.constant 0 : i32
    %c0_i32_1 = arith.constant 0 : i32
    return %c0_i32, %c0_i32_0 : i32, i32
  }
  func.func @transform_2(%arg0: i32) -> (i32, i32) {
    %c0_i32 = arith.constant 0 : i32
    %c0_i32_0 = arith.constant 0 : i32
    %c0_i32_1 = arith.constant 0 : i32
    return %c0_i32, %c0_i32_0 : i32, i32
  }
  func.func @transform_3(%arg0: i32) -> (i32, i32) {
    %c0_i32 = arith.constant 0 : i32
    %c0_i32_0 = arith.constant 0 : i32
    return %arg0, %c0_i32 : i32, i32
  }
}

module attributes {stable_mosaic.version = 11 : i64} {
  func.func @_gemm_bias_relu_kernel(%arg0: i32, %arg1: memref<98x1152xbf16, #tpu.memory_space<vmem>>, %arg2: memref<1152x128xbf16, #tpu.memory_space<vmem>>, %arg3: memref<1x128xf32, #tpu.memory_space<vmem>>, %arg4: memref<98x128xbf16, #tpu.memory_space<vmem>>) attributes {dimension_semantics = [#tpu.dimension_semantics<parallel>], iteration_bounds = array<i64: 1>, scalar_prefetch = 0 : i64, scratch_operands = 0 : i64, tpu.core_type = #tpu.core_type<tc>, window_params = [{transform_indices = @transform_0, window_bounds = array<i64: 98, 1152>}, {pipeline_mode = #tpu.pipeline_mode<synchronous>, transform_indices = @transform_1, window_bounds = array<i64: 1152, 128>}, {pipeline_mode = #tpu.pipeline_mode<synchronous>, transform_indices = @transform_2, window_bounds = array<i64: 1, 128>}, {transform_indices = @transform_3, window_bounds = array<i64: 98, 128>}]} {
    %c0 = arith.constant 0 : index
    %c0_0 = arith.constant 0 : index
    %0 = vector.load %arg1[%c0, %c0_0] : memref<98x1152xbf16, #tpu.memory_space<vmem>>, vector<98x1152xbf16>
    %c0_1 = arith.constant 0 : index
    %c0_2 = arith.constant 0 : index
    %1 = vector.load %arg2[%c0_1, %c0_2] : memref<1152x128xbf16, #tpu.memory_space<vmem>>, vector<1152x128xbf16>
    %cst = arith.constant dense<0.000000e+00> : vector<98x128xf32>
    %2 = tpu.matmul %0, %1, %cst {dimension_numbers = #tpu.dot_dimension_numbers<[1], [0], [0], [1], [0, 0, 1, 1], [], []>} : vector<98x1152xbf16>, vector<1152x128xbf16>, vector<98x128xf32> -> vector<98x128xf32>
    %c0_3 = arith.constant 0 : index
    %c0_4 = arith.constant 0 : index
    %3 = vector.load %arg3[%c0_3, %c0_4] : memref<1x128xf32, #tpu.memory_space<vmem>>, vector<1x128xf32>
    %4 = vector.broadcast %3 : vector<1x128xf32> to vector<98x128xf32>
    %5 = arith.addf %2, %4 : vector<98x128xf32>
    %cst_5 = arith.constant 0.000000e+00 : f32
    %6 = vector.broadcast %cst_5 : f32 to vector<98x128xf32>
    %7 = arith.maximumf %5, %6 : vector<98x128xf32>
    %8 = arith.truncf %7 : vector<98x128xf32> to vector<98x128xbf16>
    %c0_6 = arith.constant 0 : index
    %c0_7 = arith.constant 0 : index
    %9 = vector.load %arg4[%c0_6, %c0_7] : memref<98x128xbf16, #tpu.memory_space<vmem>>, vector<98x128xbf16>
    tpu.vector_store %arg4[%c0_6, %c0_7], %8 {strides = array<i32>} : memref<98x128xbf16, #tpu.memory_space<vmem>>, vector<98x128xbf16>,
    return
  }
  func.func @transform_0(%arg0: i32) -> (i32, i32) {
    %c0_i32 = arith.constant 0 : i32
    %c0_i32_0 = arith.constant 0 : i32
    return %arg0, %c0_i32 : i32, i32
  }
  func.func @transform_1(%arg0: i32) -> (i32, i32) {
    %c0_i32 = arith.constant 0 : i32
    %c0_i32_0 = arith.constant 0 : i32
    %c0_i32_1 = arith.constant 0 : i32
    return %c0_i32, %c0_i32_0 : i32, i32
  }
  func.func @transform_2(%arg0: i32) -> (i32, i32) {
    %c0_i32 = arith.constant 0 : i32
    %c0_i32_0 = arith.constant 0 : i32
    %c0_i32_1 = arith.constant 0 : i32
    return %c0_i32, %c0_i32_0 : i32, i32
  }
  func.func @transform_3(%arg0: i32) -> (i32, i32) {
    %c0_i32 = arith.constant 0 : i32
    %c0_i32_0 = arith.constant 0 : i32
    return %arg0, %c0_i32 : i32, i32
  }
}

module attributes {stable_mosaic.version = 11 : i64} {
  func.func @_twin_head_kernel(%arg0: i32, %arg1: memref<2x6272xbf16, #tpu.memory_space<vmem>>, %arg2: memref<2x4xbf16, #tpu.memory_space<vmem>>, %arg3: memref<6272x64xbf16, #tpu.memory_space<vmem>>, %arg4: memref<4x64xbf16, #tpu.memory_space<vmem>>, %arg5: memref<1x64xf32, #tpu.memory_space<vmem>>, %arg6: memref<64x64xbf16, #tpu.memory_space<vmem>>, %arg7: memref<1x64xf32, #tpu.memory_space<vmem>>, %arg8: memref<64x64xbf16, #tpu.memory_space<vmem>>, %arg9: memref<1x64xf32, #tpu.memory_space<vmem>>, %arg10: memref<64x2xbf16, #tpu.memory_space<vmem>>, %arg11: memref<1x2xf32, #tpu.memory_space<vmem>>, %arg12: memref<2x2xf32, #tpu.memory_space<vmem>>) attributes {dimension_semantics = [#tpu.dimension_semantics<parallel>], iteration_bounds = array<i64: 1>, scalar_prefetch = 0 : i64, scratch_operands = 0 : i64, tpu.core_type = #tpu.core_type<tc>, window_params = [{transform_indices = @transform_0, window_bounds = array<i64: 2, 6272>}, {transform_indices = @transform_1, window_bounds = array<i64: 2, 4>}, {pipeline_mode = #tpu.pipeline_mode<synchronous>, transform_indices = @transform_2, window_bounds = array<i64: 6272, 64>}, {pipeline_mode = #tpu.pipeline_mode<synchronous>, transform_indices = @transform_3, window_bounds = array<i64: 4, 64>}, {pipeline_mode = #tpu.pipeline_mode<synchronous>, transform_indices = @transform_4, window_bounds = array<i64: 1, 64>}, {pipeline_mode = #tpu.pipeline_mode<synchronous>, transform_indices = @transform_5, window_bounds = array<i64: 64, 64>}, {pipeline_mode = #tpu.pipeline_mode<synchronous>, transform_indices = @transform_6, window_bounds = array<i64: 1, 64>}, {pipeline_mode = #tpu.pipeline_mode<synchronous>, transform_indices = @transform_7, window_bounds = array<i64: 64, 64>}, {pipeline_mode = #tpu.pipeline_mode<synchronous>, transform_indices = @transform_8, window_bounds = array<i64: 1, 64>}, {pipeline_mode = #tpu.pipeline_mode<synchronous>, transform_indices = @transform_9, window_bounds = array<i64: 64, 2>}, {pipeline_mode = #tpu.pipeline_mode<synchronous>, transform_indices = @transform_10, window_bounds = array<i64: 1, 2>}, {transform_indices = @transform_11, window_bounds = array<i64: 2, 2>}]} {
    %c0 = arith.constant 0 : index
    %c0_0 = arith.constant 0 : index
    %0 = vector.load %arg1[%c0, %c0_0] : memref<2x6272xbf16, #tpu.memory_space<vmem>>, vector<2x6272xbf16>
    %c0_1 = arith.constant 0 : index
    %c0_2 = arith.constant 0 : index
    %1 = vector.load %arg3[%c0_1, %c0_2] : memref<6272x64xbf16, #tpu.memory_space<vmem>>, vector<6272x64xbf16>
    %cst = arith.constant dense<0.000000e+00> : vector<2x64xf32>
    %2 = tpu.matmul %0, %1, %cst {dimension_numbers = #tpu.dot_dimension_numbers<[1], [0], [0], [1], [0, 0, 1, 1], [], []>} : vector<2x6272xbf16>, vector<6272x64xbf16>, vector<2x64xf32> -> vector<2x64xf32>
    %c0_3 = arith.constant 0 : index
    %c0_4 = arith.constant 0 : index
    %3 = vector.load %arg2[%c0_3, %c0_4] : memref<2x4xbf16, #tpu.memory_space<vmem>>, vector<2x4xbf16>
    %c0_5 = arith.constant 0 : index
    %c0_6 = arith.constant 0 : index
    %4 = vector.load %arg4[%c0_5, %c0_6] : memref<4x64xbf16, #tpu.memory_space<vmem>>, vector<4x64xbf16>
    %cst_7 = arith.constant dense<0.000000e+00> : vector<2x64xf32>
    %5 = tpu.matmul %3, %4, %cst_7 {dimension_numbers = #tpu.dot_dimension_numbers<[1], [0], [0], [1], [0, 0, 1, 1], [], []>} : vector<2x4xbf16>, vector<4x64xbf16>, vector<2x64xf32> -> vector<2x64xf32>
    %6 = arith.addf %2, %5 : vector<2x64xf32>
    %c0_8 = arith.constant 0 : index
    %c0_9 = arith.constant 0 : index
    %7 = vector.load %arg5[%c0_8, %c0_9] : memref<1x64xf32, #tpu.memory_space<vmem>>, vector<1x64xf32>
    %8 = vector.broadcast %7 : vector<1x64xf32> to vector<2x64xf32>
    %9 = arith.addf %6, %8 : vector<2x64xf32>
    %cst_10 = arith.constant 0.000000e+00 : f32
    %10 = vector.broadcast %cst_10 : f32 to vector<2x64xf32>
    %11 = arith.maximumf %9, %10 : vector<2x64xf32>
    %12 = arith.truncf %11 : vector<2x64xf32> to vector<2x64xbf16>
    %c0_11 = arith.constant 0 : index
    %c0_12 = arith.constant 0 : index
    %13 = vector.load %arg6[%c0_11, %c0_12] : memref<64x64xbf16, #tpu.memory_space<vmem>>, vector<64x64xbf16>
    %cst_13 = arith.constant dense<0.000000e+00> : vector<2x64xf32>
    %14 = tpu.matmul %12, %13, %cst_13 {dimension_numbers = #tpu.dot_dimension_numbers<[1], [0], [0], [1], [0, 0, 1, 1], [], []>} : vector<2x64xbf16>, vector<64x64xbf16>, vector<2x64xf32> -> vector<2x64xf32>
    %c0_14 = arith.constant 0 : index
    %c0_15 = arith.constant 0 : index
    %15 = vector.load %arg7[%c0_14, %c0_15] : memref<1x64xf32, #tpu.memory_space<vmem>>, vector<1x64xf32>
    %16 = vector.broadcast %15 : vector<1x64xf32> to vector<2x64xf32>
    %17 = arith.addf %14, %16 : vector<2x64xf32>
    %cst_16 = arith.constant 0.000000e+00 : f32
    %18 = vector.broadcast %cst_16 : f32 to vector<2x64xf32>
    %19 = arith.maximumf %17, %18 : vector<2x64xf32>
    %20 = arith.truncf %19 : vector<2x64xf32> to vector<2x64xbf16>
    %c0_17 = arith.constant 0 : index
    %c0_18 = arith.constant 0 : index
    %21 = vector.load %arg8[%c0_17, %c0_18] : memref<64x64xbf16, #tpu.memory_space<vmem>>, vector<64x64xbf16>
    %cst_19 = arith.constant dense<0.000000e+00> : vector<2x64xf32>
    %22 = tpu.matmul %20, %21, %cst_19 {dimension_numbers = #tpu.dot_dimension_numbers<[1], [0], [0], [1], [0, 0, 1, 1], [], []>} : vector<2x64xbf16>, vector<64x64xbf16>, vector<2x64xf32> -> vector<2x64xf32>
    %c0_20 = arith.constant 0 : index
    %c0_21 = arith.constant 0 : index
    %23 = vector.load %arg9[%c0_20, %c0_21] : memref<1x64xf32, #tpu.memory_space<vmem>>, vector<1x64xf32>
    %24 = vector.broadcast %23 : vector<1x64xf32> to vector<2x64xf32>
    %25 = arith.addf %22, %24 : vector<2x64xf32>
    %cst_22 = arith.constant 0.000000e+00 : f32
    %26 = vector.broadcast %cst_22 : f32 to vector<2x64xf32>
    %27 = arith.maximumf %25, %26 : vector<2x64xf32>
    %28 = arith.truncf %27 : vector<2x64xf32> to vector<2x64xbf16>
    %c0_23 = arith.constant 0 : index
    %c0_24 = arith.constant 0 : index
    %29 = vector.load %arg10[%c0_23, %c0_24] : memref<64x2xbf16, #tpu.memory_space<vmem>>, vector<64x2xbf16>
    %cst_25 = arith.constant dense<0.000000e+00> : vector<2x2xf32>
    %30 = tpu.matmul %28, %29, %cst_25 {dimension_numbers = #tpu.dot_dimension_numbers<[1], [0], [0], [1], [0, 0, 1, 1], [], []>} : vector<2x64xbf16>, vector<64x2xbf16>, vector<2x2xf32> -> vector<2x2xf32>
    %c0_26 = arith.constant 0 : index
    %c0_27 = arith.constant 0 : index
    %31 = vector.load %arg11[%c0_26, %c0_27] : memref<1x2xf32, #tpu.memory_space<vmem>>, vector<1x2xf32>
    %32 = vector.broadcast %31 : vector<1x2xf32> to vector<2x2xf32>
    %33 = arith.addf %30, %32 : vector<2x2xf32>
    %c0_28 = arith.constant 0 : index
    %c0_29 = arith.constant 0 : index
    %34 = vector.load %arg12[%c0_28, %c0_29] : memref<2x2xf32, #tpu.memory_space<vmem>>, vector<2x2xf32>
    tpu.vector_store %arg12[%c0_28, %c0_29], %33 {strides = array<i32>} : memref<2x2xf32, #tpu.memory_space<vmem>>, vector<2x2xf32>,
    return
  }
  func.func @transform_0(%arg0: i32) -> (i32, i32) {
    %c0_i32 = arith.constant 0 : i32
    %c0_i32_0 = arith.constant 0 : i32
    return %arg0, %c0_i32 : i32, i32
  }
  func.func @transform_1(%arg0: i32) -> (i32, i32) {
    %c0_i32 = arith.constant 0 : i32
    %c0_i32_0 = arith.constant 0 : i32
    return %arg0, %c0_i32 : i32, i32
  }
  func.func @transform_2(%arg0: i32) -> (i32, i32) {
    %c0_i32 = arith.constant 0 : i32
    %c0_i32_0 = arith.constant 0 : i32
    %c0_i32_1 = arith.constant 0 : i32
    return %c0_i32, %c0_i32_0 : i32, i32
  }
  func.func @transform_3(%arg0: i32) -> (i32, i32) {
    %c0_i32 = arith.constant 0 : i32
    %c0_i32_0 = arith.constant 0 : i32
    %c0_i32_1 = arith.constant 0 : i32
    return %c0_i32, %c0_i32_0 : i32, i32
  }
  func.func @transform_4(%arg0: i32) -> (i32, i32) {
    %c0_i32 = arith.constant 0 : i32
    %c0_i32_0 = arith.constant 0 : i32
    %c0_i32_1 = arith.constant 0 : i32
    return %c0_i32, %c0_i32_0 : i32, i32
  }
  func.func @transform_5(%arg0: i32) -> (i32, i32) {
    %c0_i32 = arith.constant 0 : i32
    %c0_i32_0 = arith.constant 0 : i32
    %c0_i32_1 = arith.constant 0 : i32
    return %c0_i32, %c0_i32_0 : i32, i32
  }
  func.func @transform_6(%arg0: i32) -> (i32, i32) {
    %c0_i32 = arith.constant 0 : i32
    %c0_i32_0 = arith.constant 0 : i32
    %c0_i32_1 = arith.constant 0 : i32
    return %c0_i32, %c0_i32_0 : i32, i32
  }
  func.func @transform_7(%arg0: i32) -> (i32, i32) {
    %c0_i32 = arith.constant 0 : i32
    %c0_i32_0 = arith.constant 0 : i32
    %c0_i32_1 = arith.constant 0 : i32
    return %c0_i32, %c0_i32_0 : i32, i32
  }
  func.func @transform_8(%arg0: i32) -> (i32, i32) {
    %c0_i32 = arith.constant 0 : i32
    %c0_i32_0 = arith.constant 0 : i32
    %c0_i32_1 = arith.constant 0 : i32
    return %c0_i32, %c0_i32_0 : i32, i32
  }
  func.func @transform_9(%arg0: i32) -> (i32, i32) {
    %c0_i32 = arith.constant 0 : i32
    %c0_i32_0 = arith.constant 0 : i32
    %c0_i32_1 = arith.constant 0 : i32
    return %c0_i32, %c0_i32_0 : i32, i32
  }
  func.func @transform_10(%arg0: i32) -> (i32, i32) {
    %c0_i32 = arith.constant 0 : i32
    %c0_i32_0 = arith.constant 0 : i32
    %c0_i32_1 = arith.constant 0 : i32
    return %c0_i32, %c0_i32_0 : i32, i32
  }
  func.func @transform_11(%arg0: i32) -> (i32, i32) {
    %c0_i32 = arith.constant 0 : i32
    %c0_i32_0 = arith.constant 0 : i32
    return %arg0, %c0_i32 : i32, i32
  }
}

</mosaic_0001>

<bundles_post_ra>
// kernel: critic_forward.4
= control target key start
LH: loop header
LB: loop body
LE: loop exit
PB: predicated region body
PF: predicated region fallthrough
CT: control target
= control target key end

     0   :  { %s2440_s12 = smov 0   ;;  %s2442_s13 = smov 0   ;;  %s3022_s0 = inlined_call_operand.vmem [shape: bf16[800,256], index: 0, kind: input, shape index: {}]   ;;  %s3023_s1 = inlined_call_operand.vmem [shape: bf16[256,64], index: 1, kind: input, shape index: {}]   ;;  %s3024_s2 = inlined_call_operand.vmem [shape: f32[1,64], index: 2, kind: input, shape index: {}]   ;;  %s3025_s3 = inlined_call_operand.vmem [shape: bf16[800,64], index: 3, kind: output, shape index: {}]  }
   0x1   :  { %s2444_s14 = smov 0  }
   0x2 LB: > { %s2453_s15 = sadd.s32 4294967295, %s2385_s14   ;;  %s2455_s16 = sadd.s32 1, %s2385_s14   ;;  %s2385_s14 = sphi %s2444_s14, %s3032_s14   ;;  %s2381_s13 = sphi %s2442_s13, %s3031_s13   ;;  %s2377_s12 = sphi %s2440_s12, %s3030_s12  }
   0x3   : > { %s85_s17 = ssub.s32 %s2385_s14, %s2455_s16  ;;  %s88_s18 = sadd.s32 1, %s2381_s13 }
   0x4   : > { %p86_p0 = scmp.eq.s32.totalorder %s85_s17, 0  ;;  %p98_p1 = scmp.ne.s32.totalorder %s2381_s13, %s2377_s12 }
   0x5   : > { %p99_p2 = scmp.eq.s32.totalorder %s2453_s15, 1  ;;  %p1863_p3 = scmp.ge.s32.totalorder %s2385_s14, 1 }
   0x6   : > { %s2463_s19 = scalar_select %p86_p0, %s2381_s13, %s88_s18  }
   0x7   : > { %p2465_p4 = por %p99_p2, %p98_p1  ;;  %p149_p5 = scmp.lt.s32.totalorder %s2385_s14, 3 }
   0x9   : > { %p150_p6 = pnand %p1863_p3, %p149_p5 }
   0xa   : > { %v2219_v0 = vld [vmem:[%s3023_s1] sm:$0xff] (!%p150_p6)   ;;  %v2419_v1 = vmov (!%p150_p6), 0   ;;  %s2475_s23 = sshll.u32 (!%p150_p6), %s2453_s15, 6  ;;  %v2220_v2 = vld [vmem:[%s3023_s1 + $0x8] sm:$0xff] (!%p150_p6)   ;;  %v2221_v3 = vld [vmem:[%s3023_s1 + $0x10] sm:$0xff] (!%p150_p6)   ;;  %s175_s17 = sand.u32 (!%p150_p6), 1, %s2377_s12  }
   0xb   : > { %153 = sbr.rel (%p150_p6) target bundleno = 507 (0x1fb), region = 32  ;;  %720 = vmatprep.subr.bf16.mxu0 (!%p150_p6), %v2419_v1  ;;  %2098 = vmatprep.subr.bf16.mxu1 (!%p150_p6), %v2419_v1  ;;  %p184_p7 = scmp.lt.s32.totalorder (!%p150_p6), %s2475_s23, 99  ;;  %v2222_v4 = vld [vmem:[%s3023_s1 + $0x18] sm:$0xff] (!%p150_p6)   ;;  %v2223_v5 = vld [vmem:[%s3023_s1 + $0x20] sm:$0xff] (!%p150_p6)   ;;  %v2224_v7 = vld [vmem:[%s3023_s1 + $0x28] sm:$0xff] (!%p150_p6)   ;;  %vm1329_vm0 = vcmask (!%p150_p6), 519168  }
   0xc   : > { %721 = vmatpush1.bf16.msra.mxu0 (!%p150_p6), %v2219_v0  ;;  %2114 = vmatpush1.bf16.msra.mxu1 (!%p150_p6), %v2219_v0  ;;  %v2225_v9 = vld [vmem:[%s3023_s1 + $0x30] sm:$0xff] (!%p150_p6)   ;;  %v2226_v10 = vld [vmem:[%s3023_s1 + $0x38] sm:$0xff] (!%p150_p6)   ;;  %v2227_v11 = vld [vmem:[%s3023_s1 + $0x40] sm:$0xff] (!%p150_p6)   ;;  %s1864_s22 = sshll.u32 (!%p150_p6), %s175_s17, 8 }
   0xd   : > { %722 = vmatprep.subr.bf16.mxu0 (!%p150_p6), %v2419_v1  ;;  %2099 = vmatprep.subr.bf16.mxu1 (!%p150_p6), %v2419_v1  ;;  %v2228_v12 = vld [vmem:[%s3023_s1 + $0x48] sm:$0xff] (!%p150_p6)   ;;  %v2229_v13 = vld [vmem:[%s3023_s1 + $0x50] sm:$0xff] (!%p150_p6)   ;;  %v2230_v14 = vld [vmem:[%s3023_s1 + $0x58] sm:$0xff] (!%p150_p6)   ;;  %s2633_s12 = scalar_lea.vmem (!%p150_p6), [#allocation2], %s1864_s22  }
   0xe   : > { %v2231_v15 = vld [vmem:[%s3023_s1 + $0x60] sm:$0xff] (!%p150_p6)   ;;  %v2232_v16 = vld [vmem:[%s3023_s1 + $0x68] sm:$0xff] (!%p150_p6)   ;;  %v2233_v17 = vld [vmem:[%s3023_s1 + $0x70] sm:$0xff] (!%p150_p6)  }
   0xf   : > { %v2234_v18 = vld [vmem:[%s3023_s1 + $0x78] sm:$0xff] (!%p150_p6)  }
  0x10   : > { %723 = vmatpush1.bf16.msra.mxu0 (!%p150_p6), %v2220_v2  ;;  %2115 = vmatpush1.bf16.msra.mxu1 (!%p150_p6), %v2220_v2 }
  0x11   : > { %724 = vmatprep.subr.bf16.mxu0 (!%p150_p6), %v2419_v1  ;;  %2100 = vmatprep.subr.bf16.mxu1 (!%p150_p6), %v2419_v1 }
  0x12   : > { %s185_s28 = scalar_select %p184_p7, %s2475_s23, 99 }
  0x13   : > { %s2095_s24 = sshll.u32 (%p2465_p4), %s2453_s15, 8 }
  0x14   : > { %725 = vmatpush1.bf16.msra.mxu0 %v2221_v3  ;;  %2116 = vmatpush1.bf16.msra.mxu1 %v2221_v3  ;;  %s2030_s4 = sshll.u32 %s185_s28, 3  ;;  %s2830_s27 = scalar_lea.vmem (%p2465_p4), %s3025_s3, %s2095_s24  }
  0x15   : > { %726 = vmatprep.subr.bf16.mxu0 %v2419_v1  ;;  %2101 = vmatprep.subr.bf16.mxu1 %v2419_v1  ;;  %s2500_s9 = scalar_lea.vmem %s3022_s0, %s2030_s4 }
  0x16   : > { %v2237_v6 = vld [vmem:[%s2500_s9 + $0x4] ss:$8 sps:$4 sm:$0xff]   ;;  %v2235_v19 = vld [vmem:[%s2500_s9] ss:$8 sps:$4 sm:$0xff]   ;;  %v2241_v21 = vld [vmem:[%s2500_s9 + $0x14] ss:$8 sps:$4 sm:$0xff]  }
  0x17   : > { %v2240_v8 = vld [vmem:[%s2500_s9 + $0x104] ss:$8 sps:$4 sm:$0xff]   ;;  %752 = vmatprep.mubr.bf16.mxu0 %v2237_v6  ;;  %v2238_v20 = vld [vmem:[%s2500_s9 + $0x100] ss:$8 sps:$4 sm:$0xff]   ;;  %v2243_v22 = vld [vmem:[%s2500_s9 + $0x114] ss:$8 sps:$4 sm:$0xff]  }
  0x18   : > { %727 = vmatpush1.bf16.msra.mxu0 %v2222_v4  ;;  %2117 = vmatpush1.bf16.msra.mxu1 %v2222_v4  ;;  %v2245_v23 = vld [vmem:[%s2500_s9 + $0x10] ss:$8 sps:$4 sm:$0xff]   ;;  %v2247_v25 = vld [vmem:[%s2500_s9 + $0x24] ss:$8 sps:$4 sm:$0xff]   ;;  %v2251_v27 = vld [vmem:[%s2500_s9 + $0x20] ss:$8 sps:$4 sm:$0xff]  }
  0x19   : > { %728 = vmatprep.subr.bf16.mxu0 %v2419_v1  ;;  %2102 = vmatprep.subr.bf16.mxu1 %v2419_v1  ;;  %v2246_v24 = vld [vmem:[%s2500_s9 + $0x110] ss:$8 sps:$4 sm:$0xff]   ;;  %v2249_v26 = vld [vmem:[%s2500_s9 + $0x124] ss:$8 sps:$4 sm:$0xff]   ;;  %v2252_v28 = vld [vmem:[%s2500_s9 + $0x120] ss:$8 sps:$4 sm:$0xff]  }
  0x1a   : > { %880 = vmatprep.mubr.bf16.mxu1 %v2240_v8  ;;  %v2253_v29 = vld [vmem:[%s2500_s9 + $0x34] ss:$8 sps:$4 sm:$0xff]   ;;  %v2257_v31 = vld [vmem:[%s2500_s9 + $0x30] ss:$8 sps:$4 sm:$0xff]   ;;  %v2259_v33 = vld [vmem:[%s2500_s9 + $0x44] ss:$8 sps:$4 sm:$0xff]  }
  0x1b   : > { %v2255_v30 = vld [vmem:[%s2500_s9 + $0x134] ss:$8 sps:$4 sm:$0xff]   ;;  %v2258_v32 = vld [vmem:[%s2500_s9 + $0x130] ss:$8 sps:$4 sm:$0xff]   ;;  %v2261_v34 = vld [vmem:[%s2500_s9 + $0x144] ss:$8 sps:$4 sm:$0xff]  }
  0x1c   : > { %729 = vmatpush1.bf16.msra.mxu0 %v2223_v5  ;;  %2118 = vmatpush1.bf16.msra.mxu1 %v2223_v5  ;;  %v2263_v35 = vld [vmem:[%s2500_s9 + $0x40] ss:$8 sps:$4 sm:$0xff]   ;;  %v2265_v37 = vld [vmem:[%s2500_s9 + $0x54] ss:$8 sps:$4 sm:$0xff]   ;;  %v2269_v39 = vld [vmem:[%s2500_s9 + $0x50] ss:$8 sps:$4 sm:$0xff]  }
  0x1d   : > { %730 = vmatprep.subr.bf16.mxu0 %v2419_v1  ;;  %2103 = vmatprep.subr.bf16.mxu1 %v2419_v1  ;;  %v2264_v36 = vld [vmem:[%s2500_s9 + $0x140] ss:$8 sps:$4 sm:$0xff]   ;;  %v2267_v38 = vld [vmem:[%s2500_s9 + $0x154] ss:$8 sps:$4 sm:$0xff]   ;;  %v2270_v40 = vld [vmem:[%s2500_s9 + $0x150] ss:$8 sps:$4 sm:$0xff]  }
  0x1e   : > { %v2271_v41 = vld [vmem:[%s2500_s9 + $0x64] ss:$8 sps:$4 sm:$0xff]   ;;  %v2275_v43 = vld [vmem:[%s2500_s9 + $0x60] ss:$8 sps:$4 sm:$0xff]   ;;  %v2277_v45 = vld [vmem:[%s2500_s9 + $0x74] ss:$8 sps:$4 sm:$0xff]  }
  0x1f   : > { %v2273_v42 = vld [vmem:[%s2500_s9 + $0x164] ss:$8 sps:$4 sm:$0xff]   ;;  %v2276_v44 = vld [vmem:[%s2500_s9 + $0x160] ss:$8 sps:$4 sm:$0xff]   ;;  %v2279_v46 = vld [vmem:[%s2500_s9 + $0x174] ss:$8 sps:$4 sm:$0xff]  }
  0x20   : > { %731 = vmatpush1.bf16.msra.mxu0 %v2224_v7  ;;  %2119 = vmatpush1.bf16.msra.mxu1 %v2224_v7  ;;  %v2281_v47 = vld [vmem:[%s2500_s9 + $0x70] ss:$8 sps:$4 sm:$0xff]   ;;  %v2283_v49 = vld [vmem:[%s2500_s9 + $0x84] ss:$8 sps:$4 sm:$0xff]   ;;  %v2287_v51 = vld [vmem:[%s2500_s9 + $0x80] ss:$8 sps:$4 sm:$0xff]  }
  0x21   : > { %732 = vmatprep.subr.bf16.mxu0 %v2419_v1  ;;  %2104 = vmatprep.subr.bf16.mxu1 %v2419_v1  ;;  %v2282_v48 = vld [vmem:[%s2500_s9 + $0x170] ss:$8 sps:$4 sm:$0xff]   ;;  %v2285_v50 = vld [vmem:[%s2500_s9 + $0x184] ss:$8 sps:$4 sm:$0xff]   ;;  %v2288_v52 = vld [vmem:[%s2500_s9 + $0x180] ss:$8 sps:$4 sm:$0xff]  }
  0x22   : > { %v2289_v53 = vld [vmem:[%s2500_s9 + $0x94] ss:$8 sps:$4 sm:$0xff]   ;;  %v2293_v55 = vld [vmem:[%s2500_s9 + $0x90] ss:$8 sps:$4 sm:$0xff]   ;;  %v2295_v57 = vld [vmem:[%s2500_s9 + $0xa4] ss:$8 sps:$4 sm:$0xff]  }
  0x23   : > { %v2291_v54 = vld [vmem:[%s2500_s9 + $0x194] ss:$8 sps:$4 sm:$0xff]   ;;  %v2294_v56 = vld [vmem:[%s2500_s9 + $0x190] ss:$8 sps:$4 sm:$0xff]   ;;  %v2297_v58 = vld [vmem:[%s2500_s9 + $0x1a4] ss:$8 sps:$4 sm:$0xff]  }
  0x24   : > { %733 = vmatpush1.bf16.msra.mxu0 %v2225_v9  ;;  %2120 = vmatpush1.bf16.msra.mxu1 %v2225_v9  ;;  %v2299_v59 = vld [vmem:[%s2500_s9 + $0xa0] ss:$8 sps:$4 sm:$0xff]   ;;  %v2301_v61 = vld [vmem:[%s2500_s9 + $0xb4] ss:$8 sps:$4 sm:$0xff]   ;;  %v2305_v63 = vld [vmem:[%s2500_s9 + $0xb0] ss:$8 sps:$4 sm:$0xff]  }
  0x25   : > { %734 = vmatprep.subr.bf16.mxu0 %v2419_v1  ;;  %2105 = vmatprep.subr.bf16.mxu1 %v2419_v1  ;;  %v2300_v60 = vld [vmem:[%s2500_s9 + $0x1a0] ss:$8 sps:$4 sm:$0xff]   ;;  %v2303_v62 = vld [vmem:[%s2500_s9 + $0x1b4] ss:$8 sps:$4 sm:$0xff]   ;;  %v2306_v0 = vld [vmem:[%s2500_s9 + $0x1b0] ss:$8 sps:$4 sm:$0xff]  }
  0x26   : > { %v2309_v2 = vld [vmem:[%s2500_s9 + $0x1c4] ss:$8 sps:$4 sm:$0xff]   ;;  %v2311_v3 = vld [vmem:[%s2500_s9 + $0xc0] ss:$8 sps:$4 sm:$0xff]   ;;  %v2313_v5 = vld [vmem:[%s2500_s9 + $0xd4] ss:$8 sps:$4 sm:$0xff]  }
  0x27   : > { %v2312_v4 = vld [vmem:[%s2500_s9 + $0x1c0] ss:$8 sps:$4 sm:$0xff]   ;;  %v2315_v6 = vld [vmem:[%s2500_s9 + $0x1d4] ss:$8 sps:$4 sm:$0xff]   ;;  %v2317_v7 = vld [vmem:[%s2500_s9 + $0xd0] ss:$8 sps:$4 sm:$0xff]  }
  0x28   : > { %735 = vmatpush1.bf16.msra.mxu0 %v2226_v10  ;;  %2121 = vmatpush1.bf16.msra.mxu1 %v2226_v10  ;;  %v2318_v8 = vld [vmem:[%s2500_s9 + $0x1d0] ss:$8 sps:$4 sm:$0xff]   ;;  %v2319_v9 = vld [vmem:[%s2500_s9 + $0xe4] ss:$8 sps:$4 sm:$0xff]  }
  0x29   : > { %736 = vmatprep.subr.bf16.mxu0 %v2419_v1  ;;  %2106 = vmatprep.subr.bf16.mxu1 %v2419_v1  ;;  %v2321_v10 = vld [vmem:[%s2500_s9 + $0x1e4] ss:$8 sps:$4 sm:$0xff]  }
  0x2c   : > { %737 = vmatpush1.bf16.msra.mxu0 %v2227_v11  ;;  %2122 = vmatpush1.bf16.msra.mxu1 %v2227_v11  ;;  %v2323_v11 = vld [vmem:[%s2500_s9 + $0xe0] ss:$8 sps:$4 sm:$0xff]  }
  0x2d   : > { %738 = vmatprep.subr.bf16.mxu0 %v2419_v1  ;;  %2107 = vmatprep.subr.bf16.mxu1 %v2419_v1 }
  0x30   : > { %739 = vmatpush1.bf16.msra.mxu0 %v2228_v12  ;;  %2123 = vmatpush1.bf16.msra.mxu1 %v2228_v12  ;;  %v2324_v12 = vld [vmem:[%s2500_s9 + $0x1e0] ss:$8 sps:$4 sm:$0xff]  }
  0x31   : > { %740 = vmatprep.subr.bf16.mxu0 %v2419_v1  ;;  %2108 = vmatprep.subr.bf16.mxu1 %v2419_v1 }
  0x34   : > { %741 = vmatpush1.bf16.msra.mxu0 %v2229_v13  ;;  %2124 = vmatpush1.bf16.msra.mxu1 %v2229_v13  ;;  %v2325_v13 = vld [vmem:[%s2500_s9 + $0xf4] ss:$8 sps:$4 sm:$0xff]  }
  0x35   : > { %742 = vmatprep.subr.bf16.mxu0 %v2419_v1  ;;  %2109 = vmatprep.subr.bf16.mxu1 %v2419_v1 }
  0x38   : > { %743 = vmatpush1.bf16.msra.mxu0 %v2230_v14  ;;  %2125 = vmatpush1.bf16.msra.mxu1 %v2230_v14  ;;  %v2327_v14 = vld [vmem:[%s2500_s9 + $0x1f4] ss:$8 sps:$4 sm:$0xff]  }
  0x39   : > { %744 = vmatprep.subr.bf16.mxu0 %v2419_v1  ;;  %2110 = vmatprep.subr.bf16.mxu1 %v2419_v1 }
  0x3c   : > { %745 = vmatpush1.bf16.msra.mxu0 %v2231_v15  ;;  %2126 = vmatpush1.bf16.msra.mxu1 %v2231_v15  ;;  %v2329_v15 = vld [vmem:[%s2500_s9 + $0xf0] ss:$8 sps:$4 sm:$0xff]  }
  0x3d   : > { %746 = vmatprep.subr.bf16.mxu0 %v2419_v1  ;;  %2111 = vmatprep.subr.bf16.mxu1 %v2419_v1 }
  0x40   : > { %747 = vmatpush1.bf16.msra.mxu0 %v2232_v16  ;;  %2127 = vmatpush1.bf16.msra.mxu1 %v2232_v16  ;;  %v2330_v16 = vld [vmem:[%s2500_s9 + $0x1f0] ss:$8 sps:$4 sm:$0xff]  }
  0x41   : > { %748 = vmatprep.subr.bf16.mxu0 %v2419_v1  ;;  %2112 = vmatprep.subr.bf16.mxu1 %v2419_v1 }
  0x44   : > { %749 = vmatpush1.bf16.msra.mxu0 %v2233_v17  ;;  %2128 = vmatpush1.bf16.msra.mxu1 %v2233_v17  ;;  %v2627_v17 = vld [vmem:[%s3024_s2] ss:$0 sm:$0xff] }
  0x45   : > { %750 = vmatprep.subr.bf16.mxu0 %v2419_v1  ;;  %2113 = vmatprep.subr.bf16.mxu1 %v2419_v1  ;;  %v2307_v1 = vld [vmem:[%s2500_s9 + $0xc4] ss:$8 sps:$4 sm:$0xff]   ;;  %s1402_s9 = ssub.s32 (%p2465_p4), 100, %s2475_s23 }
  0x46   : > { %p1403_p8 = scmp.lt.s32.totalorder (%p2465_p4), %s1402_s9, 64 }
  0x48   : > { %751 = vmatpush1.bf16.msra.mxu0 %v2234_v18  ;;  %2129 = vmatpush1.bf16.msra.mxu1 %v2234_v18 }
  0x4b   : > { %753 = vmatmul.mubr.bf16.vlgmr.msra.gmra.mrb[0].mxu0 %v2235_v19  ;;  %881 = vmatmul.mubr.bf16.vlgmr.msra.gmra.mrb[0].mxu1 %v2238_v20 }
  0x4c   : > { %760 = vmatprep.mubr.bf16.mxu0 %v2241_v21  ;;  %888 = vmatprep.mubr.bf16.mxu1 %v2243_v22 }
  0x53   : > { %761 = vmatmul.mubr.bf16.gmra.mrb[4].mxu0 %v2245_v23  ;;  %889 = vmatmul.mubr.bf16.gmra.mrb[4].mxu1 %v2246_v24 }
  0x54   : > { %768 = vmatprep.mubr.bf16.mxu0 %v2247_v25  ;;  %896 = vmatprep.mubr.bf16.mxu1 %v2249_v26 }
  0x5b   : > { %769 = vmatmul.mubr.bf16.gmra.mrb[8].mxu0 %v2251_v27  ;;  %897 = vmatmul.mubr.bf16.gmra.mrb[8].mxu1 %v2252_v28 }
  0x5c   : > { %776 = vmatprep.mubr.bf16.mxu0 %v2253_v29  ;;  %904 = vmatprep.mubr.bf16.mxu1 %v2255_v30 }
  0x63   : > { %777 = vmatmul.mubr.bf16.gmra.mrb[12].mxu0 %v2257_v31  ;;  %905 = vmatmul.mubr.bf16.gmra.mrb[12].mxu1 %v2258_v32 }
  0x64   : > { %784 = vmatprep.mubr.bf16.mxu0 %v2259_v33  ;;  %912 = vmatprep.mubr.bf16.mxu1 %v2261_v34 }
  0x6b   : > { %785 = vmatmul.mubr.bf16.gmra.mrb[16].mxu0 %v2263_v35  ;;  %913 = vmatmul.mubr.bf16.gmra.mrb[16].mxu1 %v2264_v36 }
  0x6c   : > { %792 = vmatprep.mubr.bf16.mxu0 %v2265_v37  ;;  %920 = vmatprep.mubr.bf16.mxu1 %v2267_v38 }
  0x73   : > { %793 = vmatmul.mubr.bf16.gmra.mrb[20].mxu0 %v2269_v39  ;;  %921 = vmatmul.mubr.bf16.gmra.mrb[20].mxu1 %v2270_v40 }
  0x74   : > { %800 = vmatprep.mubr.bf16.mxu0 %v2271_v41  ;;  %928 = vmatprep.mubr.bf16.mxu1 %v2273_v42 }
  0x7b   : > { %801 = vmatmul.mubr.bf16.gmra.mrb[24].mxu0 %v2275_v43  ;;  %929 = vmatmul.mubr.bf16.gmra.mrb[24].mxu1 %v2276_v44 }
  0x7c   : > { %808 = vmatprep.mubr.bf16.mxu0 %v2277_v45  ;;  %936 = vmatprep.mubr.bf16.mxu1 %v2279_v46 }
  0x83   : > { %809 = vmatmul.mubr.bf16.gmra.mrb[28].mxu0 %v2281_v47  ;;  %937 = vmatmul.mubr.bf16.gmra.mrb[28].mxu1 %v2282_v48 }
  0x84   : > { %816 = vmatprep.mubr.bf16.mxu0 %v2283_v49  ;;  %944 = vmatprep.mubr.bf16.mxu1 %v2285_v50 }
  0x8b   : > { %817 = vmatmul.mubr.bf16.gmra.mrb[32].mxu0 %v2287_v51  ;;  %945 = vmatmul.mubr.bf16.gmra.mrb[32].mxu1 %v2288_v52 }
  0x8c   : > { %824 = vmatprep.mubr.bf16.mxu0 %v2289_v53  ;;  %952 = vmatprep.mubr.bf16.mxu1 %v2291_v54 }
  0x93   : > { %825 = vmatmul.mubr.bf16.gmra.mrb[36].mxu0 %v2293_v55  ;;  %953 = vmatmul.mubr.bf16.gmra.mrb[36].mxu1 %v2294_v56 }
  0x94   : > { %832 = vmatprep.mubr.bf16.mxu0 %v2295_v57  ;;  %960 = vmatprep.mubr.bf16.mxu1 %v2297_v58 }
  0x9b   : > { %833 = vmatmul.mubr.bf16.gmra.mrb[40].mxu0 %v2299_v59  ;;  %961 = vmatmul.mubr.bf16.gmra.mrb[40].mxu1 %v2300_v60 }
  0x9c   : > { %840 = vmatprep.mubr.bf16.mxu0 %v2301_v61  ;;  %968 = vmatprep.mubr.bf16.mxu1 %v2303_v62 }
  0xa3   : > { %841 = vmatmul.mubr.bf16.gmra.mrb[44].mxu0 %v2305_v63  ;;  %969 = vmatmul.mubr.bf16.gmra.mrb[44].mxu1 %v2306_v0 }
  0xa4   : > { %848 = vmatprep.mubr.bf16.mxu0 %v2307_v1  ;;  %976 = vmatprep.mubr.bf16.mxu1 %v2309_v2 }
  0xab   : > { %849 = vmatmul.mubr.bf16.gmra.mrb[48].mxu0 %v2311_v3  ;;  %977 = vmatmul.mubr.bf16.gmra.mrb[48].mxu1 %v2312_v4 }
  0xac   : > { %856 = vmatprep.mubr.bf16.mxu0 %v2313_v5  ;;  %984 = vmatprep.mubr.bf16.mxu1 %v2315_v6 }
  0xb3   : > { %857 = vmatmul.mubr.bf16.gmra.mrb[52].mxu0 %v2317_v7  ;;  %985 = vmatmul.mubr.bf16.gmra.mrb[52].mxu1 %v2318_v8 }
  0xb4   : > { %864 = vmatprep.mubr.bf16.mxu0 %v2319_v9  ;;  %992 = vmatprep.mubr.bf16.mxu1 %v2321_v10 }
  0xbb   : > { %865 = vmatmul.mubr.bf16.gmra.mrb[56].mxu0 %v2323_v11  ;;  %993 = vmatmul.mubr.bf16.gmra.mrb[56].mxu1 %v2324_v12 }
  0xbc   : > { %872 = vmatprep.mubr.bf16.mxu0 %v2325_v13  ;;  %1000 = vmatprep.mubr.bf16.mxu1 %v2327_v14 }
  0xc3   : > { %873 = vmatmul.mubr.bf16.gmra.mrb[60].mxu0 %v2329_v15  ;;  %1001 = vmatmul.mubr.bf16.gmra.mrb[60].mxu1 %v2330_v16 }
 0x11e   : > { %v754_v18 = vpop.f32.mrb[0].mxu0  ;;  %v882_v19 = vpop.f32.mrb[0].mxu1 }
 0x11f   : > { %v755_v20 = vadd.f32 %v2627_v17, %v754_v18  ;;  %v883_v21 = vadd.f32 %v2627_v17, %v882_v19  ;;  %v756_v22 = vpop.f32.mrb[1].mxu0  ;;  %v884_v23 = vpop.f32.mrb[1].mxu1 }
 0x120   : > { %v757_v24 = vpop.f32.mrb[2].mxu0  ;;  %v885_v25 = vpop.f32.mrb[2].mxu1 }
 0x121   : > { %v1009_v26 = vmax.f32 %v755_v20, 0.0  ;;  %v1041_v27 = vmax.f32 %v883_v21, 0.0  ;;  %v758_v28 = vadd.f32 %v2627_v17, %v757_v24  ;;  %v886_v29 = vadd.f32 %v2627_v17, %v885_v25  ;;  %v759_v30 = vpop.f32.mrb[3].mxu0  ;;  %v887_v31 = vpop.f32.mrb[3].mxu1 }
 0x123   : > { %v2031_v32 = vpack.c.bf16 %v1009_v26, %v1009_v26  ;;  %v2063_v33 = vpack.c.bf16 %v1041_v27, %v1041_v27  ;;  %v1010_v34 = vmax.f32 %v758_v28, 0.0  ;;  %v1042_v35 = vmax.f32 %v886_v29, 0.0 }
 0x125   : > { %1330 = vst.msk [vmem:[%s2633_s12] sm:$0xf] %vm1329_vm0, %v2031_v32  ;;  %1362 = vst.msk [vmem:[%s2633_s12 + $0x80] sm:$0xf] %vm1329_vm0, %v2063_v33  ;;  %v2032_v36 = vpack.c.bf16 %v1010_v34, %v1010_v34  ;;  %v2064_v37 = vpack.c.bf16 %v1042_v35, %v1042_v35 }
 0x126   : > { %v762_v38 = vpop.f32.mrb[4].mxu0  ;;  %v890_v39 = vpop.f32.mrb[4].mxu1 }
 0x127   : > { %1331 = vst.msk [vmem:[%s2633_s12 + $0x4] sm:$0xf] %vm1329_vm0, %v2032_v36  ;;  %1363 = vst.msk [vmem:[%s2633_s12 + $0x84] sm:$0xf] %vm1329_vm0, %v2064_v37  ;;  %v763_v40 = vadd.f32 %v2627_v17, %v762_v38  ;;  %v891_v41 = vadd.f32 %v2627_v17, %v890_v39  ;;  %v764_v42 = vpop.f32.mrb[5].mxu0  ;;  %v892_v43 = vpop.f32.mrb[5].mxu1 }
 0x128   : > { %v765_v44 = vpop.f32.mrb[6].mxu0  ;;  %v893_v45 = vpop.f32.mrb[6].mxu1 }
 0x129   : > { %v1011_v46 = vmax.f32 %v763_v40, 0.0  ;;  %v1043_v47 = vmax.f32 %v891_v41, 0.0  ;;  %v766_v48 = vadd.f32 %v2627_v17, %v765_v44  ;;  %v894_v49 = vadd.f32 %v2627_v17, %v893_v45  ;;  %v767_v50 = vpop.f32.mrb[7].mxu0  ;;  %v895_v51 = vpop.f32.mrb[7].mxu1 }
 0x12b   : > { %v2033_v52 = vpack.c.bf16 %v1011_v46, %v1011_v46  ;;  %v2065_v53 = vpack.c.bf16 %v1043_v47, %v1043_v47  ;;  %v1012_v54 = vmax.f32 %v766_v48, 0.0  ;;  %v1044_v55 = vmax.f32 %v894_v49, 0.0 }
 0x12d   : > { %1332 = vst.msk [vmem:[%s2633_s12 + $0x8] sm:$0xf] %vm1329_vm0, %v2033_v52  ;;  %1364 = vst.msk [vmem:[%s2633_s12 + $0x88] sm:$0xf] %vm1329_vm0, %v2065_v53  ;;  %v2034_v56 = vpack.c.bf16 %v1012_v54, %v1012_v54  ;;  %v2066_v57 = vpack.c.bf16 %v1044_v55, %v1044_v55 }
 0x12e   : > { %v770_v58 = vpop.f32.mrb[8].mxu0  ;;  %v898_v59 = vpop.f32.mrb[8].mxu1 }
 0x12f   : > { %1333 = vst.msk [vmem:[%s2633_s12 + $0xc] sm:$0xf] %vm1329_vm0, %v2034_v56  ;;  %1365 = vst.msk [vmem:[%s2633_s12 + $0x8c] sm:$0xf] %vm1329_vm0, %v2066_v57  ;;  %v771_v60 = vadd.f32 %v2627_v17, %v770_v58  ;;  %v899_v61 = vadd.f32 %v2627_v17, %v898_v59  ;;  %v772_v62 = vpop.f32.mrb[9].mxu0  ;;  %v900_v63 = vpop.f32.mrb[9].mxu1 }
 0x130   : > { %v773_v0 = vpop.f32.mrb[10].mxu0  ;;  %v901_v1 = vpop.f32.mrb[10].mxu1 }
 0x131   : > { %v1013_v2 = vmax.f32 %v771_v60, 0.0  ;;  %v1045_v3 = vmax.f32 %v899_v61, 0.0  ;;  %v774_v4 = vadd.f32 %v2627_v17, %v773_v0  ;;  %v902_v5 = vadd.f32 %v2627_v17, %v901_v1  ;;  %v775_v6 = vpop.f32.mrb[11].mxu0  ;;  %v903_v7 = vpop.f32.mrb[11].mxu1 }
 0x133   : > { %v2035_v8 = vpack.c.bf16 %v1013_v2, %v1013_v2  ;;  %v2067_v9 = vpack.c.bf16 %v1045_v3, %v1045_v3  ;;  %v1014_v10 = vmax.f32 %v774_v4, 0.0  ;;  %v1046_v11 = vmax.f32 %v902_v5, 0.0 }
 0x135   : > { %1334 = vst.msk [vmem:[%s2633_s12 + $0x10] sm:$0xf] %vm1329_vm0, %v2035_v8  ;;  %1366 = vst.msk [vmem:[%s2633_s12 + $0x90] sm:$0xf] %vm1329_vm0, %v2067_v9  ;;  %v2036_v12 = vpack.c.bf16 %v1014_v10, %v1014_v10  ;;  %v2068_v13 = vpack.c.bf16 %v1046_v11, %v1046_v11 }
 0x136   : > { %v778_v14 = vpop.f32.mrb[12].mxu0  ;;  %v906_v15 = vpop.f32.mrb[12].mxu1 }
 0x137   : > { %1335 = vst.msk [vmem:[%s2633_s12 + $0x14] sm:$0xf] %vm1329_vm0, %v2036_v12  ;;  %1367 = vst.msk [vmem:[%s2633_s12 + $0x94] sm:$0xf] %vm1329_vm0, %v2068_v13  ;;  %v779_v16 = vadd.f32 %v2627_v17, %v778_v14  ;;  %v907_v18 = vadd.f32 %v2627_v17, %v906_v15  ;;  %v780_v19 = vpop.f32.mrb[13].mxu0  ;;  %v908_v20 = vpop.f32.mrb[13].mxu1 }
 0x138   : > { %v781_v21 = vpop.f32.mrb[14].mxu0  ;;  %v909_v22 = vpop.f32.mrb[14].mxu1 }
 0x139   : > { %v1015_v23 = vmax.f32 %v779_v16, 0.0  ;;  %v1047_v24 = vmax.f32 %v907_v18, 0.0  ;;  %v782_v25 = vadd.f32 %v2627_v17, %v781_v21  ;;  %v910_v26 = vadd.f32 %v2627_v17, %v909_v22  ;;  %v783_v27 = vpop.f32.mrb[15].mxu0  ;;  %v911_v28 = vpop.f32.mrb[15].mxu1 }
 0x13b   : > { %v2037_v29 = vpack.c.bf16 %v1015_v23, %v1015_v23  ;;  %v2069_v30 = vpack.c.bf16 %v1047_v24, %v1047_v24  ;;  %v1016_v31 = vmax.f32 %v782_v25, 0.0  ;;  %v1048_v32 = vmax.f32 %v910_v26, 0.0 }
 0x13d   : > { %1336 = vst.msk [vmem:[%s2633_s12 + $0x18] sm:$0xf] %vm1329_vm0, %v2037_v29  ;;  %1368 = vst.msk [vmem:[%s2633_s12 + $0x98] sm:$0xf] %vm1329_vm0, %v2069_v30  ;;  %v2038_v33 = vpack.c.bf16 %v1016_v31, %v1016_v31  ;;  %v2070_v34 = vpack.c.bf16 %v1048_v32, %v1048_v32 }
 0x13e   : > { %v786_v35 = vpop.f32.mrb[16].mxu0  ;;  %v914_v36 = vpop.f32.mrb[16].mxu1 }
 0x13f   : > { %1337 = vst.msk [vmem:[%s2633_s12 + $0x1c] sm:$0xf] %vm1329_vm0, %v2038_v33  ;;  %1369 = vst.msk [vmem:[%s2633_s12 + $0x9c] sm:$0xf] %vm1329_vm0, %v2070_v34  ;;  %v787_v37 = vadd.f32 %v2627_v17, %v786_v35  ;;  %v915_v38 = vadd.f32 %v2627_v17, %v914_v36  ;;  %v788_v39 = vpop.f32.mrb[17].mxu0  ;;  %v916_v40 = vpop.f32.mrb[17].mxu1 }
 0x140   : > { %v789_v41 = vpop.f32.mrb[18].mxu0  ;;  %v917_v42 = vpop.f32.mrb[18].mxu1 }
 0x141   : > { %v1017_v43 = vmax.f32 %v787_v37, 0.0  ;;  %v1049_v44 = vmax.f32 %v915_v38, 0.0  ;;  %v790_v45 = vadd.f32 %v2627_v17, %v789_v41  ;;  %v918_v46 = vadd.f32 %v2627_v17, %v917_v42  ;;  %v791_v47 = vpop.f32.mrb[19].mxu0  ;;  %v919_v48 = vpop.f32.mrb[19].mxu1 }
 0x143   : > { %v2039_v49 = vpack.c.bf16 %v1017_v43, %v1017_v43  ;;  %v2071_v50 = vpack.c.bf16 %v1049_v44, %v1049_v44  ;;  %v1018_v51 = vmax.f32 %v790_v45, 0.0  ;;  %v1050_v52 = vmax.f32 %v918_v46, 0.0 }
 0x145   : > { %1338 = vst.msk [vmem:[%s2633_s12 + $0x20] sm:$0xf] %vm1329_vm0, %v2039_v49  ;;  %1370 = vst.msk [vmem:[%s2633_s12 + $0xa0] sm:$0xf] %vm1329_vm0, %v2071_v50  ;;  %v2040_v53 = vpack.c.bf16 %v1018_v51, %v1018_v51  ;;  %v2072_v54 = vpack.c.bf16 %v1050_v52, %v1050_v52 }
 0x146   : > { %v794_v55 = vpop.f32.mrb[20].mxu0  ;;  %v922_v56 = vpop.f32.mrb[20].mxu1 }
 0x147   : > { %1339 = vst.msk [vmem:[%s2633_s12 + $0x24] sm:$0xf] %vm1329_vm0, %v2040_v53  ;;  %1371 = vst.msk [vmem:[%s2633_s12 + $0xa4] sm:$0xf] %vm1329_vm0, %v2072_v54  ;;  %v795_v57 = vadd.f32 %v2627_v17, %v794_v55  ;;  %v923_v58 = vadd.f32 %v2627_v17, %v922_v56  ;;  %v796_v59 = vpop.f32.mrb[21].mxu0  ;;  %v924_v60 = vpop.f32.mrb[21].mxu1 }
 0x148   : > { %v797_v61 = vpop.f32.mrb[22].mxu0  ;;  %v925_v62 = vpop.f32.mrb[22].mxu1 }
 0x149   : > { %v1019_v63 = vmax.f32 %v795_v57, 0.0  ;;  %v1051_v0 = vmax.f32 %v923_v58, 0.0  ;;  %v798_v1 = vadd.f32 %v2627_v17, %v797_v61  ;;  %v926_v2 = vadd.f32 %v2627_v17, %v925_v62  ;;  %v799_v3 = vpop.f32.mrb[23].mxu0  ;;  %v927_v4 = vpop.f32.mrb[23].mxu1 }
 0x14b   : > { %v2041_v5 = vpack.c.bf16 %v1019_v63, %v1019_v63  ;;  %v2073_v6 = vpack.c.bf16 %v1051_v0, %v1051_v0  ;;  %v1020_v7 = vmax.f32 %v798_v1, 0.0  ;;  %v1052_v8 = vmax.f32 %v926_v2, 0.0 }
 0x14d   : > { %1340 = vst.msk [vmem:[%s2633_s12 + $0x28] sm:$0xf] %vm1329_vm0, %v2041_v5  ;;  %1372 = vst.msk [vmem:[%s2633_s12 + $0xa8] sm:$0xf] %vm1329_vm0, %v2073_v6  ;;  %v2042_v9 = vpack.c.bf16 %v1020_v7, %v1020_v7  ;;  %v2074_v10 = vpack.c.bf16 %v1052_v8, %v1052_v8 }
 0x14e   : > { %v802_v11 = vpop.f32.mrb[24].mxu0  ;;  %v930_v12 = vpop.f32.mrb[24].mxu1 }
 0x14f   : > { %1341 = vst.msk [vmem:[%s2633_s12 + $0x2c] sm:$0xf] %vm1329_vm0, %v2042_v9  ;;  %1373 = vst.msk [vmem:[%s2633_s12 + $0xac] sm:$0xf] %vm1329_vm0, %v2074_v10  ;;  %v803_v13 = vadd.f32 %v2627_v17, %v802_v11  ;;  %v931_v14 = vadd.f32 %v2627_v17, %v930_v12  ;;  %v804_v15 = vpop.f32.mrb[25].mxu0  ;;  %v932_v16 = vpop.f32.mrb[25].mxu1 }
 0x150   : > { %v805_v18 = vpop.f32.mrb[26].mxu0  ;;  %v933_v19 = vpop.f32.mrb[26].mxu1 }
 0x151   : > { %v1021_v20 = vmax.f32 %v803_v13, 0.0  ;;  %v1053_v21 = vmax.f32 %v931_v14, 0.0  ;;  %v806_v22 = vadd.f32 %v2627_v17, %v805_v18  ;;  %v934_v23 = vadd.f32 %v2627_v17, %v933_v19  ;;  %v807_v24 = vpop.f32.mrb[27].mxu0  ;;  %v935_v25 = vpop.f32.mrb[27].mxu1 }
 0x153   : > { %v2043_v26 = vpack.c.bf16 %v1021_v20, %v1021_v20  ;;  %v2075_v27 = vpack.c.bf16 %v1053_v21, %v1053_v21  ;;  %v1022_v28 = vmax.f32 %v806_v22, 0.0  ;;  %v1054_v29 = vmax.f32 %v934_v23, 0.0 }
 0x155   : > { %1342 = vst.msk [vmem:[%s2633_s12 + $0x30] sm:$0xf] %vm1329_vm0, %v2043_v26  ;;  %1374 = vst.msk [vmem:[%s2633_s12 + $0xb0] sm:$0xf] %vm1329_vm0, %v2075_v27  ;;  %v2044_v30 = vpack.c.bf16 %v1022_v28, %v1022_v28  ;;  %v2076_v31 = vpack.c.bf16 %v1054_v29, %v1054_v29 }
 0x156   : > { %v810_v32 = vpop.f32.mrb[28].mxu0  ;;  %v938_v33 = vpop.f32.mrb[28].mxu1 }
 0x157   : > { %1343 = vst.msk [vmem:[%s2633_s12 + $0x34] sm:$0xf] %vm1329_vm0, %v2044_v30  ;;  %1375 = vst.msk [vmem:[%s2633_s12 + $0xb4] sm:$0xf] %vm1329_vm0, %v2076_v31  ;;  %v811_v34 = vadd.f32 %v2627_v17, %v810_v32  ;;  %v939_v35 = vadd.f32 %v2627_v17, %v938_v33  ;;  %v812_v36 = vpop.f32.mrb[29].mxu0  ;;  %v940_v37 = vpop.f32.mrb[29].mxu1 }
 0x158   : > { %v813_v38 = vpop.f32.mrb[30].mxu0  ;;  %v941_v39 = vpop.f32.mrb[30].mxu1 }
 0x159   : > { %v1023_v40 = vmax.f32 %v811_v34, 0.0  ;;  %v1055_v41 = vmax.f32 %v939_v35, 0.0  ;;  %v814_v42 = vadd.f32 %v2627_v17, %v813_v38  ;;  %v942_v43 = vadd.f32 %v2627_v17, %v941_v39  ;;  %v815_v44 = vpop.f32.mrb[31].mxu0  ;;  %v943_v45 = vpop.f32.mrb[31].mxu1 }
 0x15b   : > { %v2045_v46 = vpack.c.bf16 %v1023_v40, %v1023_v40  ;;  %v2077_v47 = vpack.c.bf16 %v1055_v41, %v1055_v41  ;;  %v1024_v48 = vmax.f32 %v814_v42, 0.0  ;;  %v1056_v49 = vmax.f32 %v942_v43, 0.0 }
 0x15d   : > { %1344 = vst.msk [vmem:[%s2633_s12 + $0x38] sm:$0xf] %vm1329_vm0, %v2045_v46  ;;  %1376 = vst.msk [vmem:[%s2633_s12 + $0xb8] sm:$0xf] %vm1329_vm0, %v2077_v47  ;;  %v2046_v50 = vpack.c.bf16 %v1024_v48, %v1024_v48  ;;  %v2078_v51 = vpack.c.bf16 %v1056_v49, %v1056_v49 }
 0x15e   : > { %v818_v52 = vpop.f32.mrb[32].mxu0  ;;  %v946_v53 = vpop.f32.mrb[32].mxu1 }
 0x15f   : > { %1345 = vst.msk [vmem:[%s2633_s12 + $0x3c] sm:$0xf] %vm1329_vm0, %v2046_v50  ;;  %1377 = vst.msk [vmem:[%s2633_s12 + $0xbc] sm:$0xf] %vm1329_vm0, %v2078_v51  ;;  %v819_v54 = vadd.f32 %v2627_v17, %v818_v52  ;;  %v947_v55 = vadd.f32 %v2627_v17, %v946_v53  ;;  %v820_v56 = vpop.f32.mrb[33].mxu0  ;;  %v948_v57 = vpop.f32.mrb[33].mxu1 }
 0x160   : > { %v821_v58 = vpop.f32.mrb[34].mxu0  ;;  %v949_v59 = vpop.f32.mrb[34].mxu1 }
 0x161   : > { %v1025_v60 = vmax.f32 %v819_v54, 0.0  ;;  %v1057_v61 = vmax.f32 %v947_v55, 0.0  ;;  %v822_v62 = vadd.f32 %v2627_v17, %v821_v58  ;;  %v950_v63 = vadd.f32 %v2627_v17, %v949_v59  ;;  %v823_v0 = vpop.f32.mrb[35].mxu0  ;;  %v951_v1 = vpop.f32.mrb[35].mxu1 }
 0x163   : > { %v2047_v2 = vpack.c.bf16 %v1025_v60, %v1025_v60  ;;  %v2079_v3 = vpack.c.bf16 %v1057_v61, %v1057_v61  ;;  %v1026_v4 = vmax.f32 %v822_v62, 0.0  ;;  %v1058_v5 = vmax.f32 %v950_v63, 0.0 }
 0x165   : > { %1346 = vst.msk [vmem:[%s2633_s12 + $0x40] sm:$0xf] %vm1329_vm0, %v2047_v2  ;;  %1378 = vst.msk [vmem:[%s2633_s12 + $0xc0] sm:$0xf] %vm1329_vm0, %v2079_v3  ;;  %v2048_v6 = vpack.c.bf16 %v1026_v4, %v1026_v4  ;;  %v2080_v7 = vpack.c.bf16 %v1058_v5, %v1058_v5 }
 0x166   : > { %v826_v8 = vpop.f32.mrb[36].mxu0  ;;  %v954_v9 = vpop.f32.mrb[36].mxu1 }
 0x167   : > { %1347 = vst.msk [vmem:[%s2633_s12 + $0x44] sm:$0xf] %vm1329_vm0, %v2048_v6  ;;  %1379 = vst.msk [vmem:[%s2633_s12 + $0xc4] sm:$0xf] %vm1329_vm0, %v2080_v7  ;;  %v827_v10 = vadd.f32 %v2627_v17, %v826_v8  ;;  %v955_v11 = vadd.f32 %v2627_v17, %v954_v9  ;;  %v828_v12 = vpop.f32.mrb[37].mxu0  ;;  %v956_v13 = vpop.f32.mrb[37].mxu1 }
 0x168   : > { %v829_v14 = vpop.f32.mrb[38].mxu0  ;;  %v957_v15 = vpop.f32.mrb[38].mxu1 }
 0x169   : > { %v1027_v16 = vmax.f32 %v827_v10, 0.0  ;;  %v1059_v18 = vmax.f32 %v955_v11, 0.0  ;;  %v830_v19 = vadd.f32 %v2627_v17, %v829_v14  ;;  %v958_v20 = vadd.f32 %v2627_v17, %v957_v15  ;;  %v831_v21 = vpop.f32.mrb[39].mxu0  ;;  %v959_v22 = vpop.f32.mrb[39].mxu1 }
 0x16b   : > { %v2049_v23 = vpack.c.bf16 %v1027_v16, %v1027_v16  ;;  %v2081_v24 = vpack.c.bf16 %v1059_v18, %v1059_v18  ;;  %v1028_v25 = vmax.f32 %v830_v19, 0.0  ;;  %v1060_v26 = vmax.f32 %v958_v20, 0.0 }
 0x16d   : > { %1348 = vst.msk [vmem:[%s2633_s12 + $0x48] sm:$0xf] %vm1329_vm0, %v2049_v23  ;;  %1380 = vst.msk [vmem:[%s2633_s12 + $0xc8] sm:$0xf] %vm1329_vm0, %v2081_v24  ;;  %v2050_v27 = vpack.c.bf16 %v1028_v25, %v1028_v25  ;;  %v2082_v28 = vpack.c.bf16 %v1060_v26, %v1060_v26 }
 0x16e   : > { %v834_v29 = vpop.f32.mrb[40].mxu0  ;;  %v962_v30 = vpop.f32.mrb[40].mxu1 }
 0x16f   : > { %1349 = vst.msk [vmem:[%s2633_s12 + $0x4c] sm:$0xf] %vm1329_vm0, %v2050_v27  ;;  %1381 = vst.msk [vmem:[%s2633_s12 + $0xcc] sm:$0xf] %vm1329_vm0, %v2082_v28  ;;  %v835_v31 = vadd.f32 %v2627_v17, %v834_v29  ;;  %v963_v32 = vadd.f32 %v2627_v17, %v962_v30  ;;  %v836_v33 = vpop.f32.mrb[41].mxu0  ;;  %v964_v34 = vpop.f32.mrb[41].mxu1 }
 0x170   : > { %v837_v35 = vpop.f32.mrb[42].mxu0  ;;  %v965_v36 = vpop.f32.mrb[42].mxu1 }
 0x171   : > { %v1029_v37 = vmax.f32 %v835_v31, 0.0  ;;  %v1061_v38 = vmax.f32 %v963_v32, 0.0  ;;  %v838_v39 = vadd.f32 %v2627_v17, %v837_v35  ;;  %v966_v40 = vadd.f32 %v2627_v17, %v965_v36  ;;  %v839_v41 = vpop.f32.mrb[43].mxu0  ;;  %v967_v42 = vpop.f32.mrb[43].mxu1 }
 0x173   : > { %v2051_v43 = vpack.c.bf16 %v1029_v37, %v1029_v37  ;;  %v2083_v44 = vpack.c.bf16 %v1061_v38, %v1061_v38  ;;  %v1030_v45 = vmax.f32 %v838_v39, 0.0  ;;  %v1062_v46 = vmax.f32 %v966_v40, 0.0 }
 0x175   : > { %1350 = vst.msk [vmem:[%s2633_s12 + $0x50] sm:$0xf] %vm1329_vm0, %v2051_v43  ;;  %1382 = vst.msk [vmem:[%s2633_s12 + $0xd0] sm:$0xf] %vm1329_vm0, %v2083_v44  ;;  %v2052_v47 = vpack.c.bf16 %v1030_v45, %v1030_v45  ;;  %v2084_v48 = vpack.c.bf16 %v1062_v46, %v1062_v46 }
 0x176   : > { %v842_v49 = vpop.f32.mrb[44].mxu0  ;;  %v970_v50 = vpop.f32.mrb[44].mxu1 }
 0x177   : > { %1351 = vst.msk [vmem:[%s2633_s12 + $0x54] sm:$0xf] %vm1329_vm0, %v2052_v47  ;;  %1383 = vst.msk [vmem:[%s2633_s12 + $0xd4] sm:$0xf] %vm1329_vm0, %v2084_v48  ;;  %v843_v51 = vadd.f32 %v2627_v17, %v842_v49  ;;  %v971_v52 = vadd.f32 %v2627_v17, %v970_v50  ;;  %v844_v53 = vpop.f32.mrb[45].mxu0  ;;  %v972_v54 = vpop.f32.mrb[45].mxu1 }
 0x178   : > { %v845_v55 = vpop.f32.mrb[46].mxu0  ;;  %v973_v56 = vpop.f32.mrb[46].mxu1 }
 0x179   : > { %v1031_v57 = vmax.f32 %v843_v51, 0.0  ;;  %v1063_v58 = vmax.f32 %v971_v52, 0.0  ;;  %v846_v59 = vadd.f32 %v2627_v17, %v845_v55  ;;  %v974_v60 = vadd.f32 %v2627_v17, %v973_v56  ;;  %v847_v61 = vpop.f32.mrb[47].mxu0  ;;  %v975_v62 = vpop.f32.mrb[47].mxu1 }
 0x17b   : > { %v2053_v63 = vpack.c.bf16 %v1031_v57, %v1031_v57  ;;  %v2085_v0 = vpack.c.bf16 %v1063_v58, %v1063_v58  ;;  %v1032_v1 = vmax.f32 %v846_v59, 0.0  ;;  %v1064_v2 = vmax.f32 %v974_v60, 0.0 }
 0x17d   : > { %1352 = vst.msk [vmem:[%s2633_s12 + $0x58] sm:$0xf] %vm1329_vm0, %v2053_v63  ;;  %1384 = vst.msk [vmem:[%s2633_s12 + $0xd8] sm:$0xf] %vm1329_vm0, %v2085_v0  ;;  %v2054_v3 = vpack.c.bf16 %v1032_v1, %v1032_v1  ;;  %v2086_v4 = vpack.c.bf16 %v1064_v2, %v1064_v2 }
 0x17e   : > { %v850_v5 = vpop.f32.mrb[48].mxu0  ;;  %v978_v6 = vpop.f32.mrb[48].mxu1 }
 0x17f   : > { %1353 = vst.msk [vmem:[%s2633_s12 + $0x5c] sm:$0xf] %vm1329_vm0, %v2054_v3  ;;  %1385 = vst.msk [vmem:[%s2633_s12 + $0xdc] sm:$0xf] %vm1329_vm0, %v2086_v4  ;;  %v851_v7 = vadd.f32 %v2627_v17, %v850_v5  ;;  %v979_v8 = vadd.f32 %v2627_v17, %v978_v6  ;;  %v852_v9 = vpop.f32.mrb[49].mxu0  ;;  %v980_v10 = vpop.f32.mrb[49].mxu1 }
 0x180   : > { %v853_v11 = vpop.f32.mrb[50].mxu0  ;;  %v981_v12 = vpop.f32.mrb[50].mxu1 }
 0x181   : > { %v1033_v13 = vmax.f32 %v851_v7, 0.0  ;;  %v1065_v14 = vmax.f32 %v979_v8, 0.0  ;;  %v854_v15 = vadd.f32 %v2627_v17, %v853_v11  ;;  %v982_v16 = vadd.f32 %v2627_v17, %v981_v12  ;;  %v855_v18 = vpop.f32.mrb[51].mxu0  ;;  %v983_v19 = vpop.f32.mrb[51].mxu1 }
 0x183   : > { %v2055_v20 = vpack.c.bf16 %v1033_v13, %v1033_v13  ;;  %v2087_v21 = vpack.c.bf16 %v1065_v14, %v1065_v14  ;;  %v1034_v22 = vmax.f32 %v854_v15, 0.0  ;;  %v1066_v23 = vmax.f32 %v982_v16, 0.0 }
 0x185   : > { %1354 = vst.msk [vmem:[%s2633_s12 + $0x60] sm:$0xf] %vm1329_vm0, %v2055_v20  ;;  %1386 = vst.msk [vmem:[%s2633_s12 + $0xe0] sm:$0xf] %vm1329_vm0, %v2087_v21  ;;  %v2056_v24 = vpack.c.bf16 %v1034_v22, %v1034_v22  ;;  %v2088_v25 = vpack.c.bf16 %v1066_v23, %v1066_v23 }
 0x186   : > { %v858_v26 = vpop.f32.mrb[52].mxu0  ;;  %v986_v27 = vpop.f32.mrb[52].mxu1 }
 0x187   : > { %1355 = vst.msk [vmem:[%s2633_s12 + $0x64] sm:$0xf] %vm1329_vm0, %v2056_v24  ;;  %1387 = vst.msk [vmem:[%s2633_s12 + $0xe4] sm:$0xf] %vm1329_vm0, %v2088_v25  ;;  %v859_v28 = vadd.f32 %v2627_v17, %v858_v26  ;;  %v987_v29 = vadd.f32 %v2627_v17, %v986_v27  ;;  %v860_v30 = vpop.f32.mrb[53].mxu0  ;;  %v988_v31 = vpop.f32.mrb[53].mxu1 }
 0x188   : > { %v861_v32 = vpop.f32.mrb[54].mxu0  ;;  %v989_v33 = vpop.f32.mrb[54].mxu1 }
 0x189   : > { %v1035_v34 = vmax.f32 %v859_v28, 0.0  ;;  %v1067_v35 = vmax.f32 %v987_v29, 0.0  ;;  %v862_v36 = vadd.f32 %v2627_v17, %v861_v32  ;;  %v990_v37 = vadd.f32 %v2627_v17, %v989_v33  ;;  %v863_v38 = vpop.f32.mrb[55].mxu0  ;;  %v991_v39 = vpop.f32.mrb[55].mxu1 }
 0x18b   : > { %v2057_v40 = vpack.c.bf16 %v1035_v34, %v1035_v34  ;;  %v2089_v41 = vpack.c.bf16 %v1067_v35, %v1067_v35  ;;  %v1036_v42 = vmax.f32 %v862_v36, 0.0  ;;  %v1068_v43 = vmax.f32 %v990_v37, 0.0 }
 0x18d   : > { %1356 = vst.msk [vmem:[%s2633_s12 + $0x68] sm:$0xf] %vm1329_vm0, %v2057_v40  ;;  %1388 = vst.msk [vmem:[%s2633_s12 + $0xe8] sm:$0xf] %vm1329_vm0, %v2089_v41  ;;  %v2058_v44 = vpack.c.bf16 %v1036_v42, %v1036_v42  ;;  %v2090_v45 = vpack.c.bf16 %v1068_v43, %v1068_v43 }
 0x18e   : > { %v866_v46 = vpop.f32.mrb[56].mxu0  ;;  %v994_v47 = vpop.f32.mrb[56].mxu1 }
 0x18f   : > { %1357 = vst.msk [vmem:[%s2633_s12 + $0x6c] sm:$0xf] %vm1329_vm0, %v2058_v44  ;;  %1389 = vst.msk [vmem:[%s2633_s12 + $0xec] sm:$0xf] %vm1329_vm0, %v2090_v45  ;;  %v867_v48 = vadd.f32 %v2627_v17, %v866_v46  ;;  %v995_v49 = vadd.f32 %v2627_v17, %v994_v47  ;;  %v868_v50 = vpop.f32.mrb[57].mxu0  ;;  %v996_v51 = vpop.f32.mrb[57].mxu1 }
 0x190   : > { %v869_v52 = vpop.f32.mrb[58].mxu0  ;;  %v997_v53 = vpop.f32.mrb[58].mxu1 }
 0x191   : > { %v1037_v54 = vmax.f32 %v867_v48, 0.0  ;;  %v1069_v55 = vmax.f32 %v995_v49, 0.0  ;;  %v870_v56 = vadd.f32 %v2627_v17, %v869_v52  ;;  %v998_v57 = vadd.f32 %v2627_v17, %v997_v53  ;;  %v871_v58 = vpop.f32.mrb[59].mxu0  ;;  %v999_v59 = vpop.f32.mrb[59].mxu1 }
 0x193   : > { %v2059_v60 = vpack.c.bf16 %v1037_v54, %v1037_v54  ;;  %v2091_v61 = vpack.c.bf16 %v1069_v55, %v1069_v55  ;;  %v1038_v62 = vmax.f32 %v870_v56, 0.0  ;;  %v1070_v63 = vmax.f32 %v998_v57, 0.0 }
 0x195   : > { %1358 = vst.msk [vmem:[%s2633_s12 + $0x70] sm:$0xf] %vm1329_vm0, %v2059_v60  ;;  %1390 = vst.msk [vmem:[%s2633_s12 + $0xf0] sm:$0xf] %vm1329_vm0, %v2091_v61  ;;  %v2060_v0 = vpack.c.bf16 %v1038_v62, %v1038_v62  ;;  %v2092_v1 = vpack.c.bf16 %v1070_v63, %v1070_v63 }
 0x196   : > { %v874_v2 = vpop.f32.mrb[60].mxu0  ;;  %v1002_v3 = vpop.f32.mrb[60].mxu1 }
 0x197   : > { %1359 = vst.msk [vmem:[%s2633_s12 + $0x74] sm:$0xf] %vm1329_vm0, %v2060_v0  ;;  %1391 = vst.msk [vmem:[%s2633_s12 + $0xf4] sm:$0xf] %vm1329_vm0, %v2092_v1  ;;  %v875_v4 = vadd.f32 %v2627_v17, %v874_v2  ;;  %v1003_v5 = vadd.f32 %v2627_v17, %v1002_v3  ;;  %v876_v6 = vpop.f32.mrb[61].mxu0  ;;  %v1004_v7 = vpop.f32.mrb[61].mxu1 }
 0x198   : > { %v877_v8 = vpop.f32.mrb[62].mxu0  ;;  %v1005_v9 = vpop.f32.mrb[62].mxu1 }
 0x199   : > { %v1039_v10 = vmax.f32 %v875_v4, 0.0  ;;  %v1071_v11 = vmax.f32 %v1003_v5, 0.0  ;;  %v878_v12 = vadd.f32 %v2627_v17, %v877_v8  ;;  %v1006_v13 = vadd.f32 %v2627_v17, %v1005_v9  ;;  %v879_v14 = vpop.f32.mrb[63].mxu0  ;;  %v1007_v15 = vpop.f32.mrb[63].mxu1  ;;  %1400 = sbr.rel (!%p2465_p4) target bundleno = 507 (0x1fb), region = 36 }
 0x19b   : > { %v2061_v16 = vpack.c.bf16 %v1039_v10, %v1039_v10  ;;  %v2093_v18 = vpack.c.bf16 %v1071_v11, %v1071_v11  ;;  %v1040_v19 = vmax.f32 %v878_v12, 0.0  ;;  %v1072_v20 = vmax.f32 %v1006_v13, 0.0 }
 0x19d   : > { %1360 = vst.msk [vmem:[%s2633_s12 + $0x78] sm:$0xf] %vm1329_vm0, %v2061_v16  ;;  %1392 = vst.msk [vmem:[%s2633_s12 + $0xf8] sm:$0xf] %vm1329_vm0, %v2093_v18  ;;  %v2062_v21 = vpack.c.bf16 %v1040_v19, %v1040_v19  ;;  %v2094_v22 = vpack.c.bf16 %v1072_v20, %v1072_v20 }
 0x19f   : > { %1361 = vst.msk [vmem:[%s2633_s12 + $0x7c] sm:$0xf] %vm1329_vm0, %v2062_v21  ;;  %1393 = vst.msk [vmem:[%s2633_s12 + $0xfc] sm:$0xf] %vm1329_vm0, %v2094_v22 }
 0x1a0   : > { %s3034_s9 = smov (!%p1403_p8, %s1402_s9), 64 }
 0x1a1   : > { %s2015_s28 = sshll.u32 %s3034_s9, 6 }
 0x1a2   : > { %p2018_p9 = scmp.eq.s32.totalorder %s2015_s28, 0 }
 0x1a3   : > { %s2836_s29 = sshrl.u32 (!%p2018_p9), %s3034_s9, 6 }
 0x1a4   : > { %1411 = sbr.rel (%p2018_p9) target bundleno = 507 (0x1fb), region = 40  ;;  %p2019_p10 = scmp.le.s32.totalorder (!%p2018_p9), %s2836_s29, 0 }
 0x1ab   : > { %1816 = sbr.rel (%p2019_p10) target bundleno = 486 (0x1e6), region = 112  ;;  %s3027_s15 = smov (!%p2019_p10), %s2830_s27 }
 0x1ac   : > { %s3028_s20 = smov (!%p2019_p10), %s2633_s12  ;;  %s2845_s23 = smov (!%p2019_p10), 0  }
 0x1ad   : > { %s2847_s30 = smov (!%p2019_p10), 0  }
 0x1b2 LB: >> { %v1427_v17 = vld [vmem:[%s2393_s20] sm:$0xf]  ;;  %v1429_v23 = vld [vmem:[%s2393_s20 + $0x4] sm:$0xf]  ;;  %v1431_v24 = vld [vmem:[%s2393_s20 + $0x8] sm:$0xf]  ;;  %s2401_s30 = sphi %s2847_s30, %s1421_s30   ;;  %s2397_s23 = sphi %s2845_s23, %s3029_s23   ;;  %s2393_s20 = sphi %s3028_s20, %s1560_s20   ;;  %s2389_s15 = sphi %s3027_s15, %s1561_s15  }
 0x1b3   : >> { %1428 = vst [vmem:[%s2389_s15] sm:$0xf] %v1427_v17  ;;  %1430 = vst [vmem:[%s2389_s15 + $0x4] sm:$0xf] %v1429_v23  ;;  %v1433_v25 = vld [vmem:[%s2393_s20 + $0xc] sm:$0xf]  ;;  %s1555_s4 = sadd.s32 1, %s2397_s23 }
 0x1b4   : >> { %1432 = vst [vmem:[%s2389_s15 + $0x8] sm:$0xf] %v1431_v24  ;;  %v1435_v26 = vld [vmem:[%s2393_s20 + $0x10] sm:$0xf]  ;;  %v1437_v27 = vld [vmem:[%s2393_s20 + $0x14] sm:$0xf]  ;;  %p1556_p11 = scmp.ge.s32.totalorder %s1555_s4, %s2836_s29 }
 0x1b5   : >> { %1434 = vst [vmem:[%s2389_s15 + $0xc] sm:$0xf] %v1433_v25  ;;  %1436 = vst [vmem:[%s2389_s15 + $0x10] sm:$0xf] %v1435_v26  ;;  %v1439_v28 = vld [vmem:[%s2393_s20 + $0x18] sm:$0xf] }
 0x1b6   : >> { %1438 = vst [vmem:[%s2389_s15 + $0x14] sm:$0xf] %v1437_v27  ;;  %v1441_v29 = vld [vmem:[%s2393_s20 + $0x1c] sm:$0xf]  ;;  %v1443_v30 = vld [vmem:[%s2393_s20 + $0x20] sm:$0xf] }
 0x1b7   : >> { %1440 = vst [vmem:[%s2389_s15 + $0x18] sm:$0xf] %v1439_v28  ;;  %1442 = vst [vmem:[%s2389_s15 + $0x1c] sm:$0xf] %v1441_v29  ;;  %v1445_v31 = vld [vmem:[%s2393_s20 + $0x24] sm:$0xf] }
 0x1b8   : >> { %1444 = vst [vmem:[%s2389_s15 + $0x20] sm:$0xf] %v1443_v30  ;;  %v1447_v32 = vld [vmem:[%s2393_s20 + $0x28] sm:$0xf]  ;;  %v1449_v33 = vld [vmem:[%s2393_s20 + $0x2c] sm:$0xf] }
 0x1b9   : >> { %1446 = vst [vmem:[%s2389_s15 + $0x24] sm:$0xf] %v1445_v31  ;;  %1448 = vst [vmem:[%s2389_s15 + $0x28] sm:$0xf] %v1447_v32  ;;  %v1451_v34 = vld [vmem:[%s2393_s20 + $0x30] sm:$0xf] }
 0x1ba   : >> { %1450 = vst [vmem:[%s2389_s15 + $0x2c] sm:$0xf] %v1449_v33  ;;  %v1453_v35 = vld [vmem:[%s2393_s20 + $0x34] sm:$0xf]  ;;  %v1455_v36 = vld [vmem:[%s2393_s20 + $0x38] sm:$0xf] }
 0x1bb   : >> { %1452 = vst [vmem:[%s2389_s15 + $0x30] sm:$0xf] %v1451_v34  ;;  %1454 = vst [vmem:[%s2389_s15 + $0x34] sm:$0xf] %v1453_v35  ;;  %v1457_v37 = vld [vmem:[%s2393_s20 + $0x3c] sm:$0xf] }
 0x1bc   : >> { %1456 = vst [vmem:[%s2389_s15 + $0x38] sm:$0xf] %v1455_v36  ;;  %v1459_v38 = vld [vmem:[%s2393_s20 + $0x40] sm:$0xf]  ;;  %v1461_v39 = vld [vmem:[%s2393_s20 + $0x44] sm:$0xf] }
 0x1bd   : >> { %1458 = vst [vmem:[%s2389_s15 + $0x3c] sm:$0xf] %v1457_v37  ;;  %1460 = vst [vmem:[%s2389_s15 + $0x40] sm:$0xf] %v1459_v38  ;;  %v1463_v40 = vld [vmem:[%s2393_s20 + $0x48] sm:$0xf] }
 0x1be   : >> { %1462 = vst [vmem:[%s2389_s15 + $0x44] sm:$0xf] %v1461_v39  ;;  %v1465_v41 = vld [vmem:[%s2393_s20 + $0x4c] sm:$0xf]  ;;  %v1467_v42 = vld [vmem:[%s2393_s20 + $0x50] sm:$0xf] }
 0x1bf   : >> { %1464 = vst [vmem:[%s2389_s15 + $0x48] sm:$0xf] %v1463_v40  ;;  %1466 = vst [vmem:[%s2389_s15 + $0x4c] sm:$0xf] %v1465_v41  ;;  %v1469_v43 = vld [vmem:[%s2393_s20 + $0x54] sm:$0xf] }
 0x1c0   : >> { %1468 = vst [vmem:[%s2389_s15 + $0x50] sm:$0xf] %v1467_v42  ;;  %v1471_v44 = vld [vmem:[%s2393_s20 + $0x58] sm:$0xf]  ;;  %v1473_v45 = vld [vmem:[%s2393_s20 + $0x5c] sm:$0xf] }
 0x1c1   : >> { %1470 = vst [vmem:[%s2389_s15 + $0x54] sm:$0xf] %v1469_v43  ;;  %1472 = vst [vmem:[%s2389_s15 + $0x58] sm:$0xf] %v1471_v44  ;;  %v1475_v46 = vld [vmem:[%s2393_s20 + $0x60] sm:$0xf] }
 0x1c2   : >> { %1474 = vst [vmem:[%s2389_s15 + $0x5c] sm:$0xf] %v1473_v45  ;;  %v1477_v47 = vld [vmem:[%s2393_s20 + $0x64] sm:$0xf]  ;;  %v1479_v48 = vld [vmem:[%s2393_s20 + $0x68] sm:$0xf] }
 0x1c3   : >> { %1476 = vst [vmem:[%s2389_s15 + $0x60] sm:$0xf] %v1475_v46  ;;  %1478 = vst [vmem:[%s2389_s15 + $0x64] sm:$0xf] %v1477_v47  ;;  %v1481_v49 = vld [vmem:[%s2393_s20 + $0x6c] sm:$0xf] }
 0x1c4   : >> { %1480 = vst [vmem:[%s2389_s15 + $0x68] sm:$0xf] %v1479_v48  ;;  %v1483_v50 = vld [vmem:[%s2393_s20 + $0x70] sm:$0xf]  ;;  %v1485_v51 = vld [vmem:[%s2393_s20 + $0x74] sm:$0xf] }
 0x1c5   : >> { %1482 = vst [vmem:[%s2389_s15 + $0x6c] sm:$0xf] %v1481_v49  ;;  %1484 = vst [vmem:[%s2389_s15 + $0x70] sm:$0xf] %v1483_v50  ;;  %v1487_v52 = vld [vmem:[%s2393_s20 + $0x78] sm:$0xf] }
 0x1c6   : >> { %1486 = vst [vmem:[%s2389_s15 + $0x74] sm:$0xf] %v1485_v51  ;;  %v1489_v53 = vld [vmem:[%s2393_s20 + $0x7c] sm:$0xf]  ;;  %v1491_v54 = vld [vmem:[%s2393_s20 + $0x80] sm:$0xf] }
 0x1c7   : >> { %1488 = vst [vmem:[%s2389_s15 + $0x78] sm:$0xf] %v1487_v52  ;;  %1490 = vst [vmem:[%s2389_s15 + $0x7c] sm:$0xf] %v1489_v53  ;;  %v1493_v55 = vld [vmem:[%s2393_s20 + $0x84] sm:$0xf] }
 0x1c8   : >> { %1492 = vst [vmem:[%s2389_s15 + $0x80] sm:$0xf] %v1491_v54  ;;  %v1495_v56 = vld [vmem:[%s2393_s20 + $0x88] sm:$0xf]  ;;  %v1497_v57 = vld [vmem:[%s2393_s20 + $0x8c] sm:$0xf] }
 0x1c9   : >> { %1494 = vst [vmem:[%s2389_s15 + $0x84] sm:$0xf] %v1493_v55  ;;  %1496 = vst [vmem:[%s2389_s15 + $0x88] sm:$0xf] %v1495_v56  ;;  %v1499_v58 = vld [vmem:[%s2393_s20 + $0x90] sm:$0xf] }
 0x1ca   : >> { %1498 = vst [vmem:[%s2389_s15 + $0x8c] sm:$0xf] %v1497_v57  ;;  %v1501_v59 = vld [vmem:[%s2393_s20 + $0x94] sm:$0xf]  ;;  %v1503_v60 = vld [vmem:[%s2393_s20 + $0x98] sm:$0xf] }
 0x1cb   : >> { %1500 = vst [vmem:[%s2389_s15 + $0x90] sm:$0xf] %v1499_v58  ;;  %1502 = vst [vmem:[%s2389_s15 + $0x94] sm:$0xf] %v1501_v59  ;;  %v1505_v61 = vld [vmem:[%s2393_s20 + $0x9c] sm:$0xf] }
 0x1cc   : >> { %1504 = vst [vmem:[%s2389_s15 + $0x98] sm:$0xf] %v1503_v60  ;;  %v1507_v62 = vld [vmem:[%s2393_s20 + $0xa0] sm:$0xf]  ;;  %v1509_v63 = vld [vmem:[%s2393_s20 + $0xa4] sm:$0xf] }
 0x1cd   : >> { %1506 = vst [vmem:[%s2389_s15 + $0x9c] sm:$0xf] %v1505_v61  ;;  %1508 = vst [vmem:[%s2389_s15 + $0xa0] sm:$0xf] %v1507_v62  ;;  %v1511_v0 = vld [vmem:[%s2393_s20 + $0xa8] sm:$0xf] }
 0x1ce   : >> { %1510 = vst [vmem:[%s2389_s15 + $0xa4] sm:$0xf] %v1509_v63  ;;  %v1513_v1 = vld [vmem:[%s2393_s20 + $0xac] sm:$0xf]  ;;  %v1515_v2 = vld [vmem:[%s2393_s20 + $0xb0] sm:$0xf] }
 0x1cf   : >> { %1512 = vst [vmem:[%s2389_s15 + $0xa8] sm:$0xf] %v1511_v0  ;;  %1514 = vst [vmem:[%s2389_s15 + $0xac] sm:$0xf] %v1513_v1  ;;  %v1517_v3 = vld [vmem:[%s2393_s20 + $0xb4] sm:$0xf] }
 0x1d0   : >> { %1516 = vst [vmem:[%s2389_s15 + $0xb0] sm:$0xf] %v1515_v2  ;;  %v1519_v4 = vld [vmem:[%s2393_s20 + $0xb8] sm:$0xf]  ;;  %v1521_v5 = vld [vmem:[%s2393_s20 + $0xbc] sm:$0xf] }
 0x1d1   : >> { %1518 = vst [vmem:[%s2389_s15 + $0xb4] sm:$0xf] %v1517_v3  ;;  %1520 = vst [vmem:[%s2389_s15 + $0xb8] sm:$0xf] %v1519_v4  ;;  %v1523_v6 = vld [vmem:[%s2393_s20 + $0xc0] sm:$0xf] }
 0x1d2   : >> { %1522 = vst [vmem:[%s2389_s15 + $0xbc] sm:$0xf] %v1521_v5  ;;  %v1525_v7 = vld [vmem:[%s2393_s20 + $0xc4] sm:$0xf]  ;;  %v1527_v8 = vld [vmem:[%s2393_s20 + $0xc8] sm:$0xf] }
 0x1d3   : >> { %1524 = vst [vmem:[%s2389_s15 + $0xc0] sm:$0xf] %v1523_v6  ;;  %1526 = vst [vmem:[%s2389_s15 + $0xc4] sm:$0xf] %v1525_v7  ;;  %v1529_v9 = vld [vmem:[%s2393_s20 + $0xcc] sm:$0xf] }
 0x1d4   : >> { %1528 = vst [vmem:[%s2389_s15 + $0xc8] sm:$0xf] %v1527_v8  ;;  %v1531_v10 = vld [vmem:[%s2393_s20 + $0xd0] sm:$0xf]  ;;  %v1533_v11 = vld [vmem:[%s2393_s20 + $0xd4] sm:$0xf] }
 0x1d5   : >> { %1530 = vst [vmem:[%s2389_s15 + $0xcc] sm:$0xf] %v1529_v9  ;;  %1532 = vst [vmem:[%s2389_s15 + $0xd0] sm:$0xf] %v1531_v10  ;;  %v1535_v12 = vld [vmem:[%s2393_s20 + $0xd8] sm:$0xf] }
 0x1d6   : >> { %1534 = vst [vmem:[%s2389_s15 + $0xd4] sm:$0xf] %v1533_v11  ;;  %v1537_v13 = vld [vmem:[%s2393_s20 + $0xdc] sm:$0xf]  ;;  %v1539_v14 = vld [vmem:[%s2393_s20 + $0xe0] sm:$0xf] }
 0x1d7   : >> { %1536 = vst [vmem:[%s2389_s15 + $0xd8] sm:$0xf] %v1535_v12  ;;  %1538 = vst [vmem:[%s2389_s15 + $0xdc] sm:$0xf] %v1537_v13  ;;  %v1541_v15 = vld [vmem:[%s2393_s20 + $0xe4] sm:$0xf] }
 0x1d8   : >> { %1540 = vst [vmem:[%s2389_s15 + $0xe0] sm:$0xf] %v1539_v14  ;;  %v1543_v16 = vld [vmem:[%s2393_s20 + $0xe8] sm:$0xf]  ;;  %v1545_v18 = vld [vmem:[%s2393_s20 + $0xec] sm:$0xf] }
 0x1d9   : >> { %1542 = vst [vmem:[%s2389_s15 + $0xe4] sm:$0xf] %v1541_v15  ;;  %1544 = vst [vmem:[%s2389_s15 + $0xe8] sm:$0xf] %v1543_v16  ;;  %v1547_v19 = vld [vmem:[%s2393_s20 + $0xf0] sm:$0xf] }
 0x1da   : >> { %1546 = vst [vmem:[%s2389_s15 + $0xec] sm:$0xf] %v1545_v18  ;;  %v1549_v20 = vld [vmem:[%s2393_s20 + $0xf4] sm:$0xf]  ;;  %v1551_v21 = vld [vmem:[%s2393_s20 + $0xf8] sm:$0xf] }
 0x1db   : >> { %1548 = vst [vmem:[%s2389_s15 + $0xf0] sm:$0xf] %v1547_v19  ;;  %1550 = vst [vmem:[%s2389_s15 + $0xf4] sm:$0xf] %v1549_v20  ;;  %v1553_v22 = vld [vmem:[%s2393_s20 + $0xfc] sm:$0xf] }
 0x1dc   : >> { %1552 = vst [vmem:[%s2389_s15 + $0xf8] sm:$0xf] %v1551_v21  ;;  %1554 = vst [vmem:[%s2389_s15 + $0xfc] sm:$0xf] %v1553_v22  ;;  %s3036_s4 = smov (%p1556_p11, %s1555_s4), 0  ;;  %s1421_s30 = sadd.s32 1, %s2401_s30  }
 0x1dd   : >> { %s2020_s5 = sshll.u32 %s3036_s4, 8  ;;  %p1420_p12 = scmp.ge.s32.totalorder %s1421_s30, %s2836_s29 }
 0x1de   : >> { %s1560_s20 = scalar_lea.vmem %s2633_s12, %s2020_s5 [#allocation2]   ;;  %s1561_s15 = scalar_lea.vmem %s2830_s27, %s2020_s5  }
 0x1df   : >> { %s3029_s23 = smov %s3036_s4  ;;  %1423 = sbr.rel (!%p1420_p12) target bundleno = 434 (0x1b2), region = 118 }
 0x1e6 PF: > { %s3004_s6 = sand.u32 63, %s3034_s9   ;;  %s2096_s7 = sshll.u32 %s2836_s29, 8 }
 0x1e7   : > { %s1566_s8 = scalar_lea.vmem %s2633_s12, %s2096_s7 [#allocation2]   ;;  %s1568_s10 = scalar_lea.vmem %s2830_s27, %s2096_s7  }
 0x1e8   : > { %p2025_p13 = scmp.le.s32.totalorder %s3004_s6, 0 }
 0x1e9   : > { %s2403_s11 = smov (!%p2025_p13), %s1568_s10   ;;  %s2407_s14 = smov (!%p2025_p13), %s1566_s8  }
 0x1ea   : > { %1830 = sbr.rel (%p2025_p13) target bundleno = 507 (0x1fb), region = 123  ;;  %s2411_s17 = smov (!%p2025_p13), 0  }
 0x1eb   : > { %s2415_s18 = smov (!%p2025_p13), 0  }
 0x1f1 LB: >> { %v1578_v17 = vld [vmem:[%s2409_s14] sm:$0xf]  ;;  %s1580_s21 = sadd.s32 1, %s2413_s17  ;;  %s1572_s18 = sadd.s32 1, %s2417_s18   ;;  %s2417_s18 = sphi %s2415_s18, %s1572_s18   ;;  %s2413_s17 = sphi %s2411_s17, %s2412_s17   ;;  %s2409_s14 = sphi %s2407_s14, %s1585_s14   ;;  %s2405_s11 = sphi %s2403_s11, %s1586_s11  }
 0x1f2   : >> { %1579 = vst [vmem:[%s2405_s11] sm:$0xf] %v1578_v17  ;;  %p1581_p0 = scmp.ge.s32.totalorder %s1580_s21, %s3004_s6  ;;  %p1571_p1 = scmp.ge.s32.totalorder %s1572_s18, %s3004_s6 }
 0x1f4   : >> { %s3038_s21 = smov (%p1581_p0, %s1580_s21), 0  ;;  %1574 = sbr.rel (!%p1571_p1) target bundleno = 497 (0x1f1), region = 129 }
 0x1f5   : >> { %s2026_s22 = sshll.u32 %s3038_s21, 2  ;;  %s2412_s17 = smov %s3038_s21  }
 0x1f6   : >> { %s1585_s14 = scalar_lea.vmem %s1566_s8, %s2026_s22 [#allocation2]   ;;  %s1586_s11 = scalar_lea.vmem %s1568_s10, %s2026_s22  }
 0x1fb PF: > { %p10_p2 = scmp.ge.s32.totalorder %s2455_s16, 4   ;;  %s3030_s12 = smov %s2381_s13 }
 0x1fc   : > { %s3031_s13 = smov %s2463_s19  ;;  %s3032_s14 = smov %s2455_s16 }
 0x1fd   :  { %12 = sbr.rel (!%p10_p2) target bundleno = 2 (0x2), region = 140 }

// kernel: critic_forward.5
= control target key start
LH: loop header
LB: loop body
LE: loop exit
PB: predicated region body
PF: predicated region fallthrough
CT: control target
= control target key end

     0   :  { %s2897_s1 = inlined_call_operand.vmem [shape: bf16[1024,128], index: 1, kind: input, shape index: {}]   ;;  %s2898_s0 = inlined_call_operand.vmem [shape: bf16[162,1024], index: 0, kind: input, shape index: {}]   ;;  %s2899_s2 = inlined_call_operand.vmem [shape: f32[1,128], index: 2, kind: input, shape index: {}]   ;;  %s2900_s3 = inlined_call_operand.vmem [shape: bf16[162,128], index: 3, kind: output, shape index: {}]  }
   0x1   :  { %v2239_v0 = vld [vmem:[%s2897_s1 + $0x40] sm:$0xff]   ;;  %v2243_v4 = vld [vmem:[%s2897_s1 + $0x48] sm:$0xff]   ;;  %v2247_v8 = vld [vmem:[%s2897_s1 + $0x50] sm:$0xff]  }
   0x2   :  { %v2240_v1 = vld [vmem:[%s2897_s1 + $0xc0] sm:$0xff]   ;;  %1911 = vmatprep.subr.bf16.mxu0 %v2239_v0  ;;  %v2244_v5 = vld [vmem:[%s2897_s1 + $0xc8] sm:$0xff]   ;;  %v2248_v9 = vld [vmem:[%s2897_s1 + $0xd0] sm:$0xff]  }
   0x3   :  { %v2241_v2 = vld [vmem:[%s2897_s1] sm:$0xff]   ;;  %1993 = vmatprep.subr.bf16.mxu1 %v2240_v1  ;;  %v2245_v6 = vld [vmem:[%s2897_s1 + $0x8] sm:$0xff]   ;;  %v2249_v10 = vld [vmem:[%s2897_s1 + $0x10] sm:$0xff]  }
   0x4   :  { %v2242_v3 = vld [vmem:[%s2897_s1 + $0x80] sm:$0xff]   ;;  %1912 = vmatpush3.bf16.msra.mxu0 %v2241_v2  ;;  %v2246_v7 = vld [vmem:[%s2897_s1 + $0x88] sm:$0xff]   ;;  %v2250_v11 = vld [vmem:[%s2897_s1 + $0x90] sm:$0xff]  }
   0x5   :  { %1994 = vmatpush3.bf16.msra.mxu1 %v2242_v3  ;;  %1913 = vmatprep.subr.bf16.mxu0 %v2243_v4  ;;  %v2251_v12 = vld [vmem:[%s2897_s1 + $0x58] sm:$0xff]   ;;  %v2255_v16 = vld [vmem:[%s2897_s1 + $0x60] sm:$0xff]   ;;  %v2259_v20 = vld [vmem:[%s2897_s1 + $0x68] sm:$0xff]  }
   0x6   :  { %1995 = vmatprep.subr.bf16.mxu1 %v2244_v5  ;;  %v2252_v13 = vld [vmem:[%s2897_s1 + $0xd8] sm:$0xff]   ;;  %v2256_v17 = vld [vmem:[%s2897_s1 + $0xe0] sm:$0xff]   ;;  %v2260_v21 = vld [vmem:[%s2897_s1 + $0xe8] sm:$0xff]  }
   0x7   :  { %v2253_v14 = vld [vmem:[%s2897_s1 + $0x18] sm:$0xff]   ;;  %v2257_v18 = vld [vmem:[%s2897_s1 + $0x20] sm:$0xff]   ;;  %v2261_v22 = vld [vmem:[%s2897_s1 + $0x28] sm:$0xff]  }
   0x8   :  { %1914 = vmatpush3.bf16.msra.mxu0 %v2245_v6  ;;  %v2254_v15 = vld [vmem:[%s2897_s1 + $0x98] sm:$0xff]   ;;  %v2258_v19 = vld [vmem:[%s2897_s1 + $0xa0] sm:$0xff]   ;;  %v2262_v23 = vld [vmem:[%s2897_s1 + $0xa8] sm:$0xff]  }
   0x9   :  { %1996 = vmatpush3.bf16.msra.mxu1 %v2246_v7  ;;  %1915 = vmatprep.subr.bf16.mxu0 %v2247_v8  ;;  %v2263_v24 = vld [vmem:[%s2897_s1 + $0x70] sm:$0xff]   ;;  %v2267_v28 = vld [vmem:[%s2897_s1 + $0x78] sm:$0xff]   ;;  %v15_v32 = vld [vmem:[%s2898_s0] sm:$0xff] }
   0xa   :  { %1997 = vmatprep.subr.bf16.mxu1 %v2248_v9  ;;  %v2264_v25 = vld [vmem:[%s2897_s1 + $0xf0] sm:$0xff]   ;;  %v2268_v29 = vld [vmem:[%s2897_s1 + $0xf8] sm:$0xff]   ;;  %v19_v33 = vld [vmem:[%s2898_s0 + $0x20] sm:$0xff] }
   0xb   :  { %v2265_v26 = vld [vmem:[%s2897_s1 + $0x30] sm:$0xff]   ;;  %v2269_v30 = vld [vmem:[%s2897_s1 + $0x38] sm:$0xff]   ;;  %v16_v34 = vld [vmem:[%s2898_s0 + $0x8] sm:$0xff]  ;;  %v1658_v35 = vcombine.low %v15_v32, %v19_v33  ;;  %v1659_v36 = vcombine.high %v15_v32, %v19_v33 }
   0xc   :  { %1916 = vmatpush3.bf16.msra.mxu0 %v2249_v10  ;;  %v2266_v27 = vld [vmem:[%s2897_s1 + $0xb0] sm:$0xff]   ;;  %v2270_v31 = vld [vmem:[%s2897_s1 + $0xb8] sm:$0xff]   ;;  %v20_v37 = vld [vmem:[%s2898_s0 + $0x28] sm:$0xff] }
   0xd   :  { %1998 = vmatpush3.bf16.msra.mxu1 %v2250_v11  ;;  %1917 = vmatprep.subr.bf16.mxu0 %v2251_v12  ;;  %v1660_v38 = vcombine.low %v16_v34, %v20_v37  ;;  %v1661_v39 = vcombine.high %v16_v34, %v20_v37  ;;  %v2271_v40 = vld [vmem:[%s2897_s1 + $0x140] sm:$0xff]   ;;  %v24_v47 = vld [vmem:[%s2898_s0 + $0x48] sm:$0xff]  ;;  %v2279_v62 = vld [vmem:[%s2897_s1 + $0x150] sm:$0xff]  }
   0xe   :  { %1999 = vmatprep.subr.bf16.mxu1 %v2252_v13  ;;  %1078 = vmatprep.mubr.bf16.mxu0 %v1659_v36  ;;  %v2272_v41 = vld [vmem:[%s2897_s1 + $0x100] sm:$0xff]   ;;  %v28_v48 = vld [vmem:[%s2898_s0 + $0x68] sm:$0xff]  ;;  %v2280_v3 = vld [vmem:[%s2897_s1 + $0x110] sm:$0xff]  }
   0xf   :  { %1198 = vmatprep.mubr.bf16.mxu1 %v1661_v39  ;;  %v2273_v42 = vld [vmem:[%s2897_s1 + $0x1c0] sm:$0xff]   ;;  %v1669_v49 = vcombine.high %v24_v47, %v28_v48  ;;  %v2275_v50 = vld [vmem:[%s2897_s1 + $0x148] sm:$0xff]   ;;  %v1668_v53 = vcombine.low %v24_v47, %v28_v48  ;;  %v2281_v5 = vld [vmem:[%s2897_s1 + $0x1d0] sm:$0xff]  }
  0x10   :  { %1918 = vmatpush3.bf16.msra.mxu0 %v2253_v14  ;;  %v2274_v43 = vld [vmem:[%s2897_s1 + $0x180] sm:$0xff]   ;;  %v2276_v52 = vld [vmem:[%s2897_s1 + $0x108] sm:$0xff]   ;;  %v2282_v8 = vld [vmem:[%s2897_s1 + $0x190] sm:$0xff]  }
  0x11   :  { %2000 = vmatpush3.bf16.msra.mxu1 %v2254_v15  ;;  %1919 = vmatprep.subr.bf16.mxu0 %v2255_v16  ;;  %v23_v44 = vld [vmem:[%s2898_s0 + $0x40] sm:$0xff]  ;;  %v2277_v54 = vld [vmem:[%s2897_s1 + $0x1c8] sm:$0xff]   ;;  %v2283_v10 = vld [vmem:[%s2897_s1 + $0x158] sm:$0xff]  }
  0x12   :  { %2001 = vmatprep.subr.bf16.mxu1 %v2256_v17  ;;  %v27_v45 = vld [vmem:[%s2898_s0 + $0x60] sm:$0xff]  ;;  %v2278_v55 = vld [vmem:[%s2897_s1 + $0x188] sm:$0xff]   ;;  %v2284_v12 = vld [vmem:[%s2897_s1 + $0x118] sm:$0xff]  }
  0x13   :  { %v1667_v46 = vcombine.high %v23_v44, %v27_v45  ;;  %v1666_v51 = vcombine.low %v23_v44, %v27_v45  ;;  %v31_v56 = vld [vmem:[%s2898_s0 + $0x80] sm:$0xff]  ;;  %v32_v58 = vld [vmem:[%s2898_s0 + $0x88] sm:$0xff]  ;;  %v2285_v13 = vld [vmem:[%s2897_s1 + $0x1d8] sm:$0xff]  }
  0x14   :  { %1920 = vmatpush3.bf16.msra.mxu0 %v2257_v18  ;;  %v35_v57 = vld [vmem:[%s2898_s0 + $0xa0] sm:$0xff]  ;;  %v36_v59 = vld [vmem:[%s2898_s0 + $0xa8] sm:$0xff]  ;;  %v2286_v15 = vld [vmem:[%s2897_s1 + $0x198] sm:$0xff]  }
  0x15   :  { %2002 = vmatpush3.bf16.msra.mxu1 %v2258_v19  ;;  %1921 = vmatprep.subr.bf16.mxu0 %v2259_v20  ;;  %v1675_v60 = vcombine.high %v31_v56, %v35_v57  ;;  %v1677_v61 = vcombine.high %v32_v58, %v36_v59  ;;  %v39_v63 = vld [vmem:[%s2898_s0 + $0xc0] sm:$0xff]  ;;  %v40_v1 = vld [vmem:[%s2898_s0 + $0xc8] sm:$0xff]  ;;  %v1674_v4 = vcombine.low %v31_v56, %v35_v57  ;;  %v2297_v44 = vld [vmem:[%s2897_s1 + $0x1f0] sm:$0xff]  }
  0x16   :  { %2003 = vmatprep.subr.bf16.mxu1 %v2260_v21  ;;  %v43_v0 = vld [vmem:[%s2898_s0 + $0xe0] sm:$0xff]  ;;  %v44_v2 = vld [vmem:[%s2898_s0 + $0xe8] sm:$0xff]  ;;  %v1676_v6 = vcombine.low %v32_v58, %v36_v59  ;;  %v2298_v45 = vld [vmem:[%s2897_s1 + $0x1b0] sm:$0xff]  }
  0x17   :  { %v1683_v7 = vcombine.high %v39_v63, %v43_v0  ;;  %v1685_v9 = vcombine.high %v40_v1, %v44_v2  ;;  %v47_v11 = vld [vmem:[%s2898_s0 + $0x100] sm:$0xff]  ;;  %v48_v16 = vld [vmem:[%s2898_s0 + $0x108] sm:$0xff]  ;;  %v1682_v18 = vcombine.low %v39_v63, %v43_v0  ;;  %v1684_v20 = vcombine.low %v40_v1, %v44_v2 }
  0x18   :  { %1922 = vmatpush3.bf16.msra.mxu0 %v2261_v22  ;;  %v51_v14 = vld [vmem:[%s2898_s0 + $0x120] sm:$0xff]  ;;  %v52_v17 = vld [vmem:[%s2898_s0 + $0x128] sm:$0xff] }
  0x19   :  { %2004 = vmatpush3.bf16.msra.mxu1 %v2262_v23  ;;  %1923 = vmatprep.subr.bf16.mxu0 %v2263_v24  ;;  %v2287_v19 = vld [vmem:[%s2897_s1 + $0x160] sm:$0xff]   ;;  %v1691_v21 = vcombine.high %v47_v11, %v51_v14  ;;  %v1693_v23 = vcombine.high %v48_v16, %v52_v17  ;;  %v2292_v32 = vld [vmem:[%s2897_s1 + $0x128] sm:$0xff]   ;;  %v1692_v33 = vcombine.low %v48_v16, %v52_v17 }
  0x1a   :  { %2005 = vmatprep.subr.bf16.mxu1 %v2264_v25  ;;  %v2288_v22 = vld [vmem:[%s2897_s1 + $0x120] sm:$0xff]   ;;  %v2294_v37 = vld [vmem:[%s2897_s1 + $0x1a8] sm:$0xff]  }
  0x1b   :  { %v2289_v24 = vld [vmem:[%s2897_s1 + $0x1e0] sm:$0xff]   ;;  %v72_v56 = vld [vmem:[%s2898_s0 + $0x1c8] sm:$0xff] }
  0x1c   :  { %1924 = vmatpush3.bf16.msra.mxu0 %v2265_v26  ;;  %v55_v25 = vld [vmem:[%s2898_s0 + $0x140] sm:$0xff]  ;;  %v76_v57 = vld [vmem:[%s2898_s0 + $0x1e8] sm:$0xff] }
  0x1d   :  { %2006 = vmatpush3.bf16.msra.mxu1 %v2266_v27  ;;  %1925 = vmatprep.subr.bf16.mxu0 %v2267_v28  ;;  %v59_v26 = vld [vmem:[%s2898_s0 + $0x160] sm:$0xff]  ;;  %v56_v28 = vld [vmem:[%s2898_s0 + $0x148] sm:$0xff] }
  0x1e   :  { %2007 = vmatprep.subr.bf16.mxu1 %v2268_v29  ;;  %v2290_v27 = vld [vmem:[%s2897_s1 + $0x1a0] sm:$0xff]   ;;  %v60_v29 = vld [vmem:[%s2898_s0 + $0x168] sm:$0xff]  ;;  %v1699_v34 = vcombine.high %v55_v25, %v59_v26 }
  0x1f   :  { %v1701_v36 = vcombine.high %v56_v28, %v60_v29  ;;  %v67_v39 = vld [vmem:[%s2898_s0 + $0x1a0] sm:$0xff]  ;;  %v1700_v47 = vcombine.low %v56_v28, %v60_v29  ;;  %v80_v0 = vld [vmem:[%s2898_s0 + $0x208] sm:$0xff]  ;;  %v25_v28 = vld [vmem:[%s2898_s0 + $0x50] sm:$0xff] }
  0x20   :  { %1926 = vmatpush3.bf16.msra.mxu0 %v2269_v30  ;;  %v2291_v30 = vld [vmem:[%s2897_s1 + $0x168] sm:$0xff]   ;;  %v83_v63 = vld [vmem:[%s2898_s0 + $0x220] sm:$0xff]  ;;  %v29_v29 = vld [vmem:[%s2898_s0 + $0x70] sm:$0xff] }
  0x21   :  { %2008 = vmatpush3.bf16.msra.mxu1 %v2270_v31  ;;  %2075 = vmatprep.subr.bf16.mxu0 %v2271_v40  ;;  %v1690_v31 = vcombine.low %v47_v11, %v51_v14  ;;  %v2295_v40 = vld [vmem:[%s2897_s1 + $0x170] sm:$0xff]   ;;  %v84_v1 = vld [vmem:[%s2898_s0 + $0x228] sm:$0xff]  ;;  %v95_v14 = vld [vmem:[%s2898_s0 + $0x280] sm:$0x11] }
  0x22   :  { %2157 = vmatprep.subr.bf16.mxu1 %v2273_v42  ;;  %v68_v42 = vld [vmem:[%s2898_s0 + $0x1a8] sm:$0xff]  ;;  %v1724_v11 = vcombine.low %v80_v0, %v84_v1 }
  0x23   :  { %1079 = vmatmul.mubr.bf16.vlgmr.msra.gmra.mrb[0].mxu0 %v1658_v35  ;;  %v2293_v35 = vld [vmem:[%s2897_s1 + $0x1e8] sm:$0xff]  }
  0x24   :  { %1199 = vmatmul.mubr.bf16.vlgmr.msra.gmra.mrb[0].mxu1 %v1660_v38  ;;  %2076 = vmatpush3.bf16.msra.mxu0 %v2272_v41  ;;  %v63_v38 = vld [vmem:[%s2898_s0 + $0x180] sm:$0xff]  ;;  %v64_v41 = vld [vmem:[%s2898_s0 + $0x188] sm:$0xff] }
  0x25   :  { %2158 = vmatpush3.bf16.msra.mxu1 %v2274_v43  ;;  %1086 = vmatprep.mubr.bf16.mxu0 %v1667_v46  ;;  %v2296_v43 = vld [vmem:[%s2897_s1 + $0x130] sm:$0xff]   ;;  %v1698_v46 = vcombine.low %v55_v25, %v59_v26  ;;  %v1707_v48 = vcombine.high %v63_v38, %v67_v39  ;;  %v1706_v58 = vcombine.low %v63_v38, %v67_v39  ;;  %v34_v38 = vld [vmem:[%s2898_s0 + $0x98] sm:$0xff] }
  0x26   :  { %1206 = vmatprep.mubr.bf16.mxu1 %v1669_v49  ;;  %2077 = vmatprep.subr.bf16.mxu0 %v2275_v50  ;;  %v1709_v49 = vcombine.high %v64_v41, %v68_v42  ;;  %v2299_v50 = vld [vmem:[%s2897_s1 + $0x178] sm:$0xff]   ;;  %v1708_v59 = vcombine.low %v64_v41, %v68_v42 }
  0x27   :  { %2159 = vmatprep.subr.bf16.mxu1 %v2277_v54  ;;  %v71_v54 = vld [vmem:[%s2898_s0 + $0x1c0] sm:$0xff]  ;;  %v38_v39 = vld [vmem:[%s2898_s0 + $0xb8] sm:$0xff] }
  0x28   :  { %2078 = vmatpush3.bf16.msra.mxu0 %v2276_v52  ;;  %v2303_v52 = vld [vmem:[%s2897_s1 + $0x1f8] sm:$0xff]  }
  0x29   :  { %2160 = vmatpush3.bf16.msra.mxu1 %v2278_v55  ;;  %2079 = vmatprep.subr.bf16.mxu0 %v2279_v62  ;;  %v75_v55 = vld [vmem:[%s2898_s0 + $0x1e0] sm:$0xff] }
  0x2a   :  { %2161 = vmatprep.subr.bf16.mxu1 %v2281_v5  ;;  %v79_v62 = vld [vmem:[%s2898_s0 + $0x200] sm:$0xff]  ;;  %v1714_v2 = vcombine.low %v71_v54, %v75_v55  ;;  %v1725_v5 = vcombine.high %v80_v0, %v84_v1 }
  0x2b   :  { %1087 = vmatmul.mubr.bf16.gmra.mrb[4].mxu0 %v1666_v51  ;;  %v2300_v51 = vld [vmem:[%s2897_s1 + $0x138] sm:$0xff]  }
  0x2c   :  { %1207 = vmatmul.mubr.bf16.gmra.mrb[4].mxu1 %v1668_v53  ;;  %1094 = vmatprep.mubr.bf16.mxu0 %v1675_v60  ;;  %v2306_v53 = vld [vmem:[%s2897_s1 + $0x1b8] sm:$0xff]   ;;  %v1715_v60 = vcombine.high %v71_v54, %v75_v55 }
  0x2d   :  { %1214 = vmatprep.mubr.bf16.mxu1 %v1677_v61  ;;  %2080 = vmatpush3.bf16.msra.mxu0 %v2280_v3  ;;  %v1717_v61 = vcombine.high %v72_v56, %v76_v57  ;;  %v1716_v3 = vcombine.low %v72_v56, %v76_v57  ;;  %v50_v54 = vld [vmem:[%s2898_s0 + $0x118] sm:$0xff] }
  0x2e   :  { %2162 = vmatpush3.bf16.msra.mxu1 %v2282_v8  ;;  %2081 = vmatprep.subr.bf16.mxu0 %v2283_v10  ;;  %v88_v8 = vld [vmem:[%s2898_s0 + $0x248] sm:$0xff]  ;;  %v1722_v10 = vcombine.low %v79_v62, %v83_v63  ;;  %v54_v55 = vld [vmem:[%s2898_s0 + $0x138] sm:$0xff] }
  0x2f   :  { %2163 = vmatprep.subr.bf16.mxu1 %v2285_v13  ;;  %v1696_v1 = vcombine.low %v50_v54, %v54_v55 }
  0x31   :  { %2082 = vmatpush3.bf16.msra.mxu0 %v2284_v12 }
  0x32   :  { %2164 = vmatpush3.bf16.msra.mxu1 %v2286_v15  ;;  %2083 = vmatprep.subr.bf16.mxu0 %v2287_v19  ;;  %v96_v15 = vld [vmem:[%s2898_s0 + $0x288] sm:$0x11] }
  0x33   :  { %1095 = vmatmul.mubr.bf16.gmra.mrb[8].mxu0 %v1674_v4  ;;  %2165 = vmatprep.subr.bf16.mxu1 %v2289_v24  ;;  %v1723_v4 = vcombine.high %v79_v62, %v83_v63  ;;  %v1741_v19 = vcombine.high %v96_v15, %v96_v15  ;;  %v1738_v24 = vcombine.low %v95_v14, %v95_v14  ;;  %v58_v62 = vld [vmem:[%s2898_s0 + $0x158] sm:$0xff] }
  0x34   :  { %1215 = vmatmul.mubr.bf16.gmra.mrb[8].mxu1 %v1676_v6  ;;  %1102 = vmatprep.mubr.bf16.mxu0 %v1683_v7  ;;  %v87_v6 = vld [vmem:[%s2898_s0 + $0x240] sm:$0xff]  ;;  %v1740_v25 = vcombine.low %v96_v15, %v96_v15  ;;  %v62_v63 = vld [vmem:[%s2898_s0 + $0x178] sm:$0xff] }
  0x35   :  { %1222 = vmatprep.mubr.bf16.mxu1 %v1685_v9  ;;  %2084 = vmatpush3.bf16.msra.mxu0 %v2288_v22  ;;  %v91_v7 = vld [vmem:[%s2898_s0 + $0x260] sm:$0xff]  ;;  %v92_v9 = vld [vmem:[%s2898_s0 + $0x268] sm:$0xff]  ;;  %v18_v22 = vld [vmem:[%s2898_s0 + $0x18] sm:$0xff] }
  0x36   :  { %2166 = vmatpush3.bf16.msra.mxu1 %v2290_v27  ;;  %2085 = vmatprep.subr.bf16.mxu0 %v2291_v30  ;;  %v1731_v12 = vcombine.high %v87_v6, %v91_v7  ;;  %v1733_v13 = vcombine.high %v88_v8, %v92_v9  ;;  %v1730_v16 = vcombine.low %v87_v6, %v91_v7  ;;  %v26_v30 = vld [vmem:[%s2898_s0 + $0x58] sm:$0xff] }
  0x37   :  { %2167 = vmatprep.subr.bf16.mxu1 %v2293_v35  ;;  %v1732_v17 = vcombine.low %v88_v8, %v92_v9  ;;  %v66_v6 = vld [vmem:[%s2898_s0 + $0x198] sm:$0xff]  ;;  %v1704_v9 = vcombine.low %v58_v62, %v62_v63 }
  0x38   :  { %v70_v7 = vld [vmem:[%s2898_s0 + $0x1b8] sm:$0xff] }
  0x39   :  { %2086 = vmatpush3.bf16.msra.mxu0 %v2292_v32  ;;  %v78_v15 = vld [vmem:[%s2898_s0 + $0x1f8] sm:$0xff] }
  0x3a   :  { %2168 = vmatpush3.bf16.msra.mxu1 %v2294_v37  ;;  %2087 = vmatprep.subr.bf16.mxu0 %v2295_v40  ;;  %v37_v37 = vld [vmem:[%s2898_s0 + $0xb0] sm:$0xff]  ;;  %v1670_v40 = vcombine.low %v25_v28, %v29_v29 }
  0x3b   :  { %1103 = vmatmul.mubr.bf16.gmra.mrb[12].mxu0 %v1682_v18  ;;  %2169 = vmatprep.subr.bf16.mxu1 %v2297_v44  ;;  %v1739_v18 = vcombine.high %v95_v14, %v95_v14  ;;  %v41_v44 = vld [vmem:[%s2898_s0 + $0xd0] sm:$0xff]  ;;  %v74_v14 = vld [vmem:[%s2898_s0 + $0x1d8] sm:$0xff] }
  0x3c   :  { %1223 = vmatmul.mubr.bf16.gmra.mrb[12].mxu1 %v1684_v20  ;;  %1110 = vmatprep.mubr.bf16.mxu0 %v1691_v21  ;;  %v17_v20 = vld [vmem:[%s2898_s0 + $0x10] sm:$0xff] }
  0x3d   :  { %1230 = vmatprep.mubr.bf16.mxu1 %v1693_v23  ;;  %2088 = vmatpush3.bf16.msra.mxu0 %v2296_v43  ;;  %v21_v21 = vld [vmem:[%s2898_s0 + $0x30] sm:$0xff]  ;;  %v22_v23 = vld [vmem:[%s2898_s0 + $0x38] sm:$0xff]  ;;  %v1681_v43 = vcombine.high %v34_v38, %v38_v39 }
  0x3e   :  { %2170 = vmatpush3.bf16.msra.mxu1 %v2298_v45  ;;  %2089 = vmatprep.subr.bf16.mxu0 %v2299_v50  ;;  %v1663_v26 = vcombine.high %v17_v20, %v21_v21  ;;  %v1665_v27 = vcombine.high %v18_v22, %v22_v23  ;;  %v1662_v32 = vcombine.low %v17_v20, %v21_v21  ;;  %v45_v45 = vld [vmem:[%s2898_s0 + $0xf0] sm:$0xff] }
  0x3f   :  { %2171 = vmatprep.subr.bf16.mxu1 %v2303_v52  ;;  %v1687_v50 = vcombine.high %v41_v44, %v45_v45  ;;  %v49_v52 = vld [vmem:[%s2898_s0 + $0x110] sm:$0xff]  ;;  %v1686_v56 = vcombine.low %v41_v44, %v45_v45 }
  0x40   :  { %v81_v20 = vld [vmem:[%s2898_s0 + $0x210] sm:$0xff] }
  0x41   :  { %2090 = vmatpush3.bf16.msra.mxu0 %v2300_v51  ;;  %v85_v21 = vld [vmem:[%s2898_s0 + $0x230] sm:$0xff] }
  0x42   :  { %2172 = vmatpush3.bf16.msra.mxu1 %v2306_v53  ;;  %v53_v53 = vld [vmem:[%s2898_s0 + $0x130] sm:$0xff] }
  0x43   :  { %1111 = vmatmul.mubr.bf16.gmra.mrb[16].mxu0 %v1690_v31  ;;  %v30_v31 = vld [vmem:[%s2898_s0 + $0x78] sm:$0xff]  ;;  %v1694_v0 = vcombine.low %v49_v52, %v53_v53 }
  0x44   :  { %1231 = vmatmul.mubr.bf16.gmra.mrb[16].mxu1 %v1692_v33  ;;  %1118 = vmatprep.mubr.bf16.mxu0 %v1699_v34  ;;  %v1664_v33 = vcombine.low %v18_v22, %v22_v23  ;;  %v1671_v34 = vcombine.high %v25_v28, %v29_v29  ;;  %v1673_v35 = vcombine.high %v26_v30, %v30_v31  ;;  %v82_v22 = vld [vmem:[%s2898_s0 + $0x218] sm:$0xff]  ;;  %v89_v28 = vld [vmem:[%s2898_s0 + $0x250] sm:$0xff] }
  0x45   :  { %1238 = vmatprep.mubr.bf16.mxu1 %v1701_v36  ;;  %v33_v36 = vld [vmem:[%s2898_s0 + $0x90] sm:$0xff]  ;;  %v1672_v41 = vcombine.low %v26_v30, %v30_v31  ;;  %v86_v23 = vld [vmem:[%s2898_s0 + $0x238] sm:$0xff] }
  0x46   :  { %v1679_v42 = vcombine.high %v33_v36, %v37_v37  ;;  %v93_v29 = vld [vmem:[%s2898_s0 + $0x270] sm:$0xff]  ;;  %v90_v30 = vld [vmem:[%s2898_s0 + $0x258] sm:$0xff] }
  0x47   :  { %v94_v31 = vld [vmem:[%s2898_s0 + $0x278] sm:$0xff] }
  0x4b   :  { %1119 = vmatmul.mubr.bf16.gmra.mrb[20].mxu0 %v1698_v46  ;;  %v42_v46 = vld [vmem:[%s2898_s0 + $0xd8] sm:$0xff] }
  0x4c   :  { %1239 = vmatmul.mubr.bf16.gmra.mrb[20].mxu1 %v1700_v47  ;;  %1126 = vmatprep.mubr.bf16.mxu0 %v1707_v48  ;;  %v46_v47 = vld [vmem:[%s2898_s0 + $0xf8] sm:$0xff]  ;;  %v1678_v48 = vcombine.low %v33_v36, %v37_v37  ;;  %v97_v36 = vld [vmem:[%s2898_s0 + $0x290] sm:$0x11] }
  0x4d   :  { %1246 = vmatprep.mubr.bf16.mxu1 %v1709_v49  ;;  %v1680_v49 = vcombine.low %v34_v38, %v38_v39  ;;  %v1689_v51 = vcombine.high %v42_v46, %v46_v47  ;;  %v1688_v57 = vcombine.low %v42_v46, %v46_v47  ;;  %v98_v37 = vld [vmem:[%s2898_s0 + $0x298] sm:$0x11]  ;;  %v1734_v38 = vcombine.low %v89_v28, %v93_v29  ;;  %v2778_v46 = vld [vmem:[%s2899_s2] ss:$0 sm:$0xff] }
  0x4e   :  { %v1736_v39 = vcombine.low %v90_v30, %v94_v31 }
  0x53   :  { %1127 = vmatmul.mubr.bf16.gmra.mrb[24].mxu0 %v1706_v58  ;;  %v1695_v58 = vcombine.high %v49_v52, %v53_v53 }
  0x54   :  { %1247 = vmatmul.mubr.bf16.gmra.mrb[24].mxu1 %v1708_v59  ;;  %1134 = vmatprep.mubr.bf16.mxu0 %v1715_v60  ;;  %v1697_v59 = vcombine.high %v50_v54, %v54_v55  ;;  %v57_v60 = vld [vmem:[%s2898_s0 + $0x150] sm:$0xff] }
  0x55   :  { %1254 = vmatprep.mubr.bf16.mxu1 %v1717_v61  ;;  %v61_v61 = vld [vmem:[%s2898_s0 + $0x170] sm:$0xff] }
  0x56   :  { %v1702_v8 = vcombine.low %v57_v60, %v61_v61 }
  0x5b   :  { %1135 = vmatmul.mubr.bf16.gmra.mrb[28].mxu0 %v1714_v2  ;;  %v1703_v2 = vcombine.high %v57_v60, %v61_v61 }
  0x5c   :  { %1255 = vmatmul.mubr.bf16.gmra.mrb[28].mxu1 %v1716_v3  ;;  %1142 = vmatprep.mubr.bf16.mxu0 %v1723_v4  ;;  %v1705_v3 = vcombine.high %v58_v62, %v62_v63  ;;  %v65_v4 = vld [vmem:[%s2898_s0 + $0x190] sm:$0xff] }
  0x5d   :  { %1262 = vmatprep.mubr.bf16.mxu1 %v1725_v5  ;;  %v69_v5 = vld [vmem:[%s2898_s0 + $0x1b0] sm:$0xff] }
  0x63   :  { %1143 = vmatmul.mubr.bf16.gmra.mrb[32].mxu0 %v1722_v10  ;;  %v1711_v10 = vcombine.high %v65_v4, %v69_v5 }
  0x64   :  { %1263 = vmatmul.mubr.bf16.gmra.mrb[32].mxu1 %v1724_v11  ;;  %1150 = vmatprep.mubr.bf16.mxu0 %v1731_v12  ;;  %v1713_v11 = vcombine.high %v66_v6, %v70_v7  ;;  %v73_v12 = vld [vmem:[%s2898_s0 + $0x1d0] sm:$0xff] }
  0x65   :  { %1270 = vmatprep.mubr.bf16.mxu1 %v1733_v13  ;;  %v77_v13 = vld [vmem:[%s2898_s0 + $0x1f0] sm:$0xff] }
  0x6b   :  { %1151 = vmatmul.mubr.bf16.gmra.mrb[36].mxu0 %v1730_v16  ;;  %v1710_v16 = vcombine.low %v65_v4, %v69_v5 }
  0x6c   :  { %1271 = vmatmul.mubr.bf16.gmra.mrb[36].mxu1 %v1732_v17  ;;  %1158 = vmatprep.mubr.bf16.mxu0 %v1739_v18  ;;  %v1712_v17 = vcombine.low %v66_v6, %v70_v7  ;;  %v1719_v18 = vcombine.high %v73_v12, %v77_v13 }
  0x6d   :  { %1278 = vmatprep.mubr.bf16.mxu1 %v1741_v19  ;;  %v1721_v19 = vcombine.high %v74_v14, %v78_v15 }
  0x73   :  { %1159 = vmatmul.mubr.bf16.gmra.mrb[40].mxu0 %v1738_v24  ;;  %v1718_v24 = vcombine.low %v73_v12, %v77_v13 }
  0x74   :  { %1279 = vmatmul.mubr.bf16.gmra.mrb[40].mxu1 %v1740_v25  ;;  %1318 = vmatprep.mubr.bf16.mxu0 %v1663_v26  ;;  %v1720_v25 = vcombine.low %v74_v14, %v78_v15  ;;  %v1727_v26 = vcombine.high %v81_v20, %v85_v21 }
  0x75   :  { %1438 = vmatprep.mubr.bf16.mxu1 %v1665_v27  ;;  %v1729_v27 = vcombine.high %v82_v22, %v86_v23 }
  0x7b   :  { %1319 = vmatmul.mubr.bf16.vlgmr.msra.gmra.mrb[44].mxu0 %v1662_v32  ;;  %v1726_v32 = vcombine.low %v81_v20, %v85_v21 }
  0x7c   :  { %1439 = vmatmul.mubr.bf16.vlgmr.msra.gmra.mrb[44].mxu1 %v1664_v33  ;;  %1326 = vmatprep.mubr.bf16.mxu0 %v1671_v34  ;;  %v1728_v33 = vcombine.low %v82_v22, %v86_v23  ;;  %v1735_v34 = vcombine.high %v89_v28, %v93_v29 }
  0x7d   :  { %1446 = vmatprep.mubr.bf16.mxu1 %v1673_v35  ;;  %v1737_v35 = vcombine.high %v90_v30, %v94_v31 }
  0x83   :  { %1327 = vmatmul.mubr.bf16.gmra.mrb[48].mxu0 %v1670_v40  ;;  %v1743_v40 = vcombine.high %v97_v36, %v97_v36 }
  0x84   :  { %1447 = vmatmul.mubr.bf16.gmra.mrb[48].mxu1 %v1672_v41  ;;  %1334 = vmatprep.mubr.bf16.mxu0 %v1679_v42  ;;  %v1745_v41 = vcombine.high %v98_v37, %v98_v37  ;;  %v1742_v42 = vcombine.low %v97_v36, %v97_v36 }
  0x85   :  { %1454 = vmatprep.mubr.bf16.mxu1 %v1681_v43  ;;  %v1744_v43 = vcombine.low %v98_v37, %v98_v37 }
  0x8b   :  { %1335 = vmatmul.mubr.bf16.gmra.mrb[52].mxu0 %v1678_v48 }
  0x8c   :  { %1455 = vmatmul.mubr.bf16.gmra.mrb[52].mxu1 %v1680_v49  ;;  %1342 = vmatprep.mubr.bf16.mxu0 %v1687_v50 }
  0x8d   :  { %1462 = vmatprep.mubr.bf16.mxu1 %v1689_v51 }
  0x93   :  { %1343 = vmatmul.mubr.bf16.gmra.mrb[56].mxu0 %v1686_v56 }
  0x94   :  { %1463 = vmatmul.mubr.bf16.gmra.mrb[56].mxu1 %v1688_v57  ;;  %1350 = vmatprep.mubr.bf16.mxu0 %v1695_v58 }
  0x95   :  { %1470 = vmatprep.mubr.bf16.mxu1 %v1697_v59 }
  0x9b   :  { %1351 = vmatmul.mubr.bf16.gmra.mrb[60].mxu0 %v1694_v0 }
  0x9c   :  { %1471 = vmatmul.mubr.bf16.gmra.mrb[60].mxu1 %v1696_v1  ;;  %1358 = vmatprep.mubr.bf16.mxu0 %v1703_v2 }
  0x9d   :  { %1478 = vmatprep.mubr.bf16.mxu1 %v1705_v3 }
  0xa3   :  { %1359 = vmatmul.mubr.bf16.gmra.mrb[64].mxu0 %v1702_v8 }
  0xa4   :  { %1479 = vmatmul.mubr.bf16.gmra.mrb[64].mxu1 %v1704_v9  ;;  %1366 = vmatprep.mubr.bf16.mxu0 %v1711_v10 }
  0xa5   :  { %1486 = vmatprep.mubr.bf16.mxu1 %v1713_v11 }
  0xab   :  { %1367 = vmatmul.mubr.bf16.gmra.mrb[68].mxu0 %v1710_v16 }
  0xac   :  { %1487 = vmatmul.mubr.bf16.gmra.mrb[68].mxu1 %v1712_v17  ;;  %1374 = vmatprep.mubr.bf16.mxu0 %v1719_v18 }
  0xad   :  { %1494 = vmatprep.mubr.bf16.mxu1 %v1721_v19 }
  0xb3   :  { %1375 = vmatmul.mubr.bf16.gmra.mrb[72].mxu0 %v1718_v24 }
  0xb4   :  { %1495 = vmatmul.mubr.bf16.gmra.mrb[72].mxu1 %v1720_v25  ;;  %1382 = vmatprep.mubr.bf16.mxu0 %v1727_v26 }
  0xb5   :  { %1502 = vmatprep.mubr.bf16.mxu1 %v1729_v27 }
  0xbb   :  { %1383 = vmatmul.mubr.bf16.gmra.mrb[76].mxu0 %v1726_v32 }
  0xbc   :  { %1503 = vmatmul.mubr.bf16.gmra.mrb[76].mxu1 %v1728_v33  ;;  %1390 = vmatprep.mubr.bf16.mxu0 %v1735_v34 }
  0xbd   :  { %1510 = vmatprep.mubr.bf16.mxu1 %v1737_v35 }
  0xc3   :  { %1391 = vmatmul.mubr.bf16.gmra.mrb[80].mxu0 %v1734_v38 }
  0xc4   :  { %1511 = vmatmul.mubr.bf16.gmra.mrb[80].mxu1 %v1736_v39  ;;  %1398 = vmatprep.mubr.bf16.mxu0 %v1743_v40 }
  0xc5   :  { %1518 = vmatprep.mubr.bf16.mxu1 %v1745_v41 }
  0xcb   :  { %1399 = vmatmul.mubr.bf16.gmra.mrb[84].mxu0 %v1742_v42 }
  0xcc   :  { %1519 = vmatmul.mubr.bf16.gmra.mrb[84].mxu1 %v1744_v43 }
  0xf6   :  { %v1927_v44 = vpop.f32.mrb[0].mxu0 }
  0xf7   :  { %v2009_v45 = vpop.f32.mrb[0].mxu1  ;;  %v1928_v47 = vpop.f32.mrb[1].mxu0 }
  0xf8   :  { %v1929_v48 = vadd.f32 %v1928_v47, %v1927_v44  ;;  %v2010_v49 = vpop.f32.mrb[1].mxu1  ;;  %v1930_v50 = vpop.f32.mrb[2].mxu0 }
  0xf9   :  { %v2011_v51 = vadd.f32 %v2010_v49, %v2009_v45  ;;  %v2012_v52 = vpop.f32.mrb[2].mxu1  ;;  %v1931_v53 = vpop.f32.mrb[3].mxu0 }
  0xfa   :  { %v1081_v54 = vadd.f32 %v1929_v48, %v2778_v46  ;;  %v1932_v55 = vadd.f32 %v1931_v53, %v1930_v50  ;;  %v2013_v56 = vpop.f32.mrb[3].mxu1 }
  0xfb   :  { %v2014_v57 = vadd.f32 %v2013_v56, %v2012_v52 }
  0xfc   :  { %v2781_v58 = vadd.f32 %v2011_v51, %v1081_v54  ;;  %v1084_v59 = vadd.f32 %v1932_v55, %v2778_v46 }
  0xfe   :  { %v2784_v60 = vadd.f32 %v2014_v57, %v1084_v59  ;;  %v1933_v61 = vpop.f32.mrb[4].mxu0 }
  0xff   :  { %v2015_v62 = vpop.f32.mrb[4].mxu1  ;;  %v1934_v63 = vpop.f32.mrb[5].mxu0 }
 0x100   :  { %v1935_v0 = vadd.f32 %v1934_v63, %v1933_v61  ;;  %v2016_v1 = vpop.f32.mrb[5].mxu1  ;;  %v1936_v2 = vpop.f32.mrb[6].mxu0 }
 0x101   :  { %v2017_v3 = vadd.f32 %v2016_v1, %v2015_v62  ;;  %v2018_v4 = vpop.f32.mrb[6].mxu1  ;;  %v1937_v5 = vpop.f32.mrb[7].mxu0 }
 0x102   :  { %v1089_v6 = vadd.f32 %v1935_v0, %v2778_v46  ;;  %v1938_v7 = vadd.f32 %v1937_v5, %v1936_v2  ;;  %v2019_v8 = vpop.f32.mrb[7].mxu1 }
 0x103   :  { %v2020_v9 = vadd.f32 %v2019_v8, %v2018_v4 }
 0x104   :  { %v2787_v10 = vadd.f32 %v2017_v3, %v1089_v6  ;;  %v1092_v11 = vadd.f32 %v1938_v7, %v2778_v46 }
 0x106   :  { %v2790_v12 = vadd.f32 %v2020_v9, %v1092_v11  ;;  %v1939_v13 = vpop.f32.mrb[8].mxu0 }
 0x107   :  { %v2021_v14 = vpop.f32.mrb[8].mxu1  ;;  %v1940_v15 = vpop.f32.mrb[9].mxu0 }
 0x108   :  { %v1941_v16 = vadd.f32 %v1940_v15, %v1939_v13  ;;  %v2022_v17 = vpop.f32.mrb[9].mxu1  ;;  %v1942_v18 = vpop.f32.mrb[10].mxu0 }
 0x109   :  { %v2023_v19 = vadd.f32 %v2022_v17, %v2021_v14  ;;  %v2024_v20 = vpop.f32.mrb[10].mxu1  ;;  %v1943_v21 = vpop.f32.mrb[11].mxu0 }
 0x10a   :  { %v1097_v22 = vadd.f32 %v1941_v16, %v2778_v46  ;;  %v1944_v23 = vadd.f32 %v1943_v21, %v1942_v18  ;;  %v2025_v24 = vpop.f32.mrb[11].mxu1 }
 0x10b   :  { %v2026_v25 = vadd.f32 %v2025_v24, %v2024_v20 }
 0x10c   :  { %v2793_v26 = vadd.f32 %v2023_v19, %v1097_v22  ;;  %v1100_v27 = vadd.f32 %v1944_v23, %v2778_v46 }
 0x10e   :  { %v2796_v28 = vadd.f32 %v2026_v25, %v1100_v27  ;;  %v1945_v29 = vpop.f32.mrb[12].mxu0 }
 0x10f   :  { %v2027_v30 = vpop.f32.mrb[12].mxu1  ;;  %v1946_v31 = vpop.f32.mrb[13].mxu0 }
 0x110   :  { %v1947_v32 = vadd.f32 %v1946_v31, %v1945_v29  ;;  %v2028_v33 = vpop.f32.mrb[13].mxu1  ;;  %v1948_v34 = vpop.f32.mrb[14].mxu0 }
 0x111   :  { %v2029_v35 = vadd.f32 %v2028_v33, %v2027_v30  ;;  %v2030_v36 = vpop.f32.mrb[14].mxu1  ;;  %v1949_v37 = vpop.f32.mrb[15].mxu0 }
 0x112   :  { %v1105_v38 = vadd.f32 %v1947_v32, %v2778_v46  ;;  %v1950_v39 = vadd.f32 %v1949_v37, %v1948_v34  ;;  %v2031_v40 = vpop.f32.mrb[15].mxu1 }
 0x113   :  { %v2032_v41 = vadd.f32 %v2031_v40, %v2030_v36 }
 0x114   :  { %v2799_v42 = vadd.f32 %v2029_v35, %v1105_v38  ;;  %v1108_v43 = vadd.f32 %v1950_v39, %v2778_v46 }
 0x116   :  { %v2802_v44 = vadd.f32 %v2032_v41, %v1108_v43  ;;  %v1951_v45 = vpop.f32.mrb[16].mxu0 }
 0x117   :  { %v2033_v47 = vpop.f32.mrb[16].mxu1  ;;  %v1952_v48 = vpop.f32.mrb[17].mxu0 }
 0x118   :  { %v1953_v49 = vadd.f32 %v1952_v48, %v1951_v45  ;;  %v2034_v50 = vpop.f32.mrb[17].mxu1  ;;  %v1954_v51 = vpop.f32.mrb[18].mxu0 }
 0x119   :  { %v2035_v52 = vadd.f32 %v2034_v50, %v2033_v47  ;;  %v2036_v53 = vpop.f32.mrb[18].mxu1  ;;  %v1955_v54 = vpop.f32.mrb[19].mxu0 }
 0x11a   :  { %v1113_v55 = vadd.f32 %v1953_v49, %v2778_v46  ;;  %v1956_v56 = vadd.f32 %v1955_v54, %v1954_v51  ;;  %v2037_v57 = vpop.f32.mrb[19].mxu1 }
 0x11b   :  { %v2038_v59 = vadd.f32 %v2037_v57, %v2036_v53 }
 0x11c   :  { %v2805_v61 = vadd.f32 %v2035_v52, %v1113_v55  ;;  %v1116_v62 = vadd.f32 %v1956_v56, %v2778_v46 }
 0x11e   :  { %v2808_v63 = vadd.f32 %v2038_v59, %v1116_v62  ;;  %v1957_v0 = vpop.f32.mrb[20].mxu0 }
 0x11f   :  { %v2039_v1 = vpop.f32.mrb[20].mxu1  ;;  %v1958_v2 = vpop.f32.mrb[21].mxu0 }
 0x120   :  { %v1959_v3 = vadd.f32 %v1958_v2, %v1957_v0  ;;  %v2040_v4 = vpop.f32.mrb[21].mxu1  ;;  %v1960_v5 = vpop.f32.mrb[22].mxu0 }
 0x121   :  { %v2041_v6 = vadd.f32 %v2040_v4, %v2039_v1  ;;  %v2042_v7 = vpop.f32.mrb[22].mxu1  ;;  %v1961_v8 = vpop.f32.mrb[23].mxu0 }
 0x122   :  { %v1121_v9 = vadd.f32 %v1959_v3, %v2778_v46  ;;  %v1962_v11 = vadd.f32 %v1961_v8, %v1960_v5  ;;  %v2043_v13 = vpop.f32.mrb[23].mxu1 }
 0x123   :  { %v2044_v14 = vadd.f32 %v2043_v13, %v2042_v7 }
 0x124   :  { %v2811_v15 = vadd.f32 %v2041_v6, %v1121_v9  ;;  %v1124_v16 = vadd.f32 %v1962_v11, %v2778_v46 }
 0x126   :  { %v2814_v17 = vadd.f32 %v2044_v14, %v1124_v16  ;;  %v1963_v18 = vpop.f32.mrb[24].mxu0 }
 0x127   :  { %v2045_v19 = vpop.f32.mrb[24].mxu1  ;;  %v1964_v20 = vpop.f32.mrb[25].mxu0 }
 0x128   :  { %v1965_v21 = vadd.f32 %v1964_v20, %v1963_v18  ;;  %v2046_v22 = vpop.f32.mrb[25].mxu1  ;;  %v1966_v23 = vpop.f32.mrb[26].mxu0 }
 0x129   :  { %v2047_v24 = vadd.f32 %v2046_v22, %v2045_v19  ;;  %v2048_v25 = vpop.f32.mrb[26].mxu1  ;;  %v1967_v27 = vpop.f32.mrb[27].mxu0 }
 0x12a   :  { %v1129_v29 = vadd.f32 %v1965_v21, %v2778_v46  ;;  %v1968_v30 = vadd.f32 %v1967_v27, %v1966_v23  ;;  %v2049_v31 = vpop.f32.mrb[27].mxu1 }
 0x12b   :  { %v2050_v32 = vadd.f32 %v2049_v31, %v2048_v25 }
 0x12c   :  { %v2817_v33 = vadd.f32 %v2047_v24, %v1129_v29  ;;  %v1132_v34 = vadd.f32 %v1968_v30, %v2778_v46 }
 0x12e   :  { %v2820_v35 = vadd.f32 %v2050_v32, %v1132_v34  ;;  %v1969_v36 = vpop.f32.mrb[28].mxu0 }
 0x12f   :  { %v2051_v37 = vpop.f32.mrb[28].mxu1  ;;  %v1970_v38 = vpop.f32.mrb[29].mxu0 }
 0x130   :  { %v1971_v39 = vadd.f32 %v1970_v38, %v1969_v36  ;;  %v2052_v40 = vpop.f32.mrb[29].mxu1  ;;  %v1972_v41 = vpop.f32.mrb[30].mxu0 }
 0x131   :  { %v2053_v43 = vadd.f32 %v2052_v40, %v2051_v37  ;;  %v2054_v45 = vpop.f32.mrb[30].mxu1  ;;  %v1973_v47 = vpop.f32.mrb[31].mxu0 }
 0x132   :  { %v1137_v48 = vadd.f32 %v1971_v39, %v2778_v46  ;;  %v1974_v49 = vadd.f32 %v1973_v47, %v1972_v41  ;;  %v2055_v50 = vpop.f32.mrb[31].mxu1 }
 0x133   :  { %v2056_v51 = vadd.f32 %v2055_v50, %v2054_v45 }
 0x134   :  { %v2823_v52 = vadd.f32 %v2053_v43, %v1137_v48  ;;  %v1140_v53 = vadd.f32 %v1974_v49, %v2778_v46 }
 0x136   :  { %v2826_v54 = vadd.f32 %v2056_v51, %v1140_v53  ;;  %v1975_v55 = vpop.f32.mrb[32].mxu0 }
 0x137   :  { %v2057_v56 = vpop.f32.mrb[32].mxu1  ;;  %v1976_v57 = vpop.f32.mrb[33].mxu0 }
 0x138   :  { %v1977_v59 = vadd.f32 %v1976_v57, %v1975_v55  ;;  %v2058_v62 = vpop.f32.mrb[33].mxu1  ;;  %v1978_v0 = vpop.f32.mrb[34].mxu0 }
 0x139   :  { %v2059_v1 = vadd.f32 %v2058_v62, %v2057_v56  ;;  %v2060_v2 = vpop.f32.mrb[34].mxu1  ;;  %v1979_v3 = vpop.f32.mrb[35].mxu0 }
 0x13a   :  { %v1145_v4 = vadd.f32 %v1977_v59, %v2778_v46  ;;  %v1980_v5 = vadd.f32 %v1979_v3, %v1978_v0  ;;  %v2061_v6 = vpop.f32.mrb[35].mxu1 }
 0x13b   :  { %v2062_v7 = vadd.f32 %v2061_v6, %v2060_v2 }
 0x13c   :  { %v2829_v8 = vadd.f32 %v2059_v1, %v1145_v4  ;;  %v1148_v9 = vadd.f32 %v1980_v5, %v2778_v46 }
 0x13e   :  { %v2832_v11 = vadd.f32 %v2062_v7, %v1148_v9  ;;  %v1981_v13 = vpop.f32.mrb[36].mxu0 }
 0x13f   :  { %v2063_v14 = vpop.f32.mrb[36].mxu1  ;;  %v1982_v16 = vpop.f32.mrb[37].mxu0 }
 0x140   :  { %v1983_v18 = vadd.f32 %v1982_v16, %v1981_v13  ;;  %v2064_v19 = vpop.f32.mrb[37].mxu1  ;;  %v1984_v20 = vpop.f32.mrb[38].mxu0 }
 0x141   :  { %v2065_v21 = vadd.f32 %v2064_v19, %v2063_v14  ;;  %v2066_v22 = vpop.f32.mrb[38].mxu1  ;;  %v1985_v23 = vpop.f32.mrb[39].mxu0 }
 0x142   :  { %v1153_v24 = vadd.f32 %v1983_v18, %v2778_v46  ;;  %v1986_v25 = vadd.f32 %v1985_v23, %v1984_v20  ;;  %v2067_v27 = vpop.f32.mrb[39].mxu1 }
 0x143   :  { %v2068_v29 = vadd.f32 %v2067_v27, %v2066_v22 }
 0x144   :  { %v2835_v30 = vadd.f32 %v2065_v21, %v1153_v24  ;;  %v1156_v31 = vadd.f32 %v1986_v25, %v2778_v46 }
 0x146   :  { %v2838_v32 = vadd.f32 %v2068_v29, %v1156_v31  ;;  %v1987_v34 = vpop.f32.mrb[40].mxu0 }
 0x147   :  { %v2069_v36 = vpop.f32.mrb[40].mxu1  ;;  %v1988_v37 = vpop.f32.mrb[41].mxu0 }
 0x148   :  { %v1989_v38 = vadd.f32 %v1988_v37, %v1987_v34  ;;  %v2070_v39 = vpop.f32.mrb[41].mxu1  ;;  %v1990_v40 = vpop.f32.mrb[42].mxu0 }
 0x149   :  { %v2071_v41 = vadd.f32 %v2070_v39, %v2069_v36  ;;  %v2072_v43 = vpop.f32.mrb[42].mxu1  ;;  %v1991_v45 = vpop.f32.mrb[43].mxu0 }
 0x14a   :  { %v1161_v47 = vadd.f32 %v1989_v38, %v2778_v46  ;;  %v2073_v48 = vpop.f32.mrb[43].mxu1 }
 0x14c   :  { %v2841_v49 = vadd.f32 %v2071_v41, %v1161_v47 }
 0x14e   :  { %v2091_v50 = vpop.f32.mrb[44].mxu0 }
 0x14f   :  { %v2173_v51 = vpop.f32.mrb[44].mxu1  ;;  %v2092_v53 = vpop.f32.mrb[45].mxu0 }
 0x150   :  { %v2093_v55 = vadd.f32 %v2092_v53, %v2091_v50  ;;  %v2174_v56 = vpop.f32.mrb[45].mxu1  ;;  %v2094_v57 = vpop.f32.mrb[46].mxu0 }
 0x151   :  { %v2175_v59 = vadd.f32 %v2174_v56, %v2173_v51  ;;  %v2176_v62 = vpop.f32.mrb[46].mxu1  ;;  %v2095_v0 = vpop.f32.mrb[47].mxu0 }
 0x152   :  { %v1321_v1 = vadd.f32 %v2093_v55, %v2781_v58  ;;  %v2096_v2 = vadd.f32 %v2095_v0, %v2094_v57  ;;  %v2177_v3 = vpop.f32.mrb[47].mxu1 }
 0x153   :  { %v2178_v4 = vadd.f32 %v2177_v3, %v2176_v62 }
 0x154   :  { %v1441_v5 = vadd.f32 %v2175_v59, %v1321_v1  ;;  %v1324_v46 = vadd.f32 %v2096_v2, %v2784_v60 }
 0x156   :  { %v1444_v6 = vadd.f32 %v2178_v4, %v1324_v46  ;;  %v2097_v7 = vpop.f32.mrb[48].mxu0  ;;  %v1526_v14 = vmax.f32 %v1441_v5, 0.0 }
 0x157   :  { %v2179_v9 = vpop.f32.mrb[48].mxu1  ;;  %v2098_v13 = vpop.f32.mrb[49].mxu0 }
 0x158   :  { %v1527_v16 = vmax.f32 %v1444_v6, 0.0  ;;  %v2099_v18 = vadd.f32 %v2098_v13, %v2097_v7  ;;  %v2180_v19 = vpop.f32.mrb[49].mxu1  ;;  %v2100_v20 = vpop.f32.mrb[50].mxu0 }
 0x159   :  { %v2181_v21 = vadd.f32 %v2180_v19, %v2179_v9  ;;  %v2182_v22 = vpop.f32.mrb[50].mxu1  ;;  %v2101_v23 = vpop.f32.mrb[51].mxu0 }
 0x15a   :  { %v1855_v24 = vpack.c.bf16 %v1527_v16, %v1526_v14  ;;  %v1329_v58 = vadd.f32 %v2099_v18, %v2787_v10  ;;  %v2102_v25 = vadd.f32 %v2101_v23, %v2100_v20  ;;  %v2183_v27 = vpop.f32.mrb[51].mxu1 }
 0x15b   :  { %v2184_v29 = vadd.f32 %v2183_v27, %v2182_v22 }
 0x15c   :  { %1856 = vst [vmem:[%s2900_s3] sm:$0xff] %v1855_v24   ;;  %v1449_v60 = vadd.f32 %v2181_v21, %v1329_v58  ;;  %v1332_v31 = vadd.f32 %v2102_v25, %v2790_v12 }
 0x15e   :  { %v1452_v34 = vadd.f32 %v2184_v29, %v1332_v31  ;;  %v2103_v36 = vpop.f32.mrb[52].mxu0  ;;  %v1528_v39 = vmax.f32 %v1449_v60, 0.0 }
 0x15f   :  { %v2185_v37 = vpop.f32.mrb[52].mxu1  ;;  %v2104_v38 = vpop.f32.mrb[53].mxu0 }
 0x160   :  { %v1529_v40 = vmax.f32 %v1452_v34, 0.0  ;;  %v2105_v41 = vadd.f32 %v2104_v38, %v2103_v36  ;;  %v2186_v43 = vpop.f32.mrb[53].mxu1  ;;  %v2106_v45 = vpop.f32.mrb[54].mxu0 }
 0x161   :  { %v2187_v10 = vadd.f32 %v2186_v43, %v2185_v37  ;;  %v2188_v47 = vpop.f32.mrb[54].mxu1  ;;  %v2107_v48 = vpop.f32.mrb[55].mxu0 }
 0x162   :  { %v1860_v50 = vpack.c.bf16 %v1529_v40, %v1528_v39  ;;  %v1337_v51 = vadd.f32 %v2105_v41, %v2793_v26  ;;  %v2108_v53 = vadd.f32 %v2107_v48, %v2106_v45  ;;  %v2189_v55 = vpop.f32.mrb[55].mxu1 }
 0x163   :  { %v2190_v56 = vadd.f32 %v2189_v55, %v2188_v47 }
 0x164   :  { %1902 = vst [vmem:[%s2900_s3 + $0x8] sm:$0xff] %v1860_v50   ;;  %v1457_v12 = vadd.f32 %v2187_v10, %v1337_v51  ;;  %v1340_v57 = vadd.f32 %v2108_v53, %v2796_v28 }
 0x166   :  { %v1460_v59 = vadd.f32 %v2190_v56, %v1340_v57  ;;  %v2109_v62 = vpop.f32.mrb[56].mxu0  ;;  %v1530_v2 = vmax.f32 %v1457_v12, 0.0 }
 0x167   :  { %v2191_v0 = vpop.f32.mrb[56].mxu1  ;;  %v2110_v1 = vpop.f32.mrb[57].mxu0 }
 0x168   :  { %v1531_v3 = vmax.f32 %v1460_v59, 0.0  ;;  %v2111_v4 = vadd.f32 %v2110_v1, %v2109_v62  ;;  %v2192_v5 = vpop.f32.mrb[57].mxu1  ;;  %v2112_v46 = vpop.f32.mrb[58].mxu0 }
 0x169   :  { %v2193_v26 = vadd.f32 %v2192_v5, %v2191_v0  ;;  %v2194_v6 = vpop.f32.mrb[58].mxu1  ;;  %v2113_v7 = vpop.f32.mrb[59].mxu0 }
 0x16a   :  { %v1865_v9 = vpack.c.bf16 %v1531_v3, %v1530_v2  ;;  %v1345_v13 = vadd.f32 %v2111_v4, %v2799_v42  ;;  %v2114_v14 = vadd.f32 %v2113_v7, %v2112_v46  ;;  %v2195_v16 = vpop.f32.mrb[59].mxu1 }
 0x16b   :  { %v2196_v18 = vadd.f32 %v2195_v16, %v2194_v6 }
 0x16c   :  { %1903 = vst [vmem:[%s2900_s3 + $0x10] sm:$0xff] %v1865_v9   ;;  %v1465_v28 = vadd.f32 %v2193_v26, %v1345_v13  ;;  %v1348_v19 = vadd.f32 %v2114_v14, %v2802_v44 }
 0x16e   :  { %v1468_v20 = vadd.f32 %v2196_v18, %v1348_v19  ;;  %v2115_v21 = vpop.f32.mrb[60].mxu0  ;;  %v1532_v24 = vmax.f32 %v1465_v28, 0.0 }
 0x16f   :  { %v2197_v22 = vpop.f32.mrb[60].mxu1  ;;  %v2116_v23 = vpop.f32.mrb[61].mxu0 }
 0x170   :  { %v1533_v58 = vmax.f32 %v1468_v20, 0.0  ;;  %v2117_v25 = vadd.f32 %v2116_v23, %v2115_v21  ;;  %v2198_v27 = vpop.f32.mrb[61].mxu1  ;;  %v2118_v29 = vpop.f32.mrb[62].mxu0 }
 0x171   :  { %v2199_v42 = vadd.f32 %v2198_v27, %v2197_v22  ;;  %v2200_v60 = vpop.f32.mrb[62].mxu1  ;;  %v2119_v31 = vpop.f32.mrb[63].mxu0 }
 0x172   :  { %v1870_v34 = vpack.c.bf16 %v1533_v58, %v1532_v24  ;;  %v1353_v36 = vadd.f32 %v2117_v25, %v2805_v61  ;;  %v2120_v37 = vadd.f32 %v2119_v31, %v2118_v29  ;;  %v2201_v38 = vpop.f32.mrb[63].mxu1 }
 0x173   :  { %v2202_v39 = vadd.f32 %v2201_v38, %v2200_v60 }
 0x174   :  { %1904 = vst [vmem:[%s2900_s3 + $0x18] sm:$0xff] %v1870_v34   ;;  %v1473_v44 = vadd.f32 %v2199_v42, %v1353_v36  ;;  %v1356_v40 = vadd.f32 %v2120_v37, %v2808_v63 }
 0x176   :  { %v1476_v41 = vadd.f32 %v2202_v39, %v1356_v40  ;;  %v2121_v43 = vpop.f32.mrb[64].mxu0  ;;  %v1534_v47 = vmax.f32 %v1473_v44, 0.0 }
 0x177   :  { %v2203_v45 = vpop.f32.mrb[64].mxu1  ;;  %v2122_v10 = vpop.f32.mrb[65].mxu0 }
 0x178   :  { %v1535_v48 = vmax.f32 %v1476_v41, 0.0  ;;  %v2123_v50 = vadd.f32 %v2122_v10, %v2121_v43  ;;  %v2204_v51 = vpop.f32.mrb[65].mxu1  ;;  %v2124_v53 = vpop.f32.mrb[66].mxu0 }
 0x179   :  { %v2205_v61 = vadd.f32 %v2204_v51, %v2203_v45  ;;  %v2206_v55 = vpop.f32.mrb[66].mxu1  ;;  %v2125_v56 = vpop.f32.mrb[67].mxu0 }
 0x17a   :  { %v1875_v12 = vpack.c.bf16 %v1535_v48, %v1534_v47  ;;  %v1361_v57 = vadd.f32 %v2123_v50, %v2811_v15  ;;  %v2126_v59 = vadd.f32 %v2125_v56, %v2124_v53  ;;  %v2207_v62 = vpop.f32.mrb[67].mxu1 }
 0x17b   :  { %v2208_v0 = vadd.f32 %v2207_v62, %v2206_v55 }
 0x17c   :  { %1905 = vst [vmem:[%s2900_s3 + $0x20] sm:$0xff] %v1875_v12   ;;  %v1481_v63 = vadd.f32 %v2205_v61, %v1361_v57  ;;  %v1364_v1 = vadd.f32 %v2126_v59, %v2814_v17 }
 0x17e   :  { %v1484_v2 = vadd.f32 %v2208_v0, %v1364_v1  ;;  %v2127_v3 = vpop.f32.mrb[68].mxu0  ;;  %v1536_v46 = vmax.f32 %v1481_v63, 0.0 }
 0x17f   :  { %v2209_v4 = vpop.f32.mrb[68].mxu1  ;;  %v2128_v5 = vpop.f32.mrb[69].mxu0 }
 0x180   :  { %v1537_v26 = vmax.f32 %v1484_v2, 0.0  ;;  %v2129_v6 = vadd.f32 %v2128_v5, %v2127_v3  ;;  %v2210_v7 = vpop.f32.mrb[69].mxu1  ;;  %v2130_v9 = vpop.f32.mrb[70].mxu0 }
 0x181   :  { %v2211_v15 = vadd.f32 %v2210_v7, %v2209_v4  ;;  %v2212_v13 = vpop.f32.mrb[70].mxu1  ;;  %v2131_v14 = vpop.f32.mrb[71].mxu0 }
 0x182   :  { %v1880_v16 = vpack.c.bf16 %v1537_v26, %v1536_v46  ;;  %v1369_v18 = vadd.f32 %v2129_v6, %v2817_v33  ;;  %v2132_v28 = vadd.f32 %v2131_v14, %v2130_v9  ;;  %v2213_v19 = vpop.f32.mrb[71].mxu1 }
 0x183   :  { %v2214_v20 = vadd.f32 %v2213_v19, %v2212_v13 }
 0x184   :  { %1906 = vst [vmem:[%s2900_s3 + $0x28] sm:$0xff] %v1880_v16   ;;  %v1489_v17 = vadd.f32 %v2211_v15, %v1369_v18  ;;  %v1372_v21 = vadd.f32 %v2132_v28, %v2820_v35 }
 0x186   :  { %v1492_v22 = vadd.f32 %v2214_v20, %v1372_v21  ;;  %v2133_v23 = vpop.f32.mrb[72].mxu0  ;;  %v1538_v25 = vmax.f32 %v1489_v17, 0.0 }
 0x187   :  { %v2215_v24 = vpop.f32.mrb[72].mxu1  ;;  %v2134_v58 = vpop.f32.mrb[73].mxu0 }
 0x188   :  { %v1539_v27 = vmax.f32 %v1492_v22, 0.0  ;;  %v2135_v29 = vadd.f32 %v2134_v58, %v2133_v23  ;;  %v2216_v42 = vpop.f32.mrb[73].mxu1  ;;  %v2136_v60 = vpop.f32.mrb[74].mxu0 }
 0x189   :  { %v2217_v33 = vadd.f32 %v2216_v42, %v2215_v24  ;;  %v2218_v31 = vpop.f32.mrb[74].mxu1  ;;  %v2137_v34 = vpop.f32.mrb[75].mxu0 }
 0x18a   :  { %v1885_v36 = vpack.c.bf16 %v1539_v27, %v1538_v25  ;;  %v1377_v37 = vadd.f32 %v2135_v29, %v2823_v52  ;;  %v2138_v38 = vadd.f32 %v2137_v34, %v2136_v60  ;;  %v2219_v39 = vpop.f32.mrb[75].mxu1 }
 0x18b   :  { %v2220_v44 = vadd.f32 %v2219_v39, %v2218_v31 }
 0x18c   :  { %1907 = vst [vmem:[%s2900_s3 + $0x30] sm:$0xff] %v1885_v36   ;;  %v1497_v35 = vadd.f32 %v2217_v33, %v1377_v37  ;;  %v1380_v40 = vadd.f32 %v2138_v38, %v2826_v54 }
 0x18e   :  { %v1500_v41 = vadd.f32 %v2220_v44, %v1380_v40  ;;  %v2139_v43 = vpop.f32.mrb[76].mxu0  ;;  %v1540_v47 = vmax.f32 %v1497_v35, 0.0 }
 0x18f   :  { %v2221_v45 = vpop.f32.mrb[76].mxu1  ;;  %v2140_v10 = vpop.f32.mrb[77].mxu0 }
 0x190   :  { %v1541_v48 = vmax.f32 %v1500_v41, 0.0  ;;  %v2141_v50 = vadd.f32 %v2140_v10, %v2139_v43  ;;  %v2222_v51 = vpop.f32.mrb[77].mxu1  ;;  %v2142_v53 = vpop.f32.mrb[78].mxu0 }
 0x191   :  { %v2223_v52 = vadd.f32 %v2222_v51, %v2221_v45  ;;  %v2224_v61 = vpop.f32.mrb[78].mxu1  ;;  %v2143_v55 = vpop.f32.mrb[79].mxu0 }
 0x192   :  { %v1890_v56 = vpack.c.bf16 %v1541_v48, %v1540_v47  ;;  %v1385_v12 = vadd.f32 %v2141_v50, %v2829_v8  ;;  %v2144_v57 = vadd.f32 %v2143_v55, %v2142_v53  ;;  %v2225_v59 = vpop.f32.mrb[79].mxu1 }
 0x193   :  { %v2226_v62 = vadd.f32 %v2225_v59, %v2224_v61 }
 0x194   :  { %1908 = vst [vmem:[%s2900_s3 + $0x38] sm:$0xff] %v1890_v56   ;;  %v1505_v54 = vadd.f32 %v2223_v52, %v1385_v12  ;;  %v1388_v0 = vadd.f32 %v2144_v57, %v2832_v11 }
 0x196   :  { %v1508_v63 = vadd.f32 %v2226_v62, %v1388_v0  ;;  %v2145_v1 = vpop.f32.mrb[80].mxu0  ;;  %v1542_v4 = vmax.f32 %v1505_v54, 0.0 }
 0x197   :  { %v2227_v2 = vpop.f32.mrb[80].mxu1  ;;  %v2146_v3 = vpop.f32.mrb[81].mxu0 }
 0x198   :  { %v1543_v5 = vmax.f32 %v1508_v63, 0.0  ;;  %v2147_v46 = vadd.f32 %v2146_v3, %v2145_v1  ;;  %v2228_v26 = vpop.f32.mrb[81].mxu1  ;;  %v2148_v6 = vpop.f32.mrb[82].mxu0 }
 0x199   :  { %v2229_v8 = vadd.f32 %v2228_v26, %v2227_v2  ;;  %v2230_v7 = vpop.f32.mrb[82].mxu1  ;;  %v2149_v9 = vpop.f32.mrb[83].mxu0 }
 0x19a   :  { %v1895_v15 = vpack.c.bf16 %v1543_v5, %v1542_v4  ;;  %v1393_v13 = vadd.f32 %v2147_v46, %v2835_v30  ;;  %v2150_v14 = vadd.f32 %v2149_v9, %v2148_v6  ;;  %v2231_v16 = vpop.f32.mrb[83].mxu1 }
 0x19b   :  { %v2232_v18 = vadd.f32 %v2231_v16, %v2230_v7 }
 0x19c   :  { %1909 = vst [vmem:[%s2900_s3 + $0x40] sm:$0xff] %v1895_v15   ;;  %v1513_v11 = vadd.f32 %v2229_v8, %v1393_v13  ;;  %v1396_v28 = vadd.f32 %v2150_v14, %v2838_v32 }
 0x19e   :  { %v1516_v19 = vadd.f32 %v2232_v18, %v1396_v28  ;;  %v2151_v20 = vpop.f32.mrb[84].mxu0  ;;  %v1544_v22 = vmax.f32 %v1513_v11, 0.0 }
 0x19f   :  { %v2233_v17 = vpop.f32.mrb[84].mxu1  ;;  %v2152_v21 = vpop.f32.mrb[85].mxu0 }
 0x1a0   :  { %v1545_v23 = vmax.f32 %v1516_v19, 0.0  ;;  %v2153_v24 = vadd.f32 %v2152_v21, %v2151_v20  ;;  %v2234_v58 = vpop.f32.mrb[85].mxu1  ;;  %v2154_v25 = vpop.f32.mrb[86].mxu0 }
 0x1a1   :  { %v2235_v30 = vadd.f32 %v2234_v58, %v2233_v17  ;;  %v2236_v27 = vpop.f32.mrb[86].mxu1  ;;  %v2155_v29 = vpop.f32.mrb[87].mxu0 }
 0x1a2   :  { %v1900_v42 = vpack.c.bf16 %v1545_v23, %v1544_v22  ;;  %v1401_v60 = vadd.f32 %v2153_v24, %v2841_v49  ;;  %v2237_v33 = vpop.f32.mrb[87].mxu1 }
 0x1a4   :  { %1910 = vst [vmem:[%s2900_s3 + $0x48] sm:$0xff] %v1900_v42   ;;  %v1521_v32 = vadd.f32 %v2235_v30, %v1401_v60 }
 0x1a6   :  { %v1546_v31 = vmax.f32 %v1521_v32, 0.0 }
 0x1a8   :  { %v1851_v34 = vpack.c.bf16 %v1546_v31, %v1546_v31 }
 0x1aa   :  { %1652 = vst [vmem:[%s2900_s3 + $0x50] sm:$0x1] %v1851_v34 }

// kernel: critic_forward.6
= control target key start
LH: loop header
LB: loop body
LE: loop exit
PB: predicated region body
PF: predicated region fallthrough
CT: control target
= control target key end

     0   :  { %vm2160_vm0 = vmmov 0   ;;  %s2695_s1 = inlined_call_operand.vmem [shape: bf16[1152,128], index: 1, kind: input, shape index: {}]   ;;  %s2696_s0 = inlined_call_operand.vmem [shape: bf16[98,1152], index: 0, kind: input, shape index: {}]   ;;  %s2697_s2 = inlined_call_operand.vmem [shape: f32[1,128], index: 2, kind: input, shape index: {}]   ;;  %s2698_s3 = inlined_call_operand.vmem [shape: bf16[98,128], index: 3, kind: output, shape index: {}]  }
   0x1   :  { %v2000_v0 = vld [vmem:[%s2695_s1 + $0x40] sm:$0xff]   ;;  %v2002_v2 = vld [vmem:[%s2695_s1 + $0x48] sm:$0xff]   ;;  %v2004_v4 = vld [vmem:[%s2695_s1 + $0x50] sm:$0xff]  }
   0x2   :  { %v2001_v1 = vld [vmem:[%s2695_s1] sm:$0xff]   ;;  %1982 = vmatprep.subr.bf16.mxu1 %v2000_v0  ;;  %1691 = vmatprep.subr.bf16.mxu0 %v2000_v0  ;;  %v2003_v3 = vld [vmem:[%s2695_s1 + $0x8] sm:$0xff]   ;;  %v2005_v5 = vld [vmem:[%s2695_s1 + $0x10] sm:$0xff]  }
   0x3   :  { %1990 = vmatpush3.bf16.msra.mxu1 %v2001_v1  ;;  %1692 = vmatpush3.bf16.msra.mxu0 %v2001_v1  ;;  %v2006_v6 = vld [vmem:[%s2695_s1 + $0x58] sm:$0xff]   ;;  %v2008_v8 = vld [vmem:[%s2695_s1 + $0x60] sm:$0xff]   ;;  %v2010_v10 = vld [vmem:[%s2695_s1 + $0x68] sm:$0xff]  }
   0x4   :  { %1983 = vmatprep.subr.bf16.mxu1 %v2002_v2  ;;  %1693 = vmatprep.subr.bf16.mxu0 %v2002_v2  ;;  %v2007_v7 = vld [vmem:[%s2695_s1 + $0x18] sm:$0xff]   ;;  %v2009_v9 = vld [vmem:[%s2695_s1 + $0x20] sm:$0xff]   ;;  %v2011_v12 = vld [vmem:[%s2695_s1 + $0x28] sm:$0xff]  }
   0x5   :  { %v2018_v11 = vld [vmem:[%s2696_s0 + $0x124] ss:$36 sps:$4 sm:$0xff]   ;;  %v2012_v14 = vld [vmem:[%s2695_s1 + $0x70] sm:$0xff]   ;;  %v2014_v16 = vld [vmem:[%s2695_s1 + $0x78] sm:$0xff]  }
   0x6   :  { %v2022_v13 = vld [vmem:[%s2696_s0 + $0x4] ss:$36 sps:$4 sm:$0xff]   ;;  %1035 = vmatprep.mubr.bf16.mxu1 %v2018_v11  ;;  %v2013_v15 = vld [vmem:[%s2695_s1 + $0x30] sm:$0xff]   ;;  %v2015_v17 = vld [vmem:[%s2695_s1 + $0x38] sm:$0xff]  }
   0x7   :  { %1991 = vmatpush3.bf16.msra.mxu1 %v2003_v3  ;;  %1694 = vmatpush3.bf16.msra.mxu0 %v2003_v3  ;;  %v2019_v18 = vld [vmem:[%s2695_s1 + $0xc0] sm:$0xff]   ;;  %v2026_v24 = vld [vmem:[%s2695_s1 + $0xc8] sm:$0xff]   ;;  %v2030_v30 = vld [vmem:[%s2695_s1 + $0xd0] sm:$0xff]  }
   0x8   :  { %1984 = vmatprep.subr.bf16.mxu1 %v2004_v4  ;;  %1695 = vmatprep.subr.bf16.mxu0 %v2004_v4  ;;  %v2016_v19 = vld [vmem:[%s2696_s0 + $0x120] ss:$36 sps:$4 sm:$0xff]   ;;  %v2028_v25 = vld [vmem:[%s2695_s1 + $0x148] sm:$0xff]   ;;  %v2035_v31 = vld [vmem:[%s2695_s1 + $0x150] sm:$0xff]  }
   0x9   :  { %1003 = vmatprep.mubr.bf16.mxu0 %v2022_v13  ;;  %v2020_v20 = vld [vmem:[%s2696_s0] ss:$36 sps:$4 sm:$0xff]   ;;  %v2031_v26 = vld [vmem:[%s2696_s0 + $0x4c] ss:$36 sps:$4 sm:$0xff]   ;;  %v2037_v36 = vld [vmem:[%s2695_s1 + $0xd8] sm:$0xff]  }
   0xa   :  { %v2024_v21 = vld [vmem:[%s2695_s1 + $0x140] sm:$0xff]   ;;  %v2027_v27 = vld [vmem:[%s2695_s1 + $0x88] sm:$0xff]   ;;  %v2033_v32 = vld [vmem:[%s2695_s1 + $0x90] sm:$0xff]  }
   0xb   :  { %1992 = vmatpush3.bf16.msra.mxu1 %v2005_v5  ;;  %1696 = vmatpush3.bf16.msra.mxu0 %v2005_v5  ;;  %v2023_v22 = vld [vmem:[%s2695_s1 + $0x80] sm:$0xff]   ;;  %v2038_v28 = vld [vmem:[%s2696_s0 + $0x16c] ss:$36 sps:$4 sm:$0xff]   ;;  %v2042_v37 = vld [vmem:[%s2695_s1 + $0x158] sm:$0xff]  }
   0xc   :  { %1985 = vmatprep.subr.bf16.mxu1 %v2006_v6  ;;  %1697 = vmatprep.subr.bf16.mxu0 %v2006_v6  ;;  %v2025_v23 = vld [vmem:[%s2695_s1 + $0x100] sm:$0xff]   ;;  %v2029_v29 = vld [vmem:[%s2695_s1 + $0x108] sm:$0xff]   ;;  %v2036_v35 = vld [vmem:[%s2695_s1 + $0x110] sm:$0xff]  }
   0xd   :  { %v2034_v33 = vld [vmem:[%s2696_s0 + $0x48] ss:$36 sps:$4 sm:$0xff]   ;;  %v2040_v38 = vld [vmem:[%s2695_s1 + $0x98] sm:$0xff]   ;;  %v2044_v41 = vld [vmem:[%s2695_s1 + $0xe0] sm:$0xff]  }
   0xe   :  { %v2041_v34 = vld [vmem:[%s2696_s0 + $0x168] ss:$36 sps:$4 sm:$0xff]   ;;  %v2045_v39 = vld [vmem:[%s2696_s0 + $0x94] ss:$36 sps:$4 sm:$0xff]   ;;  %v2049_v43 = vld [vmem:[%s2695_s1 + $0x160] sm:$0xff]  }
   0xf   :  { %1993 = vmatpush3.bf16.msra.mxu1 %v2007_v7  ;;  %1698 = vmatpush3.bf16.msra.mxu0 %v2007_v7  ;;  %v2043_v40 = vld [vmem:[%s2695_s1 + $0x118] sm:$0xff]   ;;  %v75_v42 = vld [vmem:[%s2696_s0 + $0x1b0] sm:$0x11]  ;;  %v2047_v45 = vld [vmem:[%s2695_s1 + $0xa0] sm:$0xff]   ;;  %v2159_v7 = vmov 0.0  }
  0x10   :  { %1986 = vmatprep.subr.bf16.mxu1 %v2008_v8  ;;  %1699 = vmatprep.subr.bf16.mxu0 %v2008_v8  ;;  %v1550_v44 = vcombine.high %v75_v42, %v75_v42  ;;  %v2048_v46 = vld [vmem:[%s2696_s0 + $0x90] ss:$36 sps:$4 sm:$0xff]   ;;  %v2050_v47 = vld [vmem:[%s2695_s1 + $0x120] sm:$0xff]   ;;  %v1549_v48 = vcombine.low %v75_v42, %v75_v42  ;;  %v2051_v49 = vld [vmem:[%s2695_s1 + $0xe8] sm:$0xff]  }
  0x11   :  { %v2055_v50 = vld [vmem:[%s2695_s1 + $0x168] sm:$0xff]   ;;  %v2058_v52 = vld [vmem:[%s2696_s0 + $0xdc] ss:$36 sps:$4 sm:$0xff]   ;;  %v2057_v54 = vld [vmem:[%s2695_s1 + $0xf0] sm:$0xff]  }
  0x12   :  { %v2053_v51 = vld [vmem:[%s2695_s1 + $0xa8] sm:$0xff]   ;;  %v2062_v55 = vld [vmem:[%s2695_s1 + $0x170] sm:$0xff]   ;;  %v2061_v57 = vld [vmem:[%s2696_s0 + $0xd8] ss:$36 sps:$4 sm:$0xff]  }
  0x13   :  { %1994 = vmatpush3.bf16.msra.mxu1 %v2009_v9  ;;  %1700 = vmatpush3.bf16.msra.mxu0 %v2009_v9  ;;  %v2056_v53 = vld [vmem:[%s2695_s1 + $0x128] sm:$0xff]   ;;  %v2060_v56 = vld [vmem:[%s2695_s1 + $0xb0] sm:$0xff]   ;;  %v2064_v59 = vld [vmem:[%s2695_s1 + $0xf8] sm:$0xff]  }
  0x14   :  { %1987 = vmatprep.subr.bf16.mxu1 %v2010_v10  ;;  %1701 = vmatprep.subr.bf16.mxu0 %v2010_v10  ;;  %v2063_v58 = vld [vmem:[%s2695_s1 + $0x130] sm:$0xff]   ;;  %v2066_v60 = vld [vmem:[%s2695_s1 + $0x178] sm:$0xff]   ;;  %v2071_v0 = vld [vmem:[%s2695_s1 + $0x1c0] sm:$0xff]  }
  0x15   :  { %v2069_v61 = vld [vmem:[%s2696_s0 + $0xc] ss:$36 sps:$4 sm:$0xff]   ;;  %v2065_v62 = vld [vmem:[%s2695_s1 + $0xb8] sm:$0xff]   ;;  %v2075_v4 = vld [vmem:[%s2695_s1 + $0x180] sm:$0xff]  }
  0x16   :  { %v2070_v63 = vld [vmem:[%s2695_s1 + $0x138] sm:$0xff]   ;;  %v2067_v2 = vld [vmem:[%s2696_s0 + $0x8] ss:$36 sps:$4 sm:$0xff]   ;;  %v2072_v3 = vld [vmem:[%s2696_s0 + $0x10] ss:$36 sps:$4 sm:$0xff]  }
  0x17   :  { %1995 = vmatpush3.bf16.msra.mxu1 %v2011_v12  ;;  %1702 = vmatpush3.bf16.msra.mxu0 %v2011_v12  ;;  %v2074_v1 = vld [vmem:[%s2696_s0 + $0x14] ss:$36 sps:$4 sm:$0xff]   ;;  %v2076_v5 = vld [vmem:[%s2695_s1 + $0x200] sm:$0xff]   ;;  %v2079_v8 = vld [vmem:[%s2695_s1 + $0x1c8] sm:$0xff]  }
  0x18   :  { %1988 = vmatprep.subr.bf16.mxu1 %v2012_v14  ;;  %1703 = vmatprep.subr.bf16.mxu0 %v2012_v14  ;;  %v2077_v6 = vld [vmem:[%s2696_s0 + $0x54] ss:$36 sps:$4 sm:$0xff]   ;;  %v2081_v9 = vld [vmem:[%s2695_s1 + $0x188] sm:$0xff]   ;;  %v2082_v10 = vld [vmem:[%s2696_s0 + $0x5c] ss:$36 sps:$4 sm:$0xff]  }
  0x19   :  { %v2085_v11 = vld [vmem:[%s2695_s1 + $0x208] sm:$0xff]   ;;  %v2086_v12 = vld [vmem:[%s2695_s1 + $0x1d0] sm:$0xff]   ;;  %v2084_v14 = vld [vmem:[%s2696_s0 + $0x58] ss:$36 sps:$4 sm:$0xff]  }
  0x1a   :  { %v2080_v13 = vld [vmem:[%s2696_s0 + $0x50] ss:$36 sps:$4 sm:$0xff]   ;;  %v2128_v42 = vld [vmem:[%s2695_s1 + $0x1f8] sm:$0xff]  }
  0x1b   :  { %1996 = vmatpush3.bf16.msra.mxu1 %v2013_v15  ;;  %1704 = vmatpush3.bf16.msra.mxu0 %v2013_v15  ;;  %v2087_v15 = vld [vmem:[%s2696_s0 + $0x9c] ss:$36 sps:$4 sm:$0xff]  }
  0x1c   :  { %1989 = vmatprep.subr.bf16.mxu1 %v2014_v16  ;;  %1705 = vmatprep.subr.bf16.mxu0 %v2014_v16  ;;  %v2089_v16 = vld [vmem:[%s2695_s1 + $0x190] sm:$0xff]  }
  0x1f   :  { %1997 = vmatpush3.bf16.msra.mxu1 %v2015_v17  ;;  %1706 = vmatpush3.bf16.msra.mxu0 %v2015_v17  ;;  %v2091_v17 = vld [vmem:[%s2696_s0 + $0xa4] ss:$36 sps:$4 sm:$0xff]  }
  0x20   :  { %1749 = vmatprep.subr.bf16.mxu1 %v2019_v18  ;;  %1807 = vmatprep.subr.bf16.mxu0 %v2024_v21  ;;  %v2094_v18 = vld [vmem:[%s2695_s1 + $0x210] sm:$0xff]   ;;  %v2090_v21 = vld [vmem:[%s2696_s0 + $0x98] ss:$36 sps:$4 sm:$0xff]  }
  0x22   :  { %1036 = vmatmul.mubr.bf16.vlgmr.msra.gmra.mrb[0].mxu1 %v2016_v19  ;;  %1004 = vmatmul.mubr.bf16.vlgmr.msra.gmra.mrb[0].mxu0 %v2020_v20  ;;  %v2095_v19 = vld [vmem:[%s2695_s1 + $0x1d8] sm:$0xff]  }
  0x23   :  { %1750 = vmatpush3.bf16.msra.mxu1 %v2023_v22  ;;  %1808 = vmatpush3.bf16.msra.mxu0 %v2025_v23  ;;  %v2096_v20 = vld [vmem:[%s2695_s1 + $0x198] sm:$0xff]   ;;  %v2093_v22 = vld [vmem:[%s2696_s0 + $0xa0] ss:$36 sps:$4 sm:$0xff]  }
  0x24   :  { %1751 = vmatprep.subr.bf16.mxu1 %v2026_v24  ;;  %1809 = vmatprep.subr.bf16.mxu0 %v2028_v25  ;;  %v2097_v23 = vld [vmem:[%s2696_s0 + $0xe4] ss:$36 sps:$4 sm:$0xff]   ;;  %v2100_v24 = vld [vmem:[%s2696_s0 + $0xec] ss:$36 sps:$4 sm:$0xff]   ;;  %v2103_v25 = vld [vmem:[%s2695_s1 + $0x218] sm:$0xff]  }
  0x25   :  { %1011 = vmatprep.mubr.bf16.mxu0 %v2031_v26  ;;  %1043 = vmatprep.mubr.bf16.mxu1 %v2038_v28  ;;  %v2104_v26 = vld [vmem:[%s2695_s1 + $0x1e0] sm:$0xff]  }
  0x26   :  { %v2099_v28 = vld [vmem:[%s2696_s0 + $0xe0] ss:$36 sps:$4 sm:$0xff]  }
  0x27   :  { %1752 = vmatpush3.bf16.msra.mxu1 %v2027_v27  ;;  %1810 = vmatpush3.bf16.msra.mxu0 %v2029_v29  ;;  %v2105_v27 = vld [vmem:[%s2695_s1 + $0x1a0] sm:$0xff]   ;;  %v2102_v29 = vld [vmem:[%s2696_s0 + $0xe8] ss:$36 sps:$4 sm:$0xff]  }
  0x28   :  { %1753 = vmatprep.subr.bf16.mxu1 %v2030_v30  ;;  %1811 = vmatprep.subr.bf16.mxu0 %v2035_v31  ;;  %v2112_v30 = vld [vmem:[%s2695_s1 + $0x220] sm:$0xff]   ;;  %v2113_v31 = vld [vmem:[%s2695_s1 + $0x1e8] sm:$0xff]  }
  0x2a   :  { %1012 = vmatmul.mubr.bf16.gmra.mrb[4].mxu0 %v2034_v33  ;;  %1044 = vmatmul.mubr.bf16.gmra.mrb[4].mxu1 %v2041_v34  ;;  %v2106_v33 = vld [vmem:[%s2696_s0 + $0x12c] ss:$36 sps:$4 sm:$0xff]   ;;  %v2109_v34 = vld [vmem:[%s2696_s0 + $0x134] ss:$36 sps:$4 sm:$0xff]  }
  0x2b   :  { %1754 = vmatpush3.bf16.msra.mxu1 %v2033_v32  ;;  %1812 = vmatpush3.bf16.msra.mxu0 %v2036_v35  ;;  %v2114_v32 = vld [vmem:[%s2695_s1 + $0x1a8] sm:$0xff]  }
  0x2c   :  { %1755 = vmatprep.subr.bf16.mxu1 %v2037_v36  ;;  %1813 = vmatprep.subr.bf16.mxu0 %v2042_v37  ;;  %v2120_v35 = vld [vmem:[%s2695_s1 + $0x228] sm:$0xff]   ;;  %v2122_v36 = vld [vmem:[%s2695_s1 + $0x1f0] sm:$0xff]  }
  0x2d   :  { %1019 = vmatprep.mubr.bf16.mxu0 %v2045_v39  ;;  %1051 = vmatprep.mubr.bf16.mxu1 %v1550_v44  ;;  %v2108_v37 = vld [vmem:[%s2696_s0 + $0x128] ss:$36 sps:$4 sm:$0xff]   ;;  %v2123_v39 = vld [vmem:[%s2695_s1 + $0x1b0] sm:$0xff]   ;;  %v2130_v44 = vld [vmem:[%s2695_s1 + $0x1b8] sm:$0xff]  }
  0x2f   :  { %1756 = vmatpush3.bf16.msra.mxu1 %v2040_v38  ;;  %1814 = vmatpush3.bf16.msra.mxu0 %v2043_v40  ;;  %v2111_v38 = vld [vmem:[%s2696_s0 + $0x130] ss:$36 sps:$4 sm:$0xff]  }
  0x30   :  { %1757 = vmatprep.subr.bf16.mxu1 %v2044_v41  ;;  %1815 = vmatprep.subr.bf16.mxu0 %v2049_v43  ;;  %v2115_v40 = vld [vmem:[%s2696_s0 + $0x174] ss:$36 sps:$4 sm:$0xff]   ;;  %v2118_v43 = vld [vmem:[%s2696_s0 + $0x17c] ss:$36 sps:$4 sm:$0xff]  }
  0x31   :  { %v2126_v41 = vld [vmem:[%s2695_s1 + $0x230] sm:$0xff]  }
  0x32   :  { %1020 = vmatmul.mubr.bf16.gmra.mrb[8].mxu0 %v2048_v46  ;;  %1052 = vmatmul.mubr.bf16.gmra.mrb[8].mxu1 %v1549_v48  ;;  %v76_v46 = vld [vmem:[%s2696_s0 + $0x1b8] sm:$0x11]  ;;  %v2117_v48 = vld [vmem:[%s2696_s0 + $0x170] ss:$36 sps:$4 sm:$0xff]  }
  0x33   :  { %1758 = vmatpush3.bf16.msra.mxu1 %v2047_v45  ;;  %1816 = vmatpush3.bf16.msra.mxu0 %v2050_v47  ;;  %v2134_v45 = vld [vmem:[%s2695_s1 + $0x238] sm:$0xff]   ;;  %v77_v47 = vld [vmem:[%s2696_s0 + $0x1c0] sm:$0x11] }
  0x34   :  { %1759 = vmatprep.subr.bf16.mxu1 %v2051_v49  ;;  %1817 = vmatprep.subr.bf16.mxu0 %v2055_v50  ;;  %v2121_v49 = vld [vmem:[%s2696_s0 + $0x178] ss:$36 sps:$4 sm:$0xff]   ;;  %v1552_v50 = vcombine.high %v76_v46, %v76_v46 }
  0x35   :  { %1027 = vmatprep.mubr.bf16.mxu0 %v2058_v52  ;;  %1091 = vmatprep.mubr.bf16.mxu1 %v2069_v61  ;;  %v1551_v52 = vcombine.low %v76_v46, %v76_v46  ;;  %v2142_v61 = vld [vmem:[%s2696_s0 + $0xa8] ss:$36 sps:$4 sm:$0xff]  }
  0x37   :  { %1760 = vmatpush3.bf16.msra.mxu1 %v2053_v51  ;;  %1818 = vmatpush3.bf16.msra.mxu0 %v2056_v53  ;;  %v1554_v51 = vcombine.high %v77_v47, %v77_v47  ;;  %v1553_v53 = vcombine.low %v77_v47, %v77_v47 }
  0x38   :  { %1761 = vmatprep.subr.bf16.mxu1 %v2057_v54  ;;  %1819 = vmatprep.subr.bf16.mxu0 %v2062_v55  ;;  %v2133_v54 = vld [vmem:[%s2696_s0 + $0x1c] ss:$36 sps:$4 sm:$0xff]  }
  0x39   :  { %v2131_v55 = vld [vmem:[%s2696_s0 + $0x18] ss:$36 sps:$4 sm:$0xff]  }
  0x3a   :  { %1028 = vmatmul.mubr.bf16.gmra.mrb[12].mxu0 %v2061_v57  ;;  %v2136_v57 = vld [vmem:[%s2696_s0 + $0x64] ss:$36 sps:$4 sm:$0xff]  }
  0x3b   :  { %1762 = vmatpush3.bf16.msra.mxu1 %v2060_v56  ;;  %1820 = vmatpush3.bf16.msra.mxu0 %v2063_v58  ;;  %v2135_v56 = vld [vmem:[%s2696_s0 + $0x20] ss:$36 sps:$4 sm:$0xff]  }
  0x3c   :  { %1763 = vmatprep.subr.bf16.mxu1 %v2064_v59  ;;  %1821 = vmatprep.subr.bf16.mxu0 %v2066_v60  ;;  %v2138_v58 = vld [vmem:[%s2696_s0 + $0x60] ss:$36 sps:$4 sm:$0xff]   ;;  %v2139_v59 = vld [vmem:[%s2696_s0 + $0x68] ss:$36 sps:$4 sm:$0xff]  }
  0x3d   :  { %1179 = vmatprep.mubr.bf16.mxu0 %v2074_v1  ;;  %v2140_v60 = vld [vmem:[%s2696_s0 + $0xac] ss:$36 sps:$4 sm:$0xff]   ;;  %v2147_v1 = vld [vmem:[%s2696_s0 + $0xf8] ss:$36 sps:$4 sm:$0xff]  }
  0x3f   :  { %1764 = vmatpush3.bf16.msra.mxu1 %v2065_v62  ;;  %1822 = vmatpush3.bf16.msra.mxu0 %v2070_v63  ;;  %v2143_v62 = vld [vmem:[%s2696_s0 + $0xb0] ss:$36 sps:$4 sm:$0xff]  }
  0x40   :  { %1865 = vmatprep.subr.bf16.mxu1 %v2071_v0  ;;  %1938 = vmatprep.subr.bf16.mxu0 %v2159_v7  ;;  %v2144_v63 = vld [vmem:[%s2696_s0 + $0xf4] ss:$36 sps:$4 sm:$0xff]  }
  0x41   :  { %v2146_v0 = vld [vmem:[%s2696_s0 + $0xf0] ss:$36 sps:$4 sm:$0xff]  }
  0x42   :  { %1092 = vmatmul.mubr.bf16.vlgmr.msra.gmra.mrb[12].mxu1 %v2067_v2  ;;  %1180 = vmatmul.mubr.bf16.vlgmr.msra.gmra.mrb[16].mxu0 %v2072_v3  ;;  %v2148_v2 = vld [vmem:[%s2696_s0 + $0x13c] ss:$36 sps:$4 sm:$0xff]  }
  0x43   :  { %1866 = vmatpush3.bf16.msra.mxu1 %v2075_v4  ;;  %1939 = vmatpush3.bf16.msra.mxu0 %v2076_v5  ;;  %v2150_v3 = vld [vmem:[%s2696_s0 + $0x138] ss:$36 sps:$4 sm:$0xff]   ;;  %v2151_v4 = vld [vmem:[%s2696_s0 + $0x140] ss:$36 sps:$4 sm:$0xff]  }
  0x44   :  { %1099 = vmatprep.mubr.bf16.mxu1 %v2077_v6  ;;  %1867 = vmatprep.subr.bf16.mxu1 %v2079_v8  ;;  %v2152_v5 = vld [vmem:[%s2696_s0 + $0x184] ss:$36 sps:$4 sm:$0xff]  }
  0x45   :  { %1187 = vmatprep.mubr.bf16.mxu0 %v2082_v10  ;;  %1940 = vmatprep.subr.bf16.mxu0 %v2159_v7  ;;  %v78_v6 = vld [vmem:[%s2696_s0 + $0x1c8] sm:$0x11]  ;;  %v2154_v8 = vld [vmem:[%s2696_s0 + $0x180] ss:$36 sps:$4 sm:$0xff]  }
  0x46   :  { %v1556_v10 = vcombine.high %v78_v6, %v78_v6 }
  0x47   :  { %1868 = vmatpush3.bf16.msra.mxu1 %v2081_v9  ;;  %1941 = vmatpush3.bf16.msra.mxu0 %v2085_v11  ;;  %v2155_v9 = vld [vmem:[%s2696_s0 + $0x188] ss:$36 sps:$4 sm:$0xff]   ;;  %v1555_v11 = vcombine.low %v78_v6, %v78_v6 }
  0x48   :  { %1869 = vmatprep.subr.bf16.mxu1 %v2086_v12  ;;  %1942 = vmatprep.subr.bf16.mxu0 %v2159_v7  ;;  %v2158_v12 = vld [vmem:[%s2696_s0 + $0x1d0] ss:$0 sps:$4 sm:$0x11]  }
  0x4a   :  { %1100 = vmatmul.mubr.bf16.gmra.mrb[16].mxu1 %v2080_v13  ;;  %1188 = vmatmul.mubr.bf16.gmra.mrb[20].mxu0 %v2084_v14 }
  0x4b   :  { %1107 = vmatprep.mubr.bf16.mxu1 %v2087_v15  ;;  %1870 = vmatpush3.bf16.msra.mxu1 %v2089_v16 }
  0x4c   :  { %1195 = vmatprep.mubr.bf16.mxu0 %v2091_v17  ;;  %1943 = vmatpush3.bf16.msra.mxu0 %v2094_v18 }
  0x4d   :  { %1871 = vmatprep.subr.bf16.mxu1 %v2095_v19  ;;  %1944 = vmatprep.subr.bf16.mxu0 %v2159_v7 }
  0x4f   :  { %1872 = vmatpush3.bf16.msra.mxu1 %v2096_v20 }
  0x50   :  { %1945 = vmatpush3.bf16.msra.mxu0 %v2103_v25  ;;  %1873 = vmatprep.subr.bf16.mxu1 %v2104_v26 }
  0x51   :  { %1946 = vmatprep.subr.bf16.mxu0 %v2159_v7 }
  0x52   :  { %1108 = vmatmul.mubr.bf16.gmra.mrb[20].mxu1 %v2090_v21  ;;  %1196 = vmatmul.mubr.bf16.gmra.mrb[24].mxu0 %v2093_v22 }
  0x53   :  { %1115 = vmatprep.mubr.bf16.mxu1 %v2097_v23  ;;  %1203 = vmatprep.mubr.bf16.mxu0 %v2100_v24 }
  0x54   :  { %1874 = vmatpush3.bf16.msra.mxu1 %v2105_v27  ;;  %1947 = vmatpush3.bf16.msra.mxu0 %v2112_v30 }
  0x55   :  { %1875 = vmatprep.subr.bf16.mxu1 %v2113_v31  ;;  %1948 = vmatprep.subr.bf16.mxu0 %v2159_v7 }
  0x58   :  { %1876 = vmatpush3.bf16.msra.mxu1 %v2114_v32  ;;  %1949 = vmatpush3.bf16.msra.mxu0 %v2120_v35 }
  0x59   :  { %1877 = vmatprep.subr.bf16.mxu1 %v2122_v36  ;;  %1950 = vmatprep.subr.bf16.mxu0 %v2159_v7 }
  0x5a   :  { %1116 = vmatmul.mubr.bf16.gmra.mrb[24].mxu1 %v2099_v28  ;;  %1204 = vmatmul.mubr.bf16.gmra.mrb[28].mxu0 %v2102_v29 }
  0x5b   :  { %1123 = vmatprep.mubr.bf16.mxu1 %v2106_v33  ;;  %1211 = vmatprep.mubr.bf16.mxu0 %v2109_v34 }
  0x5c   :  { %1878 = vmatpush3.bf16.msra.mxu1 %v2123_v39  ;;  %1951 = vmatpush3.bf16.msra.mxu0 %v2126_v41 }
  0x5d   :  { %1879 = vmatprep.subr.bf16.mxu1 %v2128_v42  ;;  %1952 = vmatprep.subr.bf16.mxu0 %v2159_v7 }
  0x60   :  { %1880 = vmatpush3.bf16.msra.mxu1 %v2130_v44  ;;  %1953 = vmatpush3.bf16.msra.mxu0 %v2134_v45 }
  0x62   :  { %1124 = vmatmul.mubr.bf16.gmra.mrb[28].mxu1 %v2108_v37  ;;  %1212 = vmatmul.mubr.bf16.gmra.mrb[32].mxu0 %v2111_v38 }
  0x63   :  { %1131 = vmatprep.mubr.bf16.mxu1 %v2115_v40  ;;  %1219 = vmatprep.mubr.bf16.mxu0 %v2118_v43 }
  0x6a   :  { %1132 = vmatmul.mubr.bf16.gmra.mrb[32].mxu1 %v2117_v48  ;;  %1220 = vmatmul.mubr.bf16.gmra.mrb[36].mxu0 %v2121_v49 }
  0x6b   :  { %1139 = vmatprep.mubr.bf16.mxu1 %v1552_v50  ;;  %1227 = vmatprep.mubr.bf16.mxu0 %v1554_v51 }
  0x72   :  { %1140 = vmatmul.mubr.bf16.gmra.mrb[36].mxu1 %v1551_v52  ;;  %1228 = vmatmul.mubr.bf16.gmra.mrb[40].mxu0 %v1553_v53 }
  0x73   :  { %1267 = vmatprep.mubr.bf16.mxu1 %v2133_v54  ;;  %1954 = vmatprep.mubr.msk.bf16.mxu0 %vm2160_vm0, %v2159_v7 }
  0x7a   :  { %1268 = vmatmul.mubr.bf16.vlgmr.msra.gmra.mrb[40].mxu1 %v2131_v55  ;;  %1955 = vmatmul.mubr.bf16.vlgmr.msra.gmra.mrb[44].mxu0 %v2135_v56  ;;  %v2613_v55 = vld [vmem:[%s2697_s2] ss:$0 sm:$0xff] }
  0x7b   :  { %1275 = vmatprep.mubr.bf16.mxu1 %v2136_v57  ;;  %1958 = vmatprep.mubr.msk.bf16.mxu0 %vm2160_vm0, %v2159_v7 }
  0x82   :  { %1276 = vmatmul.mubr.bf16.gmra.mrb[44].mxu1 %v2138_v58  ;;  %1959 = vmatmul.mubr.bf16.gmra.mrb[48].mxu0 %v2139_v59 }
  0x83   :  { %1283 = vmatprep.mubr.bf16.mxu1 %v2140_v60  ;;  %1962 = vmatprep.mubr.msk.bf16.mxu0 %vm2160_vm0, %v2159_v7 }
  0x8a   :  { %1284 = vmatmul.mubr.bf16.gmra.mrb[48].mxu1 %v2142_v61  ;;  %1963 = vmatmul.mubr.bf16.gmra.mrb[52].mxu0 %v2143_v62 }
  0x8b   :  { %1291 = vmatprep.mubr.bf16.mxu1 %v2144_v63  ;;  %1966 = vmatprep.mubr.msk.bf16.mxu0 %vm2160_vm0, %v2159_v7 }
  0x92   :  { %1292 = vmatmul.mubr.bf16.gmra.mrb[52].mxu1 %v2146_v0  ;;  %1967 = vmatmul.mubr.bf16.gmra.mrb[56].mxu0 %v2147_v1 }
  0x93   :  { %1299 = vmatprep.mubr.bf16.mxu1 %v2148_v2  ;;  %1970 = vmatprep.mubr.msk.bf16.mxu0 %vm2160_vm0, %v2159_v7 }
  0x9a   :  { %1300 = vmatmul.mubr.bf16.gmra.mrb[56].mxu1 %v2150_v3  ;;  %1971 = vmatmul.mubr.bf16.gmra.mrb[60].mxu0 %v2151_v4 }
  0x9b   :  { %1307 = vmatprep.mubr.bf16.mxu1 %v2152_v5  ;;  %1974 = vmatprep.mubr.msk.bf16.mxu0 %vm2160_vm0, %v2159_v7 }
  0xa2   :  { %1308 = vmatmul.mubr.bf16.gmra.mrb[60].mxu1 %v2154_v8  ;;  %1975 = vmatmul.mubr.bf16.gmra.mrb[64].mxu0 %v2155_v9 }
  0xa3   :  { %1315 = vmatprep.mubr.bf16.mxu1 %v1556_v10  ;;  %1978 = vmatprep.mubr.msk.bf16.mxu0 %vm2160_vm0, %v2159_v7 }
  0xaa   :  { %1316 = vmatmul.mubr.bf16.gmra.mrb[64].mxu1 %v1555_v11  ;;  %1979 = vmatmul.mubr.bf16.gmra.mrb[68].mxu0 %v2158_v12 }
  0xf5   :  { %v1731_v13 = vpop.f32.mrb[0].mxu1  ;;  %v1707_v14 = vpop.f32.mrb[0].mxu0 }
  0xf6   :  { %v1732_v15 = vpop.f32.mrb[1].mxu1  ;;  %v1708_v16 = vpop.f32.mrb[1].mxu0 }
  0xf7   :  { %v2596_v17 = vadd.f32 %v1732_v15, %v1731_v13  ;;  %v1734_v18 = vpop.f32.mrb[2].mxu1  ;;  %v1709_v19 = vadd.f32 %v1708_v16, %v1707_v14  ;;  %v1710_v20 = vpop.f32.mrb[2].mxu0 }
  0xf8   :  { %v1735_v21 = vpop.f32.mrb[3].mxu1  ;;  %v1711_v22 = vpop.f32.mrb[3].mxu0 }
  0xf9   :  { %v2598_v23 = vadd.f32 %v1735_v21, %v1734_v18  ;;  %v1712_v7 = vadd.f32 %v1711_v22, %v1710_v20  ;;  %v1006_v58 = vadd.f32 %v1709_v19, %v2613_v55 }
  0xfb   :  { %v1009_v1 = vadd.f32 %v1712_v7, %v2613_v55 }
  0xfd   :  { %v1713_v24 = vpop.f32.mrb[4].mxu0  ;;  %v1737_v25 = vpop.f32.mrb[4].mxu1 }
  0xfe   :  { %v1714_v26 = vpop.f32.mrb[5].mxu0  ;;  %v1738_v27 = vpop.f32.mrb[5].mxu1 }
  0xff   :  { %v1715_v28 = vadd.f32 %v1714_v26, %v1713_v24  ;;  %v1716_v29 = vpop.f32.mrb[6].mxu0  ;;  %v2600_v30 = vadd.f32 %v1738_v27, %v1737_v25  ;;  %v1740_v31 = vpop.f32.mrb[6].mxu1 }
 0x100   :  { %v1717_v32 = vpop.f32.mrb[7].mxu0  ;;  %v1741_v33 = vpop.f32.mrb[7].mxu1 }
 0x101   :  { %v1718_v34 = vadd.f32 %v1717_v32, %v1716_v29  ;;  %v2602_v35 = vadd.f32 %v1741_v33, %v1740_v31  ;;  %v1014_v13 = vadd.f32 %v1715_v28, %v2613_v55 }
 0x103   :  { %v1017_v21 = vadd.f32 %v1718_v34, %v2613_v55 }
 0x105   :  { %v1719_v36 = vpop.f32.mrb[8].mxu0  ;;  %v1743_v37 = vpop.f32.mrb[8].mxu1 }
 0x106   :  { %v1720_v38 = vpop.f32.mrb[9].mxu0  ;;  %v1744_v39 = vpop.f32.mrb[9].mxu1 }
 0x107   :  { %v1721_v40 = vadd.f32 %v1720_v38, %v1719_v36  ;;  %v1722_v41 = vpop.f32.mrb[10].mxu0  ;;  %v2604_v42 = vadd.f32 %v1744_v39, %v1743_v37  ;;  %v1746_v43 = vpop.f32.mrb[10].mxu1 }
 0x108   :  { %v1723_v44 = vpop.f32.mrb[11].mxu0  ;;  %v1747_v45 = vpop.f32.mrb[11].mxu1 }
 0x109   :  { %v1724_v46 = vadd.f32 %v1723_v44, %v1722_v41  ;;  %v1022_v33 = vadd.f32 %v1721_v40, %v2613_v55 }
 0x10b   :  { %v1025_v43 = vadd.f32 %v1724_v46, %v2613_v55 }
 0x10d   :  { %v1725_v47 = vpop.f32.mrb[12].mxu0 }
 0x10e   :  { %v1726_v48 = vpop.f32.mrb[13].mxu0 }
 0x10f   :  { %v2606_v49 = vadd.f32 %v1726_v48, %v1725_v47  ;;  %v1728_v50 = vpop.f32.mrb[14].mxu0 }
 0x110   :  { %v1729_v51 = vpop.f32.mrb[15].mxu0 }
 0x111   :  { %v2608_v52 = vadd.f32 %v1729_v51, %v1728_v50 }
 0x115   :  { %v1765_v53 = vpop.f32.mrb[12].mxu1  ;;  %v1823_v54 = vpop.f32.mrb[16].mxu0 }
 0x116   :  { %v1766_v56 = vpop.f32.mrb[13].mxu1  ;;  %v1824_v57 = vpop.f32.mrb[17].mxu0 }
 0x117   :  { %v1767_v59 = vadd.f32 %v1766_v56, %v1765_v53  ;;  %v1768_v60 = vpop.f32.mrb[14].mxu1  ;;  %v1825_v61 = vadd.f32 %v1824_v57, %v1823_v54  ;;  %v1826_v62 = vpop.f32.mrb[18].mxu0  ;;  %v1030_v57 = vadd.f32 %v2606_v49, %v2613_v55 }
 0x118   :  { %v1769_v63 = vpop.f32.mrb[15].mxu1  ;;  %v1827_v0 = vpop.f32.mrb[19].mxu0 }
 0x119   :  { %v1094_v2 = vadd.f32 %v1767_v59, %v1006_v58  ;;  %v1770_v3 = vadd.f32 %v1769_v63, %v1768_v60  ;;  %v1828_v4 = vadd.f32 %v1827_v0, %v1826_v62  ;;  %v1033_v63 = vadd.f32 %v2608_v52, %v2613_v55 }
 0x11b   :  { %v1097_v5 = vadd.f32 %v1770_v3, %v1009_v1  ;;  %v2617_v6 = vadd.f32 %v1825_v61, %v1094_v2 }
 0x11d   :  { %v2619_v8 = vadd.f32 %v1828_v4, %v1097_v5  ;;  %v1771_v9 = vpop.f32.mrb[16].mxu1  ;;  %v1829_v10 = vpop.f32.mrb[20].mxu0 }
 0x11e   :  { %v1772_v11 = vpop.f32.mrb[17].mxu1  ;;  %v1830_v12 = vpop.f32.mrb[21].mxu0 }
 0x11f   :  { %v1773_v14 = vadd.f32 %v1772_v11, %v1771_v9  ;;  %v1774_v15 = vpop.f32.mrb[18].mxu1  ;;  %v1831_v16 = vadd.f32 %v1830_v12, %v1829_v10  ;;  %v1832_v18 = vpop.f32.mrb[22].mxu0  ;;  %v1038_v12 = vadd.f32 %v2596_v17, %v2613_v55 }
 0x120   :  { %v1775_v19 = vpop.f32.mrb[19].mxu1  ;;  %v1833_v20 = vpop.f32.mrb[23].mxu0 }
 0x121   :  { %v1102_v22 = vadd.f32 %v1773_v14, %v1014_v13  ;;  %v1776_v7 = vadd.f32 %v1775_v19, %v1774_v15  ;;  %v1834_v24 = vadd.f32 %v1833_v20, %v1832_v18  ;;  %v1041_v19 = vadd.f32 %v2598_v23, %v2613_v55 }
 0x123   :  { %v1105_v25 = vadd.f32 %v1776_v7, %v1017_v21  ;;  %v2623_v26 = vadd.f32 %v1831_v16, %v1102_v22 }
 0x125   :  { %v2625_v27 = vadd.f32 %v1834_v24, %v1105_v25  ;;  %v1777_v29 = vpop.f32.mrb[20].mxu1  ;;  %v1835_v31 = vpop.f32.mrb[24].mxu0 }
 0x126   :  { %v1778_v32 = vpop.f32.mrb[21].mxu1  ;;  %v1836_v28 = vpop.f32.mrb[25].mxu0 }
 0x127   :  { %v1779_v36 = vadd.f32 %v1778_v32, %v1777_v29  ;;  %v1780_v37 = vpop.f32.mrb[22].mxu1  ;;  %v1837_v38 = vadd.f32 %v1836_v28, %v1835_v31  ;;  %v1838_v39 = vpop.f32.mrb[26].mxu0  ;;  %v1046_v28 = vadd.f32 %v2600_v30, %v2613_v55 }
 0x128   :  { %v1781_v41 = vpop.f32.mrb[23].mxu1  ;;  %v1839_v34 = vpop.f32.mrb[27].mxu0 }
 0x129   :  { %v1110_v44 = vadd.f32 %v1779_v36, %v1022_v33  ;;  %v1782_v45 = vadd.f32 %v1781_v41, %v1780_v37  ;;  %v1840_v47 = vadd.f32 %v1839_v34, %v1838_v39  ;;  %v1049_v41 = vadd.f32 %v2602_v35, %v2613_v55 }
 0x12b   :  { %v1113_v48 = vadd.f32 %v1782_v45, %v1025_v43  ;;  %v2629_v50 = vadd.f32 %v1837_v38, %v1110_v44 }
 0x12d   :  { %v2631_v51 = vadd.f32 %v1840_v47, %v1113_v48  ;;  %v1783_v53 = vpop.f32.mrb[24].mxu1  ;;  %v1841_v54 = vpop.f32.mrb[28].mxu0 }
 0x12e   :  { %v1784_v56 = vpop.f32.mrb[25].mxu1  ;;  %v1842_v40 = vpop.f32.mrb[29].mxu0 }
 0x12f   :  { %v1785_v58 = vadd.f32 %v1784_v56, %v1783_v53  ;;  %v1786_v59 = vpop.f32.mrb[26].mxu1  ;;  %v1843_v60 = vadd.f32 %v1842_v40, %v1841_v54  ;;  %v1844_v61 = vpop.f32.mrb[30].mxu0  ;;  %v1054_v40 = vadd.f32 %v2604_v42, %v2613_v55 }
 0x130   :  { %v1787_v46 = vpop.f32.mrb[27].mxu1  ;;  %v1845_v62 = vpop.f32.mrb[31].mxu0 }
 0x131   :  { %v1118_v0 = vadd.f32 %v1785_v58, %v1030_v57  ;;  %v1788_v1 = vadd.f32 %v1787_v46, %v1786_v59  ;;  %v1846_v2 = vadd.f32 %v1845_v62, %v1844_v61 }
 0x133   :  { %v1121_v3 = vadd.f32 %v1788_v1, %v1033_v63  ;;  %v2637_v4 = vadd.f32 %v1843_v60, %v1118_v0 }
 0x135   :  { %v2639_v5 = vadd.f32 %v1846_v2, %v1121_v3  ;;  %v1789_v9 = vpop.f32.mrb[28].mxu1  ;;  %v1847_v10 = vpop.f32.mrb[32].mxu0 }
 0x136   :  { %v1790_v49 = vpop.f32.mrb[29].mxu1  ;;  %v1848_v11 = vpop.f32.mrb[33].mxu0 }
 0x137   :  { %v1791_v13 = vadd.f32 %v1790_v49, %v1789_v9  ;;  %v1792_v14 = vpop.f32.mrb[30].mxu1  ;;  %v1849_v15 = vadd.f32 %v1848_v11, %v1847_v10  ;;  %v1850_v16 = vpop.f32.mrb[34].mxu0 }
 0x138   :  { %v1793_v52 = vpop.f32.mrb[31].mxu1  ;;  %v1851_v18 = vpop.f32.mrb[35].mxu0 }
 0x139   :  { %v1126_v20 = vadd.f32 %v1791_v13, %v1038_v12  ;;  %v1794_v21 = vadd.f32 %v1793_v52, %v1792_v14  ;;  %v1852_v22 = vadd.f32 %v1851_v18, %v1850_v16 }
 0x13b   :  { %v1129_v7 = vadd.f32 %v1794_v21, %v1041_v19  ;;  %v2645_v24 = vadd.f32 %v1849_v15, %v1126_v20 }
 0x13d   :  { %v2647_v25 = vadd.f32 %v1852_v22, %v1129_v7  ;;  %v1795_v29 = vpop.f32.mrb[32].mxu1  ;;  %v1853_v31 = vpop.f32.mrb[36].mxu0 }
 0x13e   :  { %v1796_v17 = vpop.f32.mrb[33].mxu1  ;;  %v1854_v32 = vpop.f32.mrb[37].mxu0 }
 0x13f   :  { %v1797_v33 = vadd.f32 %v1796_v17, %v1795_v29  ;;  %v1798_v36 = vpop.f32.mrb[34].mxu1  ;;  %v1855_v37 = vadd.f32 %v1854_v32, %v1853_v31  ;;  %v1856_v38 = vpop.f32.mrb[38].mxu0 }
 0x140   :  { %v1799_v23 = vpop.f32.mrb[35].mxu1  ;;  %v1857_v39 = vpop.f32.mrb[39].mxu0 }
 0x141   :  { %v1134_v34 = vadd.f32 %v1797_v33, %v1046_v28  ;;  %v1800_v43 = vadd.f32 %v1799_v23, %v1798_v36  ;;  %v1858_v44 = vadd.f32 %v1857_v39, %v1856_v38 }
 0x143   :  { %v1137_v45 = vadd.f32 %v1800_v43, %v1049_v41  ;;  %v2653_v47 = vadd.f32 %v1855_v37, %v1134_v34 }
 0x145   :  { %v2655_v48 = vadd.f32 %v1858_v44, %v1137_v45  ;;  %v1801_v53 = vpop.f32.mrb[36].mxu1  ;;  %v1859_v54 = vpop.f32.mrb[40].mxu0 }
 0x146   :  { %v1802_v30 = vpop.f32.mrb[37].mxu1  ;;  %v1860_v56 = vpop.f32.mrb[41].mxu0 }
 0x147   :  { %v1803_v57 = vadd.f32 %v1802_v30, %v1801_v53  ;;  %v1804_v58 = vpop.f32.mrb[38].mxu1  ;;  %v1861_v59 = vadd.f32 %v1860_v56, %v1859_v54  ;;  %v1862_v60 = vpop.f32.mrb[42].mxu0 }
 0x148   :  { %v1805_v35 = vpop.f32.mrb[39].mxu1  ;;  %v1863_v61 = vpop.f32.mrb[43].mxu0 }
 0x149   :  { %v1142_v46 = vadd.f32 %v1803_v57, %v1054_v40 }
 0x14b   :  { %v2659_v62 = vadd.f32 %v1861_v59, %v1142_v46 }
 0x14d   :  { %v1881_v63 = vpop.f32.mrb[40].mxu1  ;;  %v1357_v0 = vpop.f32.mrb[44].mxu0 }
 0x14e   :  { %v1882_v1 = vpop.f32.mrb[41].mxu1  ;;  %v1956_v2 = vpop.f32.mrb[45].mxu0 }
 0x14f   :  { %v1883_v3 = vadd.f32 %v1882_v1, %v1881_v63  ;;  %v1884_v9 = vpop.f32.mrb[42].mxu1  ;;  %v1360_v10 = vpop.f32.mrb[46].mxu0 }
 0x150   :  { %v1885_v49 = vpop.f32.mrb[43].mxu1  ;;  %v1957_v11 = vpop.f32.mrb[47].mxu0 }
 0x151   :  { %v1886_v12 = vadd.f32 %v1885_v49, %v1884_v9  ;;  %v1270_v42 = vadd.f32 %v1883_v3, %v2617_v6 }
 0x153   :  { %v1358_v55 = vadd.f32 %v1357_v0, %v1270_v42  ;;  %v1273_v13 = vadd.f32 %v1886_v12, %v2619_v8 }
 0x155   :  { %v1361_v14 = vadd.f32 %v1360_v10, %v1273_v13  ;;  %v1887_v15 = vpop.f32.mrb[44].mxu1  ;;  %v1365_v16 = vpop.f32.mrb[48].mxu0  ;;  %v1411_v19 = vmax.f32 %v1358_v55, 0.0 }
 0x156   :  { %v1888_v52 = vpop.f32.mrb[45].mxu1  ;;  %v1960_v18 = vpop.f32.mrb[49].mxu0 }
 0x157   :  { %v1412_v20 = vmax.f32 %v1361_v14, 0.0  ;;  %v1889_v21 = vadd.f32 %v1888_v52, %v1887_v15  ;;  %v1890_v22 = vpop.f32.mrb[46].mxu1  ;;  %v1368_v7 = vpop.f32.mrb[50].mxu0 }
 0x158   :  { %v1891_v29 = vpop.f32.mrb[47].mxu1  ;;  %v1961_v31 = vpop.f32.mrb[51].mxu0 }
 0x159   :  { %v1659_v17 = vpack.c.bf16 %v1412_v20, %v1411_v19  ;;  %v1892_v32 = vadd.f32 %v1891_v29, %v1890_v22  ;;  %v1278_v28 = vadd.f32 %v1889_v21, %v2623_v26 }
 0x15b   :  { %1660 = vst [vmem:[%s2698_s3] sm:$0xff] %v1659_v17   ;;  %v1366_v6 = vadd.f32 %v1365_v16, %v1278_v28  ;;  %v1281_v8 = vadd.f32 %v1892_v32, %v2625_v27 }
 0x15d   :  { %v1369_v33 = vadd.f32 %v1368_v7, %v1281_v8  ;;  %v1893_v36 = vpop.f32.mrb[48].mxu1  ;;  %v1373_v37 = vpop.f32.mrb[52].mxu0  ;;  %v1413_v39 = vmax.f32 %v1366_v6, 0.0 }
 0x15e   :  { %v1894_v38 = vpop.f32.mrb[49].mxu1  ;;  %v1964_v23 = vpop.f32.mrb[53].mxu0 }
 0x15f   :  { %v1414_v41 = vmax.f32 %v1369_v33, 0.0  ;;  %v1895_v34 = vadd.f32 %v1894_v38, %v1893_v36  ;;  %v1896_v43 = vpop.f32.mrb[50].mxu1  ;;  %v1376_v44 = vpop.f32.mrb[54].mxu0 }
 0x160   :  { %v1897_v45 = vpop.f32.mrb[51].mxu1  ;;  %v1965_v53 = vpop.f32.mrb[55].mxu0 }
 0x161   :  { %v1664_v26 = vpack.c.bf16 %v1414_v41, %v1413_v39  ;;  %v1898_v54 = vadd.f32 %v1897_v45, %v1896_v43  ;;  %v1286_v30 = vadd.f32 %v1895_v34, %v2629_v50 }
 0x163   :  { %1686 = vst [vmem:[%s2698_s3 + $0x8] sm:$0xff] %v1664_v26   ;;  %v1374_v27 = vadd.f32 %v1373_v37, %v1286_v30  ;;  %v1289_v56 = vadd.f32 %v1898_v54, %v2631_v51 }
 0x165   :  { %v1377_v40 = vadd.f32 %v1376_v44, %v1289_v56  ;;  %v1899_v57 = vpop.f32.mrb[52].mxu1  ;;  %v1381_v58 = vpop.f32.mrb[56].mxu0  ;;  %v1415_v35 = vmax.f32 %v1374_v27, 0.0 }
 0x166   :  { %v1900_v59 = vpop.f32.mrb[53].mxu1  ;;  %v1968_v60 = vpop.f32.mrb[57].mxu0 }
 0x167   :  { %v1416_v61 = vmax.f32 %v1377_v40, 0.0  ;;  %v1901_v46 = vadd.f32 %v1900_v59, %v1899_v57  ;;  %v1902_v63 = vpop.f32.mrb[54].mxu1  ;;  %v1384_v0 = vpop.f32.mrb[58].mxu0 }
 0x168   :  { %v1903_v1 = vpop.f32.mrb[55].mxu1  ;;  %v1969_v2 = vpop.f32.mrb[59].mxu0 }
 0x169   :  { %v1669_v50 = vpack.c.bf16 %v1416_v61, %v1415_v35  ;;  %v1904_v3 = vadd.f32 %v1903_v1, %v1902_v63  ;;  %v1294_v9 = vadd.f32 %v1901_v46, %v2637_v4 }
 0x16b   :  { %1687 = vst [vmem:[%s2698_s3 + $0x10] sm:$0xff] %v1669_v50   ;;  %v1382_v51 = vadd.f32 %v1381_v58, %v1294_v9  ;;  %v1297_v10 = vadd.f32 %v1904_v3, %v2639_v5 }
 0x16d   :  { %v1385_v49 = vadd.f32 %v1384_v0, %v1297_v10  ;;  %v1905_v11 = vpop.f32.mrb[56].mxu1  ;;  %v1389_v12 = vpop.f32.mrb[60].mxu0  ;;  %v1417_v13 = vmax.f32 %v1382_v51, 0.0 }
 0x16e   :  { %v1906_v42 = vpop.f32.mrb[57].mxu1  ;;  %v1972_v55 = vpop.f32.mrb[61].mxu0 }
 0x16f   :  { %v1418_v14 = vmax.f32 %v1385_v49, 0.0  ;;  %v1907_v15 = vadd.f32 %v1906_v42, %v1905_v11  ;;  %v1908_v16 = vpop.f32.mrb[58].mxu1  ;;  %v1392_v52 = vpop.f32.mrb[62].mxu0 }
 0x170   :  { %v1909_v18 = vpop.f32.mrb[59].mxu1  ;;  %v1973_v19 = vpop.f32.mrb[63].mxu0 }
 0x171   :  { %v1674_v4 = vpack.c.bf16 %v1418_v14, %v1417_v13  ;;  %v1910_v20 = vadd.f32 %v1909_v18, %v1908_v16  ;;  %v1302_v21 = vadd.f32 %v1907_v15, %v2645_v24 }
 0x173   :  { %1688 = vst [vmem:[%s2698_s3 + $0x18] sm:$0xff] %v1674_v4   ;;  %v1390_v5 = vadd.f32 %v1389_v12, %v1302_v21  ;;  %v1305_v22 = vadd.f32 %v1910_v20, %v2647_v25 }
 0x175   :  { %v1393_v7 = vadd.f32 %v1392_v52, %v1305_v22  ;;  %v1911_v29 = vpop.f32.mrb[60].mxu1  ;;  %v1397_v31 = vpop.f32.mrb[64].mxu0  ;;  %v1419_v28 = vmax.f32 %v1390_v5, 0.0 }
 0x176   :  { %v1912_v17 = vpop.f32.mrb[61].mxu1  ;;  %v1976_v32 = vpop.f32.mrb[65].mxu0 }
 0x177   :  { %v1420_v6 = vmax.f32 %v1393_v7, 0.0  ;;  %v1913_v8 = vadd.f32 %v1912_v17, %v1911_v29  ;;  %v1914_v33 = vpop.f32.mrb[62].mxu1  ;;  %v1400_v36 = vpop.f32.mrb[66].mxu0 }
 0x178   :  { %v1915_v37 = vpop.f32.mrb[63].mxu1  ;;  %v1977_v38 = vpop.f32.mrb[67].mxu0 }
 0x179   :  { %v1679_v24 = vpack.c.bf16 %v1420_v6, %v1419_v28  ;;  %v1916_v23 = vadd.f32 %v1915_v37, %v1914_v33  ;;  %v1310_v39 = vadd.f32 %v1913_v8, %v2653_v47 }
 0x17b   :  { %1689 = vst [vmem:[%s2698_s3 + $0x20] sm:$0xff] %v1679_v24   ;;  %v1398_v25 = vadd.f32 %v1397_v31, %v1310_v39  ;;  %v1313_v41 = vadd.f32 %v1916_v23, %v2655_v48 }
 0x17d   :  { %v1401_v34 = vadd.f32 %v1400_v36, %v1313_v41  ;;  %v1917_v43 = vpop.f32.mrb[64].mxu1  ;;  %v1405_v44 = vpop.f32.mrb[68].mxu0  ;;  %v1421_v26 = vmax.f32 %v1398_v25, 0.0 }
 0x17e   :  { %v1918_v45 = vpop.f32.mrb[65].mxu1  ;;  %v1980_v53 = vpop.f32.mrb[69].mxu0 }
 0x17f   :  { %v1422_v54 = vmax.f32 %v1401_v34, 0.0  ;;  %v1919_v30 = vadd.f32 %v1918_v45, %v1917_v43  ;;  %v1920_v27 = vpop.f32.mrb[66].mxu1  ;;  %v1408_v56 = vpop.f32.mrb[70].mxu0 }
 0x180   :  { %v1921_v40 = vpop.f32.mrb[67].mxu1  ;;  %v1981_v57 = vpop.f32.mrb[71].mxu0 }
 0x181   :  { %v1684_v47 = vpack.c.bf16 %v1422_v54, %v1421_v26  ;;  %v1318_v58 = vadd.f32 %v1919_v30, %v2659_v62 }
 0x183   :  { %1690 = vst [vmem:[%s2698_s3 + $0x28] sm:$0xff] %v1684_v47   ;;  %v1406_v48 = vadd.f32 %v1405_v44, %v1318_v58 }
 0x185   :  { %v1423_v59 = vmax.f32 %v1406_v48, 0.0 }
 0x187   :  { %v1655_v60 = vpack.c.bf16 %v1423_v59, %v1423_v59 }
 0x189   :  { %1489 = vst [vmem:[%s2698_s3 + $0x30] sm:$0x1] %v1655_v60 }

// kernel: critic_forward.7
= control target key start
LH: loop header
LB: loop body
LE: loop exit
PB: predicated region body
PF: predicated region fallthrough
CT: control target
= control target key end

     0   :  { %vm836_vm0 = vcmask 1041408   ;;  %v6305_v0 = vmov 0.0   ;;  %vm6306_vm1 = vmmov 0   ;;  %vm832_vm2 = vcmask 31744   ;;  %s7740_s3 = inlined_call_operand.vmem [shape: bf16[4,64], index: 3, kind: input, shape index: {}]   ;;  %s7741_s2 = inlined_call_operand.vmem [shape: bf16[6272,64], index: 2, kind: input, shape index: {}]   ;;  %s7742_s1 = inlined_call_operand.vmem [shape: bf16[2,4], index: 1, kind: input, shape index: {}]   ;;  %s7743_s0 = inlined_call_operand.vmem [shape: bf16[2,6272], index: 0, kind: input, shape index: {}]   ;;  %s7744_s5 = inlined_call_operand.vmem [shape: bf16[64,64], index: 5, kind: input, shape index: {}]   ;;  %s7745_s7 = inlined_call_operand.vmem [shape: bf16[64,64], index: 7, kind: input, shape index: {}]   ;;  %s7746_s4 = inlined_call_operand.vmem [shape: f32[1,64], index: 4, kind: input, shape index: {}]   ;;  %s7747_s9 = inlined_call_operand.vmem [shape: bf16[64,2], index: 9, kind: input, shape index: {}]   ;;  %s7748_s6 = inlined_call_operand.vmem [shape: f32[1,64], index: 6, kind: input, shape index: {}]   ;;  %s7749_s8 = inlined_call_operand.vmem [shape: f32[1,64], index: 8, kind: input, shape index: {}]   ;;  %s7750_s10 = inlined_call_operand.vmem [shape: f32[1,2], index: 10, kind: input, shape index: {}]   ;;  %s7751_s11 = inlined_call_operand.vmem [shape: f32[2,2], index: 11, kind: output, shape index: {}]  }
   0x1   :  { %5830 = vmatprep.subr.bf16.mxu0 %v6305_v0  ;;  %v831_v1 = vld [vmem:[%s7740_s3] sm:$0x3]  ;;  %5832 = vmatprep.mubr.msk.bf16.mxu0 %vm6306_vm1, %v6305_v0  ;;  %v5899_v8 = vld [vmem:[%s7741_s2 + $0x48] sm:$0xff]   ;;  %v5903_v12 = vld [vmem:[%s7741_s2 + $0x50] sm:$0xff]   ;;  %v891_v32 = vlaneseq  ;;  %v6307_v37 = vmov 1966171168  }
   0x2   :  { %v838_v2 = vsel %vm836_vm0, %v831_v1, 0  ;;  %v5895_v3 = vld [vmem:[%s7741_s2 + $0x40] sm:$0xff]   ;;  %v5900_v9 = vld [vmem:[%s7741_s2 + $0x8] sm:$0xff]   ;;  %v5904_v13 = vld [vmem:[%s7741_s2 + $0x10] sm:$0xff]   ;;  %v889_v38 = vunpack.c.l.s4 %v6307_v37  ;;  %vm4645_vm3 = vcmask 523264   ;;  %vm4857_vm4 = vcmask 9216  }
   0x3   :  { %5831 = vmatpush3.bf16.msra.mxu0 %v838_v2  ;;  %v5896_v4 = vld [vmem:[%s7741_s2] sm:$0xff]   ;;  %5278 = vmatprep.subr.bf16.mxu1 %v5895_v3  ;;  %v5901_v10 = vld [vmem:[%s7741_s2 + $0xc8] sm:$0xff]   ;;  %v5905_v14 = vld [vmem:[%s7741_s2 + $0xd0] sm:$0xff]   ;;  %v892_v39 = vshrl.u32 %v891_v32, 7 }
   0x4   :  { %v5897_v5 = vld [vmem:[%s7741_s2 + $0xc0] sm:$0xff]   ;;  %5279 = vmatpush3.bf16.msra.mxu1 %v5896_v4  ;;  %v5902_v11 = vld [vmem:[%s7741_s2 + $0x88] sm:$0xff]   ;;  %v5906_v15 = vld [vmem:[%s7741_s2 + $0x90] sm:$0xff]   ;;  %v890_v43 = vunpack.c.0.s8 %v889_v38 }
   0x5   :  { %v830_v6 = vld [vmem:[%s7742_s1] sm:$0x1]  ;;  %5300 = vmatprep.subr.bf16.mxu0 %v5897_v5  ;;  %5280 = vmatprep.subr.bf16.mxu1 %v5899_v8  ;;  %v5907_v16 = vld [vmem:[%s7741_s2 + $0x58] sm:$0xff]   ;;  %v5915_v24 = vld [vmem:[%s7741_s2 + $0x68] sm:$0xff]  }
   0x6   :  { %v5898_v7 = vld [vmem:[%s7741_s2 + $0x80] sm:$0xff]   ;;  %5833 = vmatmul.mubr.msk.bf16.vlgmr.msra.gmra.mrb[0].mxu0 %vm832_vm2, %v830_v6  ;;  %v5908_v17 = vld [vmem:[%s7741_s2 + $0x18] sm:$0xff]   ;;  %v5916_v25 = vld [vmem:[%s7741_s2 + $0x28] sm:$0xff]   ;;  %v6482_v45 = vsub.s32 %v890_v43, %v892_v39 }
   0x7   :  { %5301 = vmatpush3.bf16.msra.mxu0 %v5898_v7  ;;  %v5909_v18 = vld [vmem:[%s7741_s2 + $0xd8] sm:$0xff]   ;;  %v5911_v20 = vld [vmem:[%s7741_s2 + $0x60] sm:$0xff]   ;;  %v5917_v26 = vld [vmem:[%s7741_s2 + $0xe8] sm:$0xff]  }
   0x8   :  { %5281 = vmatpush3.bf16.msra.mxu1 %v5900_v9  ;;  %5302 = vmatprep.subr.bf16.mxu0 %v5901_v10  ;;  %v5910_v19 = vld [vmem:[%s7741_s2 + $0x98] sm:$0xff]   ;;  %v5912_v21 = vld [vmem:[%s7741_s2 + $0x20] sm:$0xff]   ;;  %v5918_v27 = vld [vmem:[%s7741_s2 + $0xa8] sm:$0xff]  }
   0x9   :  { %5282 = vmatprep.subr.bf16.mxu1 %v5903_v12  ;;  %v5913_v22 = vld [vmem:[%s7741_s2 + $0xe0] sm:$0xff]   ;;  %v5919_v28 = vld [vmem:[%s7741_s2 + $0x70] sm:$0xff]   ;;  %v5923_v33 = vld [vmem:[%s7741_s2 + $0x78] sm:$0xff]  }
   0xa   :  { %v5914_v23 = vld [vmem:[%s7741_s2 + $0xa0] sm:$0xff]   ;;  %v5920_v29 = vld [vmem:[%s7741_s2 + $0x30] sm:$0xff]   ;;  %v5924_v34 = vld [vmem:[%s7741_s2 + $0x38] sm:$0xff]  }
   0xb   :  { %5303 = vmatpush3.bf16.msra.mxu0 %v5902_v11  ;;  %v5921_v30 = vld [vmem:[%s7741_s2 + $0xf0] sm:$0xff]   ;;  %v5925_v35 = vld [vmem:[%s7741_s2 + $0xf8] sm:$0xff]   ;;  %v39_v36 = vld [vmem:[%s7743_s0] sm:$0xff] }
   0xc   :  { %5283 = vmatpush3.bf16.msra.mxu1 %v5904_v13  ;;  %5304 = vmatprep.subr.bf16.mxu0 %v5905_v14  ;;  %v5922_v31 = vld [vmem:[%s7741_s2 + $0xb0] sm:$0xff]   ;;  %v5927_v40 = vld [vmem:[%s7741_s2 + $0xb8] sm:$0xff]   ;;  %v5928_v41 = vld [vmem:[%s7741_s2 + $0x140] sm:$0xff]   ;;  %v887_v42 = vcombine.high %v39_v36, %v39_v36  ;;  %v894_v46 = vrot.slane %v39_v36, %v6482_v45 }
   0xd   :  { %5284 = vmatprep.subr.bf16.mxu1 %v5907_v16  ;;  %v5930_v44 = vld [vmem:[%s7741_s2 + $0x1c0] sm:$0xff]   ;;  %v5932_v56 = vld [vmem:[%s7741_s2 + $0x148] sm:$0xff]   ;;  %v5936_v62 = vld [vmem:[%s7741_s2 + $0x150] sm:$0xff]  }
   0xe   :  { %v6486_v47 = vrot.slane %v887_v42, %v6482_v45  ;;  %v902_v48 = vcombine.high %v894_v46, %v894_v46  ;;  %v910_v49 = vrot.slane %v894_v46, %v6482_v45  ;;  %v5929_v51 = vld [vmem:[%s7741_s2 + $0x100] sm:$0xff]   ;;  %v5933_v58 = vld [vmem:[%s7741_s2 + $0x108] sm:$0xff]   ;;  %v5937_v63 = vld [vmem:[%s7741_s2 + $0x110] sm:$0xff]  }
   0xf   :  { %5305 = vmatpush3.bf16.msra.mxu0 %v5906_v15  ;;  %v5931_v53 = vld [vmem:[%s7741_s2 + $0x180] sm:$0xff]   ;;  %v5934_v59 = vld [vmem:[%s7741_s2 + $0x1c8] sm:$0xff]   ;;  %v5938_v1 = vld [vmem:[%s7741_s2 + $0x1d0] sm:$0xff]  }
  0x10   :  { %5285 = vmatpush3.bf16.msra.mxu1 %v5908_v17  ;;  %5306 = vmatprep.subr.bf16.mxu0 %v5909_v18  ;;  %v903_v50 = vcombine.high %v6486_v47, %v6486_v47  ;;  %v924_v52 = vrot.slane %v902_v48, %v6482_v45  ;;  %v932_v55 = vcombine.high %v910_v49, %v910_v49  ;;  %v5935_v61 = vld [vmem:[%s7741_s2 + $0x188] sm:$0xff]   ;;  %v5939_v2 = vld [vmem:[%s7741_s2 + $0x190] sm:$0xff]   ;;  %v5940_v3 = vld [vmem:[%s7741_s2 + $0x158] sm:$0xff]  }
  0x11   :  { %5286 = vmatprep.subr.bf16.mxu1 %v5911_v20  ;;  %v5941_v4 = vld [vmem:[%s7741_s2 + $0x118] sm:$0xff]   ;;  %v5944_v7 = vld [vmem:[%s7741_s2 + $0x160] sm:$0xff]   ;;  %v5948_v11 = vld [vmem:[%s7741_s2 + $0x168] sm:$0xff]  }
  0x12   :  { %v931_v54 = vrot.slane %v903_v50, %v6482_v45  ;;  %v934_v57 = vcombine.high %v924_v52, %v924_v52  ;;  %3628 = vmatprep.mubr.bf16.mxu1 %v924_v52  ;;  %v5942_v5 = vld [vmem:[%s7741_s2 + $0x1d8] sm:$0xff]   ;;  %v5945_v8 = vld [vmem:[%s7741_s2 + $0x120] sm:$0xff]   ;;  %v5949_v12 = vld [vmem:[%s7741_s2 + $0x128] sm:$0xff]  }
  0x13   :  { %5307 = vmatpush3.bf16.msra.mxu0 %v5910_v19  ;;  %v5943_v6 = vld [vmem:[%s7741_s2 + $0x198] sm:$0xff]   ;;  %v5946_v9 = vld [vmem:[%s7741_s2 + $0x1e0] sm:$0xff]   ;;  %v5950_v13 = vld [vmem:[%s7741_s2 + $0x1e8] sm:$0xff]  }
  0x14   :  { %5287 = vmatpush3.bf16.msra.mxu1 %v5912_v21  ;;  %5308 = vmatprep.subr.bf16.mxu0 %v5913_v22  ;;  %v935_v60 = vcombine.high %v931_v54, %v931_v54  ;;  %v5947_v10 = vld [vmem:[%s7741_s2 + $0x1a0] sm:$0xff]   ;;  %v5951_v14 = vld [vmem:[%s7741_s2 + $0x1a8] sm:$0xff]   ;;  %v5952_v15 = vld [vmem:[%s7741_s2 + $0x170] sm:$0xff]  }
  0x15   :  { %5288 = vmatprep.subr.bf16.mxu1 %v5915_v24  ;;  %3668 = vmatprep.mubr.bf16.mxu0 %v934_v57  ;;  %v5953_v16 = vld [vmem:[%s7741_s2 + $0x130] sm:$0xff]   ;;  %v5956_v19 = vld [vmem:[%s7741_s2 + $0x178] sm:$0xff]   ;;  %v5960_v24 = vld [vmem:[%s7741_s2 + $0x240] sm:$0xff]  }
  0x16   :  { %v5954_v17 = vld [vmem:[%s7741_s2 + $0x1f0] sm:$0xff]   ;;  %v5957_v20 = vld [vmem:[%s7741_s2 + $0x138] sm:$0xff]   ;;  %v5967_v32 = vld [vmem:[%s7741_s2 + $0x288] sm:$0xff]  }
  0x17   :  { %5309 = vmatpush3.bf16.msra.mxu0 %v5914_v23  ;;  %v5955_v18 = vld [vmem:[%s7741_s2 + $0x1b0] sm:$0xff]   ;;  %v5958_v21 = vld [vmem:[%s7741_s2 + $0x1f8] sm:$0xff]   ;;  %v917_v23 = vrot.slane %v6486_v47, %v6482_v45  ;;  %v5977_v42 = vld [vmem:[%s7741_s2 + $0x220] sm:$0xff]  }
  0x18   :  { %5289 = vmatpush3.bf16.msra.mxu1 %v5916_v25  ;;  %5310 = vmatprep.subr.bf16.mxu0 %v5917_v26  ;;  %v5959_v22 = vld [vmem:[%s7741_s2 + $0x1b8] sm:$0xff]   ;;  %v5961_v25 = vld [vmem:[%s7741_s2 + $0x200] sm:$0xff]   ;;  %v5971_v36 = vld [vmem:[%s7741_s2 + $0x290] sm:$0xff]  }
  0x19   :  { %5290 = vmatprep.subr.bf16.mxu1 %v5919_v28  ;;  %v5962_v26 = vld [vmem:[%s7741_s2 + $0x2c0] sm:$0xff]   ;;  %v933_v28 = vcombine.high %v917_v23, %v917_v23  ;;  %v5972_v37 = vld [vmem:[%s7741_s2 + $0x258] sm:$0xff]   ;;  %v5980_v46 = vld [vmem:[%s7741_s2 + $0x268] sm:$0xff]  }
  0x1a   :  { %v5973_v38 = vld [vmem:[%s7741_s2 + $0x218] sm:$0xff]   ;;  %v5978_v43 = vld [vmem:[%s7741_s2 + $0x2e0] sm:$0xff]   ;;  %v5981_v47 = vld [vmem:[%s7741_s2 + $0x228] sm:$0xff]  }
  0x1b   :  { %5311 = vmatpush3.bf16.msra.mxu0 %v5918_v27  ;;  %v5963_v27 = vld [vmem:[%s7741_s2 + $0x280] sm:$0xff]   ;;  %v5974_v39 = vld [vmem:[%s7741_s2 + $0x2d8] sm:$0xff]   ;;  %v5982_v48 = vld [vmem:[%s7741_s2 + $0x2e8] sm:$0xff]  }
  0x1c   :  { %5291 = vmatpush3.bf16.msra.mxu1 %v5920_v29  ;;  %5312 = vmatprep.subr.bf16.mxu0 %v5921_v30  ;;  %v5964_v29 = vld [vmem:[%s7741_s2 + $0x248] sm:$0xff]   ;;  %v5984_v50 = vld [vmem:[%s7741_s2 + $0x270] sm:$0xff]   ;;  %v5988_v57 = vld [vmem:[%s7741_s2 + $0x278] sm:$0xff]  }
  0x1d   :  { %5292 = vmatprep.subr.bf16.mxu1 %v5923_v33  ;;  %v5965_v30 = vld [vmem:[%s7741_s2 + $0x208] sm:$0xff]   ;;  %v5968_v33 = vld [vmem:[%s7741_s2 + $0x250] sm:$0xff]  }
  0x1e   :  { %v40_v52 = vld [vmem:[%s7743_s0 + $0x8] sm:$0xff] }
  0x1f   :  { %5313 = vmatpush3.bf16.msra.mxu0 %v5922_v31  ;;  %v5966_v31 = vld [vmem:[%s7741_s2 + $0x2c8] sm:$0xff]  }
  0x20   :  { %5293 = vmatpush3.bf16.msra.mxu1 %v5924_v34  ;;  %5314 = vmatprep.subr.bf16.mxu0 %v5925_v35  ;;  %v5969_v34 = vld [vmem:[%s7741_s2 + $0x210] sm:$0xff]  }
  0x21   :  { %5322 = vmatprep.subr.bf16.mxu1 %v5928_v41  ;;  %v5970_v35 = vld [vmem:[%s7741_s2 + $0x2d0] sm:$0xff]   ;;  %v5976_v41 = vld [vmem:[%s7741_s2 + $0x260] sm:$0xff]  }
  0x23   :  { %5315 = vmatpush3.bf16.msra.mxu0 %v5927_v40  ;;  %3629 = vmatmul.mubr.bf16.vlgmr.msra.gmra.mrb[0].mxu1 %v910_v49  ;;  %v5975_v40 = vld [vmem:[%s7741_s2 + $0x298] sm:$0xff]   ;;  %v5983_v49 = vld [vmem:[%s7741_s2 + $0x2a8] sm:$0xff]  }
  0x24   :  { %5344 = vmatprep.subr.bf16.mxu0 %v5930_v44  ;;  %5323 = vmatpush3.bf16.msra.mxu1 %v5929_v51  ;;  %v5979_v44 = vld [vmem:[%s7741_s2 + $0x2a0] sm:$0xff]   ;;  %v5985_v51 = vld [vmem:[%s7741_s2 + $0x230] sm:$0xff]  }
  0x25   :  { %5324 = vmatprep.subr.bf16.mxu1 %v5932_v56  ;;  %3708 = vmatprep.mubr.bf16.mxu1 %v931_v54  ;;  %v943_v54 = vrot.slane %v40_v52, %v6482_v45  ;;  %v5987_v56 = vld [vmem:[%s7741_s2 + $0x2b0] sm:$0xff]  }
  0x26   :  { %3669 = vmatmul.mubr.bf16.vlgmr.msra.gmra.mrb[4].mxu0 %v932_v55  ;;  %v936_v55 = vcombine.high %v40_v52, %v40_v52  ;;  %v6035_v52 = vld [vmem:[%s7741_s2 + $0x4d0] sm:$0xff]  }
  0x27   :  { %5345 = vmatpush3.bf16.msra.mxu0 %v5931_v53  ;;  %3748 = vmatprep.mubr.bf16.mxu0 %v935_v60  ;;  %v5986_v53 = vld [vmem:[%s7741_s2 + $0x2f0] sm:$0xff]   ;;  %v5989_v60 = vld [vmem:[%s7741_s2 + $0x238] sm:$0xff]  }
  0x28   :  { %5346 = vmatprep.subr.bf16.mxu0 %v5934_v59  ;;  %5325 = vmatpush3.bf16.msra.mxu1 %v5933_v58  ;;  %v951_v58 = vcombine.high %v943_v54, %v943_v54  ;;  %v6677_v59 = vrot.slane %v936_v55, %v6482_v45  ;;  %v6038_v55 = vld [vmem:[%s7741_s2 + $0x418] sm:$0xff]  }
  0x29   :  { %5326 = vmatprep.subr.bf16.mxu1 %v5936_v62 }
  0x2a   :  { %v973_v62 = vrot.slane %v951_v58, %v6482_v45  ;;  %v6041_v58 = vld [vmem:[%s7741_s2 + $0x460] sm:$0xff]  }
  0x2b   :  { %5347 = vmatpush3.bf16.msra.mxu0 %v5935_v61  ;;  %v5990_v61 = vld [vmem:[%s7741_s2 + $0x2f8] sm:$0xff]  }
  0x2c   :  { %5348 = vmatprep.subr.bf16.mxu0 %v5938_v1  ;;  %5327 = vmatpush3.bf16.msra.mxu1 %v5937_v63  ;;  %v952_v63 = vcombine.high %v6677_v59, %v6677_v59  ;;  %v5991_v1 = vld [vmem:[%s7741_s2 + $0x2b8] sm:$0xff]  }
  0x2d   :  { %5328 = vmatprep.subr.bf16.mxu1 %v5940_v3  ;;  %v5992_v3 = vld [vmem:[%s7741_s2 + $0x340] sm:$0xff]  }
  0x2f   :  { %5349 = vmatpush3.bf16.msra.mxu0 %v5939_v2  ;;  %v959_v2 = vrot.slane %v943_v54, %v6482_v45  ;;  %v6037_v54 = vld [vmem:[%s7741_s2 + $0x458] sm:$0xff]  }
  0x30   :  { %5350 = vmatprep.subr.bf16.mxu0 %v5942_v5  ;;  %5329 = vmatpush3.bf16.msra.mxu1 %v5941_v4  ;;  %v983_v4 = vcombine.high %v973_v62, %v973_v62  ;;  %v5993_v5 = vld [vmem:[%s7741_s2 + $0x300] sm:$0xff]  }
  0x31   :  { %5330 = vmatprep.subr.bf16.mxu1 %v5944_v7  ;;  %v5994_v7 = vld [vmem:[%s7741_s2 + $0x3c0] sm:$0xff]  }
  0x33   :  { %5351 = vmatpush3.bf16.msra.mxu0 %v5943_v6  ;;  %v980_v6 = vrot.slane %v952_v63, %v6482_v45  ;;  %v6046_v63 = vld [vmem:[%s7741_s2 + $0x428] sm:$0xff]  }
  0x34   :  { %5352 = vmatprep.subr.bf16.mxu0 %v5946_v9  ;;  %5331 = vmatpush3.bf16.msra.mxu1 %v5945_v8  ;;  %v5995_v8 = vld [vmem:[%s7741_s2 + $0x380] sm:$0xff]   ;;  %v981_v9 = vcombine.high %v959_v2, %v959_v2 }
  0x35   :  { %5332 = vmatprep.subr.bf16.mxu1 %v5948_v11  ;;  %v5997_v11 = vld [vmem:[%s7741_s2 + $0x308] sm:$0xff]  }
  0x37   :  { %5353 = vmatpush3.bf16.msra.mxu0 %v5947_v10  ;;  %v5996_v10 = vld [vmem:[%s7741_s2 + $0x348] sm:$0xff]  }
  0x38   :  { %5354 = vmatprep.subr.bf16.mxu0 %v5950_v13  ;;  %5333 = vmatpush3.bf16.msra.mxu1 %v5949_v12  ;;  %v984_v12 = vcombine.high %v980_v6, %v980_v6  ;;  %v5998_v13 = vld [vmem:[%s7741_s2 + $0x3c8] sm:$0xff]  }
  0x39   :  { %5334 = vmatprep.subr.bf16.mxu1 %v5952_v15  ;;  %v6000_v15 = vld [vmem:[%s7741_s2 + $0x350] sm:$0xff]  }
  0x3b   :  { %5355 = vmatpush3.bf16.msra.mxu0 %v5951_v14  ;;  %v5999_v14 = vld [vmem:[%s7741_s2 + $0x388] sm:$0xff]  }
  0x3c   :  { %5356 = vmatprep.subr.bf16.mxu0 %v5954_v17  ;;  %5335 = vmatpush3.bf16.msra.mxu1 %v5953_v16  ;;  %v6001_v16 = vld [vmem:[%s7741_s2 + $0x310] sm:$0xff]  }
  0x3d   :  { %5336 = vmatprep.subr.bf16.mxu1 %v5956_v19  ;;  %v6002_v17 = vld [vmem:[%s7741_s2 + $0x3d0] sm:$0xff]   ;;  %v6004_v19 = vld [vmem:[%s7741_s2 + $0x358] sm:$0xff]  }
  0x3f   :  { %5357 = vmatpush3.bf16.msra.mxu0 %v5955_v18  ;;  %v6003_v18 = vld [vmem:[%s7741_s2 + $0x390] sm:$0xff]  }
  0x40   :  { %5358 = vmatprep.subr.bf16.mxu0 %v5958_v21  ;;  %5337 = vmatpush3.bf16.msra.mxu1 %v5957_v20  ;;  %v6005_v20 = vld [vmem:[%s7741_s2 + $0x318] sm:$0xff]  }
  0x41   :  { %5366 = vmatprep.subr.bf16.mxu1 %v5960_v24  ;;  %v6006_v21 = vld [vmem:[%s7741_s2 + $0x3d8] sm:$0xff]   ;;  %v6009_v24 = vld [vmem:[%s7741_s2 + $0x320] sm:$0xff]  }
  0x43   :  { %5359 = vmatpush3.bf16.msra.mxu0 %v5959_v22  ;;  %3709 = vmatmul.mubr.bf16.vlgmr.msra.gmra.mrb[4].mxu1 %v917_v23  ;;  %v6007_v22 = vld [vmem:[%s7741_s2 + $0x398] sm:$0xff]   ;;  %v6008_v23 = vld [vmem:[%s7741_s2 + $0x360] sm:$0xff]  }
  0x44   :  { %5388 = vmatprep.subr.bf16.mxu0 %v5962_v26  ;;  %5367 = vmatpush3.bf16.msra.mxu1 %v5961_v25  ;;  %v6010_v25 = vld [vmem:[%s7741_s2 + $0x3e0] sm:$0xff]  }
  0x45   :  { %5368 = vmatprep.subr.bf16.mxu1 %v5964_v29  ;;  %3788 = vmatprep.mubr.bf16.mxu1 %v973_v62  ;;  %v6011_v26 = vld [vmem:[%s7741_s2 + $0x3a0] sm:$0xff]   ;;  %v6014_v29 = vld [vmem:[%s7741_s2 + $0x3e8] sm:$0xff]  }
  0x46   :  { %3749 = vmatmul.mubr.bf16.vlgmr.msra.gmra.mrb[8].mxu0 %v933_v28  ;;  %v6013_v28 = vld [vmem:[%s7741_s2 + $0x328] sm:$0xff]  }
  0x47   :  { %5389 = vmatpush3.bf16.msra.mxu0 %v5963_v27  ;;  %3828 = vmatprep.mubr.bf16.mxu0 %v983_v4  ;;  %v6012_v27 = vld [vmem:[%s7741_s2 + $0x368] sm:$0xff]   ;;  %v6050_v4 = vld [vmem:[%s7741_s2 + $0x430] sm:$0xff]  }
  0x48   :  { %5390 = vmatprep.subr.bf16.mxu0 %v5966_v31  ;;  %5369 = vmatpush3.bf16.msra.mxu1 %v5965_v30  ;;  %v6015_v30 = vld [vmem:[%s7741_s2 + $0x3a8] sm:$0xff]   ;;  %v6016_v31 = vld [vmem:[%s7741_s2 + $0x370] sm:$0xff]  }
  0x49   :  { %5370 = vmatprep.subr.bf16.mxu1 %v5968_v33  ;;  %v6018_v33 = vld [vmem:[%s7741_s2 + $0x3f0] sm:$0xff]   ;;  %v6045_v62 = vld [vmem:[%s7741_s2 + $0x468] sm:$0xff]  }
  0x4b   :  { %5391 = vmatpush3.bf16.msra.mxu0 %v5967_v32  ;;  %v6017_v32 = vld [vmem:[%s7741_s2 + $0x330] sm:$0xff]  }
  0x4c   :  { %5392 = vmatprep.subr.bf16.mxu0 %v5970_v35  ;;  %5371 = vmatpush3.bf16.msra.mxu1 %v5969_v34  ;;  %v6019_v34 = vld [vmem:[%s7741_s2 + $0x3b0] sm:$0xff]   ;;  %v6020_v35 = vld [vmem:[%s7741_s2 + $0x378] sm:$0xff]  }
  0x4d   :  { %5372 = vmatprep.subr.bf16.mxu1 %v5972_v37  ;;  %v6022_v37 = vld [vmem:[%s7741_s2 + $0x3f8] sm:$0xff]  }
  0x4f   :  { %5393 = vmatpush3.bf16.msra.mxu0 %v5971_v36  ;;  %v6021_v36 = vld [vmem:[%s7741_s2 + $0x338] sm:$0xff]  }
  0x50   :  { %5394 = vmatprep.subr.bf16.mxu0 %v5974_v39  ;;  %5373 = vmatpush3.bf16.msra.mxu1 %v5973_v38  ;;  %v6024_v38 = vld [vmem:[%s7741_s2 + $0x3b8] sm:$0xff]   ;;  %v966_v39 = vrot.slane %v6677_v59, %v6482_v45  ;;  %v6042_v59 = vld [vmem:[%s7741_s2 + $0x420] sm:$0xff]  }
  0x51   :  { %5374 = vmatprep.subr.bf16.mxu1 %v5976_v41  ;;  %v6026_v41 = vld [vmem:[%s7741_s2 + $0x400] sm:$0xff]  }
  0x53   :  { %5395 = vmatpush3.bf16.msra.mxu0 %v5975_v40  ;;  %v6025_v40 = vld [vmem:[%s7741_s2 + $0x440] sm:$0xff]  }
  0x54   :  { %5396 = vmatprep.subr.bf16.mxu0 %v5978_v43  ;;  %5375 = vmatpush3.bf16.msra.mxu1 %v5977_v42  ;;  %v6027_v42 = vld [vmem:[%s7741_s2 + $0x4c0] sm:$0xff]  }
  0x55   :  { %5376 = vmatprep.subr.bf16.mxu1 %v5980_v46  ;;  %v6028_v43 = vld [vmem:[%s7741_s2 + $0x480] sm:$0xff]   ;;  %v6029_v46 = vld [vmem:[%s7741_s2 + $0x448] sm:$0xff]  }
  0x57   :  { %5397 = vmatpush3.bf16.msra.mxu0 %v5979_v44  ;;  %v982_v44 = vcombine.high %v966_v39, %v966_v39 }
  0x58   :  { %5398 = vmatprep.subr.bf16.mxu0 %v5982_v48  ;;  %5377 = vmatpush3.bf16.msra.mxu1 %v5981_v47  ;;  %v6030_v47 = vld [vmem:[%s7741_s2 + $0x408] sm:$0xff]  }
  0x59   :  { %5378 = vmatprep.subr.bf16.mxu1 %v5984_v50  ;;  %v6031_v48 = vld [vmem:[%s7741_s2 + $0x4c8] sm:$0xff]   ;;  %v6033_v50 = vld [vmem:[%s7741_s2 + $0x450] sm:$0xff]  }
  0x5b   :  { %5399 = vmatpush3.bf16.msra.mxu0 %v5983_v49  ;;  %v6032_v49 = vld [vmem:[%s7741_s2 + $0x488] sm:$0xff]  }
  0x5c   :  { %5400 = vmatprep.subr.bf16.mxu0 %v5986_v53  ;;  %5379 = vmatpush3.bf16.msra.mxu1 %v5985_v51  ;;  %v6034_v51 = vld [vmem:[%s7741_s2 + $0x410] sm:$0xff]  }
  0x5d   :  { %5380 = vmatprep.subr.bf16.mxu1 %v5988_v57  ;;  %v6036_v53 = vld [vmem:[%s7741_s2 + $0x490] sm:$0xff]   ;;  %v6040_v57 = vld [vmem:[%s7741_s2 + $0x498] sm:$0xff]  }
  0x5f   :  { %5401 = vmatpush3.bf16.msra.mxu0 %v5987_v56  ;;  %v6039_v56 = vld [vmem:[%s7741_s2 + $0x4d8] sm:$0xff]  }
  0x60   :  { %5402 = vmatprep.subr.bf16.mxu0 %v5990_v61  ;;  %5381 = vmatpush3.bf16.msra.mxu1 %v5989_v60  ;;  %v6043_v60 = vld [vmem:[%s7741_s2 + $0x4e0] sm:$0xff]  }
  0x61   :  { %5410 = vmatprep.subr.bf16.mxu1 %v5992_v3  ;;  %v6044_v61 = vld [vmem:[%s7741_s2 + $0x4a0] sm:$0xff]   ;;  %v6049_v3 = vld [vmem:[%s7741_s2 + $0x470] sm:$0xff]  }
  0x63   :  { %5403 = vmatpush3.bf16.msra.mxu0 %v5991_v1  ;;  %3789 = vmatmul.mubr.bf16.vlgmr.msra.gmra.mrb[8].mxu1 %v959_v2  ;;  %v6047_v1 = vld [vmem:[%s7741_s2 + $0x4e8] sm:$0xff]  }
  0x64   :  { %5432 = vmatprep.subr.bf16.mxu0 %v5994_v7  ;;  %5411 = vmatpush3.bf16.msra.mxu1 %v5993_v5  ;;  %v6048_v2 = vld [vmem:[%s7741_s2 + $0x4a8] sm:$0xff]   ;;  %v41_v5 = vld [vmem:[%s7743_s0 + $0x10] sm:$0xff] }
  0x65   :  { %3868 = vmatprep.mubr.bf16.mxu1 %v980_v6  ;;  %5412 = vmatprep.subr.bf16.mxu1 %v5996_v10  ;;  %v6051_v6 = vld [vmem:[%s7741_s2 + $0x4f0] sm:$0xff]   ;;  %v992_v7 = vrot.slane %v41_v5, %v6482_v45  ;;  %v6053_v10 = vld [vmem:[%s7741_s2 + $0x478] sm:$0xff]  }
  0x66   :  { %3829 = vmatmul.mubr.bf16.vlgmr.msra.gmra.mrb[12].mxu0 %v981_v9  ;;  %v6052_v9 = vld [vmem:[%s7741_s2 + $0x4b0] sm:$0xff]  }
  0x67   :  { %5433 = vmatpush3.bf16.msra.mxu0 %v5995_v8  ;;  %3908 = vmatprep.mubr.bf16.mxu0 %v984_v12  ;;  %v985_v8 = vcombine.high %v41_v5, %v41_v5  ;;  %v6100_v5 = vld [vmem:[%s7741_s2 + $0x6d0] sm:$0xff]  }
  0x68   :  { %5434 = vmatprep.subr.bf16.mxu0 %v5998_v13  ;;  %5413 = vmatpush3.bf16.msra.mxu1 %v5997_v11  ;;  %v1000_v11 = vcombine.high %v992_v7, %v992_v7  ;;  %v6054_v13 = vld [vmem:[%s7741_s2 + $0x438] sm:$0xff]  }
  0x69   :  { %5414 = vmatprep.subr.bf16.mxu1 %v6000_v15  ;;  %v6883_v12 = vrot.slane %v985_v8, %v6482_v45  ;;  %v6103_v8 = vld [vmem:[%s7741_s2 + $0x618] sm:$0xff]  }
  0x6a   :  { %v1022_v15 = vrot.slane %v1000_v11, %v6482_v45  ;;  %v6106_v11 = vld [vmem:[%s7741_s2 + $0x660] sm:$0xff]  }
  0x6b   :  { %5435 = vmatpush3.bf16.msra.mxu0 %v5999_v14  ;;  %v6055_v14 = vld [vmem:[%s7741_s2 + $0x4f8] sm:$0xff]  }
  0x6c   :  { %5436 = vmatprep.subr.bf16.mxu0 %v6002_v17  ;;  %5415 = vmatpush3.bf16.msra.mxu1 %v6001_v16  ;;  %v1001_v16 = vcombine.high %v6883_v12, %v6883_v12  ;;  %v6056_v17 = vld [vmem:[%s7741_s2 + $0x4b8] sm:$0xff]  }
  0x6d   :  { %5416 = vmatprep.subr.bf16.mxu1 %v6004_v19  ;;  %v6057_v19 = vld [vmem:[%s7741_s2 + $0x540] sm:$0xff]  }
  0x6f   :  { %5437 = vmatpush3.bf16.msra.mxu0 %v6003_v18  ;;  %v1008_v18 = vrot.slane %v992_v7, %v6482_v45  ;;  %v6102_v7 = vld [vmem:[%s7741_s2 + $0x658] sm:$0xff]  }
  0x70   :  { %5438 = vmatprep.subr.bf16.mxu0 %v6006_v21  ;;  %5417 = vmatpush3.bf16.msra.mxu1 %v6005_v20  ;;  %v1032_v20 = vcombine.high %v1022_v15, %v1022_v15  ;;  %v6058_v21 = vld [vmem:[%s7741_s2 + $0x500] sm:$0xff]  }
  0x71   :  { %5418 = vmatprep.subr.bf16.mxu1 %v6008_v23  ;;  %v6059_v23 = vld [vmem:[%s7741_s2 + $0x5c0] sm:$0xff]  }
  0x73   :  { %5439 = vmatpush3.bf16.msra.mxu0 %v6007_v22  ;;  %v1029_v22 = vrot.slane %v1001_v16, %v6482_v45  ;;  %v6109_v16 = vld [vmem:[%s7741_s2 + $0x6a0] sm:$0xff]  }
  0x74   :  { %5440 = vmatprep.subr.bf16.mxu0 %v6010_v25  ;;  %5419 = vmatpush3.bf16.msra.mxu1 %v6009_v24  ;;  %v6060_v24 = vld [vmem:[%s7741_s2 + $0x580] sm:$0xff]   ;;  %v1030_v25 = vcombine.high %v1008_v18, %v1008_v18 }
  0x75   :  { %5420 = vmatprep.subr.bf16.mxu1 %v6012_v27  ;;  %v6062_v27 = vld [vmem:[%s7741_s2 + $0x508] sm:$0xff]  }
  0x77   :  { %5441 = vmatpush3.bf16.msra.mxu0 %v6011_v26  ;;  %v6061_v26 = vld [vmem:[%s7741_s2 + $0x548] sm:$0xff]  }
  0x78   :  { %5442 = vmatprep.subr.bf16.mxu0 %v6014_v29  ;;  %5421 = vmatpush3.bf16.msra.mxu1 %v6013_v28  ;;  %v1033_v28 = vcombine.high %v1029_v22, %v1029_v22  ;;  %v6063_v29 = vld [vmem:[%s7741_s2 + $0x5c8] sm:$0xff]  }
  0x79   :  { %5422 = vmatprep.subr.bf16.mxu1 %v6016_v31  ;;  %v6065_v31 = vld [vmem:[%s7741_s2 + $0x550] sm:$0xff]  }
  0x7b   :  { %5443 = vmatpush3.bf16.msra.mxu0 %v6015_v30  ;;  %v6064_v30 = vld [vmem:[%s7741_s2 + $0x588] sm:$0xff]  }
  0x7c   :  { %5444 = vmatprep.subr.bf16.mxu0 %v6018_v33  ;;  %5423 = vmatpush3.bf16.msra.mxu1 %v6017_v32  ;;  %v6066_v32 = vld [vmem:[%s7741_s2 + $0x510] sm:$0xff]  }
  0x7d   :  { %5424 = vmatprep.subr.bf16.mxu1 %v6020_v35  ;;  %v6067_v33 = vld [vmem:[%s7741_s2 + $0x5d0] sm:$0xff]   ;;  %v6069_v35 = vld [vmem:[%s7741_s2 + $0x558] sm:$0xff]  }
  0x7f   :  { %5445 = vmatpush3.bf16.msra.mxu0 %v6019_v34  ;;  %v6068_v34 = vld [vmem:[%s7741_s2 + $0x590] sm:$0xff]  }
  0x80   :  { %5446 = vmatprep.subr.bf16.mxu0 %v6022_v37  ;;  %5425 = vmatpush3.bf16.msra.mxu1 %v6021_v36  ;;  %v6070_v36 = vld [vmem:[%s7741_s2 + $0x518] sm:$0xff]  }
  0x81   :  { %5454 = vmatprep.subr.bf16.mxu1 %v6025_v40  ;;  %v6071_v37 = vld [vmem:[%s7741_s2 + $0x5d8] sm:$0xff]   ;;  %v6074_v40 = vld [vmem:[%s7741_s2 + $0x520] sm:$0xff]  }
  0x83   :  { %5447 = vmatpush3.bf16.msra.mxu0 %v6024_v38  ;;  %3869 = vmatmul.mubr.bf16.vlgmr.msra.gmra.mrb[12].mxu1 %v966_v39  ;;  %v6072_v38 = vld [vmem:[%s7741_s2 + $0x598] sm:$0xff]   ;;  %v6073_v39 = vld [vmem:[%s7741_s2 + $0x560] sm:$0xff]  }
  0x84   :  { %5476 = vmatprep.subr.bf16.mxu0 %v6027_v42  ;;  %5455 = vmatpush3.bf16.msra.mxu1 %v6026_v41  ;;  %v6075_v41 = vld [vmem:[%s7741_s2 + $0x5e0] sm:$0xff]  }
  0x85   :  { %5456 = vmatprep.subr.bf16.mxu1 %v6029_v46  ;;  %3948 = vmatprep.mubr.bf16.mxu1 %v1022_v15  ;;  %v6076_v42 = vld [vmem:[%s7741_s2 + $0x5a0] sm:$0xff]   ;;  %v6079_v46 = vld [vmem:[%s7741_s2 + $0x5e8] sm:$0xff]  }
  0x86   :  { %3909 = vmatmul.mubr.bf16.vlgmr.msra.gmra.mrb[16].mxu0 %v982_v44  ;;  %v6078_v44 = vld [vmem:[%s7741_s2 + $0x528] sm:$0xff]  }
  0x87   :  { %5477 = vmatpush3.bf16.msra.mxu0 %v6028_v43  ;;  %3988 = vmatprep.mubr.bf16.mxu0 %v1032_v20  ;;  %v6077_v43 = vld [vmem:[%s7741_s2 + $0x568] sm:$0xff]  }
  0x88   :  { %5478 = vmatprep.subr.bf16.mxu0 %v6031_v48  ;;  %5457 = vmatpush3.bf16.msra.mxu1 %v6030_v47  ;;  %v6080_v47 = vld [vmem:[%s7741_s2 + $0x5a8] sm:$0xff]   ;;  %v6081_v48 = vld [vmem:[%s7741_s2 + $0x570] sm:$0xff]  }
  0x89   :  { %5458 = vmatprep.subr.bf16.mxu1 %v6033_v50  ;;  %v6083_v50 = vld [vmem:[%s7741_s2 + $0x5f0] sm:$0xff]   ;;  %v6111_v20 = vld [vmem:[%s7741_s2 + $0x628] sm:$0xff]  }
  0x8b   :  { %5479 = vmatpush3.bf16.msra.mxu0 %v6032_v49  ;;  %v6082_v49 = vld [vmem:[%s7741_s2 + $0x530] sm:$0xff]  }
  0x8c   :  { %5480 = vmatprep.subr.bf16.mxu0 %v6035_v52  ;;  %5459 = vmatpush3.bf16.msra.mxu1 %v6034_v51  ;;  %v6084_v51 = vld [vmem:[%s7741_s2 + $0x5b0] sm:$0xff]   ;;  %v6085_v52 = vld [vmem:[%s7741_s2 + $0x578] sm:$0xff]  }
  0x8d   :  { %5460 = vmatprep.subr.bf16.mxu1 %v6037_v54  ;;  %v6087_v54 = vld [vmem:[%s7741_s2 + $0x5f8] sm:$0xff]  }
  0x8f   :  { %5481 = vmatpush3.bf16.msra.mxu0 %v6036_v53  ;;  %v6086_v53 = vld [vmem:[%s7741_s2 + $0x538] sm:$0xff]  }
  0x90   :  { %5482 = vmatprep.subr.bf16.mxu0 %v6039_v56  ;;  %5461 = vmatpush3.bf16.msra.mxu1 %v6038_v55  ;;  %v6089_v55 = vld [vmem:[%s7741_s2 + $0x5b8] sm:$0xff]   ;;  %v1015_v56 = vrot.slane %v6883_v12, %v6482_v45  ;;  %v6107_v12 = vld [vmem:[%s7741_s2 + $0x620] sm:$0xff]  }
  0x91   :  { %5462 = vmatprep.subr.bf16.mxu1 %v6041_v58  ;;  %v6091_v58 = vld [vmem:[%s7741_s2 + $0x600] sm:$0xff]  }
  0x93   :  { %5483 = vmatpush3.bf16.msra.mxu0 %v6040_v57  ;;  %v6090_v57 = vld [vmem:[%s7741_s2 + $0x640] sm:$0xff]  }
  0x94   :  { %5484 = vmatprep.subr.bf16.mxu0 %v6043_v60  ;;  %5463 = vmatpush3.bf16.msra.mxu1 %v6042_v59  ;;  %v6092_v59 = vld [vmem:[%s7741_s2 + $0x6c0] sm:$0xff]  }
  0x95   :  { %5464 = vmatprep.subr.bf16.mxu1 %v6045_v62  ;;  %v6093_v60 = vld [vmem:[%s7741_s2 + $0x680] sm:$0xff]   ;;  %v6094_v62 = vld [vmem:[%s7741_s2 + $0x648] sm:$0xff]  }
  0x97   :  { %5485 = vmatpush3.bf16.msra.mxu0 %v6044_v61  ;;  %v1031_v61 = vcombine.high %v1015_v56, %v1015_v56 }
  0x98   :  { %5486 = vmatprep.subr.bf16.mxu0 %v6047_v1  ;;  %5465 = vmatpush3.bf16.msra.mxu1 %v6046_v63  ;;  %v6095_v63 = vld [vmem:[%s7741_s2 + $0x608] sm:$0xff]  }
  0x99   :  { %5466 = vmatprep.subr.bf16.mxu1 %v6049_v3  ;;  %v6096_v1 = vld [vmem:[%s7741_s2 + $0x6c8] sm:$0xff]   ;;  %v6098_v3 = vld [vmem:[%s7741_s2 + $0x650] sm:$0xff]  }
  0x9b   :  { %5487 = vmatpush3.bf16.msra.mxu0 %v6048_v2  ;;  %v6097_v2 = vld [vmem:[%s7741_s2 + $0x688] sm:$0xff]  }
  0x9c   :  { %5488 = vmatprep.subr.bf16.mxu0 %v6051_v6  ;;  %5467 = vmatpush3.bf16.msra.mxu1 %v6050_v4  ;;  %v6099_v4 = vld [vmem:[%s7741_s2 + $0x610] sm:$0xff]  }
  0x9d   :  { %5468 = vmatprep.subr.bf16.mxu1 %v6053_v10  ;;  %v6101_v6 = vld [vmem:[%s7741_s2 + $0x690] sm:$0xff]   ;;  %v6105_v10 = vld [vmem:[%s7741_s2 + $0x698] sm:$0xff]  }
  0x9f   :  { %5489 = vmatpush3.bf16.msra.mxu0 %v6052_v9  ;;  %v6104_v9 = vld [vmem:[%s7741_s2 + $0x6d8] sm:$0xff]  }
  0xa0   :  { %5490 = vmatprep.subr.bf16.mxu0 %v6055_v14  ;;  %5469 = vmatpush3.bf16.msra.mxu1 %v6054_v13  ;;  %v6108_v14 = vld [vmem:[%s7741_s2 + $0x6e0] sm:$0xff]  }
  0xa1   :  { %5498 = vmatprep.subr.bf16.mxu1 %v6057_v19 }
  0xa3   :  { %5491 = vmatpush3.bf16.msra.mxu0 %v6056_v17  ;;  %3949 = vmatmul.mubr.bf16.vlgmr.msra.gmra.mrb[16].mxu1 %v1008_v18  ;;  %v6110_v18 = vld [vmem:[%s7741_s2 + $0x668] sm:$0xff]  }
  0xa4   :  { %5520 = vmatprep.subr.bf16.mxu0 %v6059_v23  ;;  %5499 = vmatpush3.bf16.msra.mxu1 %v6058_v21  ;;  %v6112_v21 = vld [vmem:[%s7741_s2 + $0x6e8] sm:$0xff]   ;;  %v6114_v23 = vld [vmem:[%s7741_s2 + $0x670] sm:$0xff]  }
  0xa5   :  { %4028 = vmatprep.mubr.bf16.mxu1 %v1029_v22  ;;  %5500 = vmatprep.subr.bf16.mxu1 %v6061_v26  ;;  %v6113_v22 = vld [vmem:[%s7741_s2 + $0x6a8] sm:$0xff]   ;;  %v6116_v26 = vld [vmem:[%s7741_s2 + $0x6f0] sm:$0xff]  }
  0xa6   :  { %3989 = vmatmul.mubr.bf16.vlgmr.msra.gmra.mrb[20].mxu0 %v1030_v25  ;;  %v42_v25 = vld [vmem:[%s7743_s0 + $0x18] sm:$0xff] }
  0xa7   :  { %5521 = vmatpush3.bf16.msra.mxu0 %v6060_v24  ;;  %4068 = vmatprep.mubr.bf16.mxu0 %v1033_v28  ;;  %v6115_v24 = vld [vmem:[%s7741_s2 + $0x630] sm:$0xff]   ;;  %v1034_v28 = vcombine.high %v42_v25, %v42_v25 }
  0xa8   :  { %5522 = vmatprep.subr.bf16.mxu0 %v6063_v29  ;;  %5501 = vmatpush3.bf16.msra.mxu1 %v6062_v27  ;;  %v1041_v27 = vrot.slane %v42_v25, %v6482_v45  ;;  %v6117_v29 = vld [vmem:[%s7741_s2 + $0x6b0] sm:$0xff]  }
  0xa9   :  { %5502 = vmatprep.subr.bf16.mxu1 %v6065_v31 }
  0xaa   :  { %v1049_v31 = vcombine.high %v1041_v27, %v1041_v27 }
  0xab   :  { %5523 = vmatpush3.bf16.msra.mxu0 %v6064_v30  ;;  %v6118_v30 = vld [vmem:[%s7741_s2 + $0x678] sm:$0xff]  }
  0xac   :  { %5524 = vmatprep.subr.bf16.mxu0 %v6067_v33  ;;  %5503 = vmatpush3.bf16.msra.mxu1 %v6066_v32  ;;  %v7091_v32 = vrot.slane %v1034_v28, %v6482_v45  ;;  %v6119_v33 = vld [vmem:[%s7741_s2 + $0x638] sm:$0xff]   ;;  %v6157_v28 = vld [vmem:[%s7741_s2 + $0x8c0] sm:$0xff]  }
  0xad   :  { %5504 = vmatprep.subr.bf16.mxu1 %v6069_v35  ;;  %v1071_v35 = vrot.slane %v1049_v31, %v6482_v45  ;;  %v6159_v31 = vld [vmem:[%s7741_s2 + $0x848] sm:$0xff]  }
  0xae   :  { %v1064_v25 = vrot.slane %v7091_v32, %v6482_v45 }
  0xaf   :  { %5525 = vmatpush3.bf16.msra.mxu0 %v6068_v34  ;;  %v6120_v34 = vld [vmem:[%s7741_s2 + $0x6f8] sm:$0xff]  }
  0xb0   :  { %5526 = vmatprep.subr.bf16.mxu0 %v6071_v37  ;;  %5505 = vmatpush3.bf16.msra.mxu1 %v6070_v36  ;;  %v1050_v36 = vcombine.high %v7091_v32, %v7091_v32  ;;  %v6121_v37 = vld [vmem:[%s7741_s2 + $0x6b8] sm:$0xff]   ;;  %v6160_v32 = vld [vmem:[%s7741_s2 + $0x808] sm:$0xff]  }
  0xb1   :  { %5506 = vmatprep.subr.bf16.mxu1 %v6073_v39  ;;  %v6122_v39 = vld [vmem:[%s7741_s2 + $0x740] sm:$0xff]  }
  0xb3   :  { %5527 = vmatpush3.bf16.msra.mxu0 %v6072_v38  ;;  %v1057_v38 = vrot.slane %v1041_v27, %v6482_v45  ;;  %v6156_v27 = vld [vmem:[%s7741_s2 + $0x800] sm:$0xff]  }
  0xb4   :  { %5528 = vmatprep.subr.bf16.mxu0 %v6075_v41  ;;  %5507 = vmatpush3.bf16.msra.mxu1 %v6074_v40  ;;  %v1081_v40 = vcombine.high %v1071_v35, %v1071_v35  ;;  %v6123_v41 = vld [vmem:[%s7741_s2 + $0x700] sm:$0xff]  }
  0xb5   :  { %5508 = vmatprep.subr.bf16.mxu1 %v6077_v43  ;;  %v6124_v43 = vld [vmem:[%s7741_s2 + $0x7c0] sm:$0xff]  }
  0xb7   :  { %5529 = vmatpush3.bf16.msra.mxu0 %v6076_v42  ;;  %v1078_v42 = vrot.slane %v1050_v36, %v6482_v45  ;;  %v6164_v36 = vld [vmem:[%s7741_s2 + $0x810] sm:$0xff]  }
  0xb8   :  { %5530 = vmatprep.subr.bf16.mxu0 %v6079_v46  ;;  %5509 = vmatpush3.bf16.msra.mxu1 %v6078_v44  ;;  %v6125_v44 = vld [vmem:[%s7741_s2 + $0x780] sm:$0xff]   ;;  %v1079_v46 = vcombine.high %v1057_v38, %v1057_v38 }
  0xb9   :  { %5510 = vmatprep.subr.bf16.mxu1 %v6081_v48  ;;  %v6127_v48 = vld [vmem:[%s7741_s2 + $0x708] sm:$0xff]  }
  0xbb   :  { %5531 = vmatpush3.bf16.msra.mxu0 %v6080_v47  ;;  %v6126_v47 = vld [vmem:[%s7741_s2 + $0x748] sm:$0xff]  }
  0xbc   :  { %5532 = vmatprep.subr.bf16.mxu0 %v6083_v50  ;;  %5511 = vmatpush3.bf16.msra.mxu1 %v6082_v49  ;;  %v1082_v49 = vcombine.high %v1078_v42, %v1078_v42  ;;  %v6128_v50 = vld [vmem:[%s7741_s2 + $0x7c8] sm:$0xff]  }
  0xbd   :  { %5512 = vmatprep.subr.bf16.mxu1 %v6085_v52  ;;  %v6130_v52 = vld [vmem:[%s7741_s2 + $0x750] sm:$0xff]  }
  0xbf   :  { %5533 = vmatpush3.bf16.msra.mxu0 %v6084_v51  ;;  %v6129_v51 = vld [vmem:[%s7741_s2 + $0x788] sm:$0xff]  }
  0xc0   :  { %5534 = vmatprep.subr.bf16.mxu0 %v6087_v54  ;;  %5513 = vmatpush3.bf16.msra.mxu1 %v6086_v53  ;;  %v6131_v53 = vld [vmem:[%s7741_s2 + $0x710] sm:$0xff]  }
  0xc1   :  { %5542 = vmatprep.subr.bf16.mxu1 %v6090_v57  ;;  %v6132_v54 = vld [vmem:[%s7741_s2 + $0x7d0] sm:$0xff]   ;;  %v6135_v57 = vld [vmem:[%s7741_s2 + $0x718] sm:$0xff]  }
  0xc3   :  { %5535 = vmatpush3.bf16.msra.mxu0 %v6089_v55  ;;  %4029 = vmatmul.mubr.bf16.vlgmr.msra.gmra.mrb[20].mxu1 %v1015_v56  ;;  %v6133_v55 = vld [vmem:[%s7741_s2 + $0x790] sm:$0xff]   ;;  %v6134_v56 = vld [vmem:[%s7741_s2 + $0x758] sm:$0xff]  }
  0xc4   :  { %5564 = vmatprep.subr.bf16.mxu0 %v6092_v59  ;;  %5543 = vmatpush3.bf16.msra.mxu1 %v6091_v58  ;;  %v6136_v58 = vld [vmem:[%s7741_s2 + $0x7d8] sm:$0xff]  }
  0xc5   :  { %5544 = vmatprep.subr.bf16.mxu1 %v6094_v62  ;;  %4108 = vmatprep.mubr.bf16.mxu1 %v1071_v35  ;;  %v6137_v59 = vld [vmem:[%s7741_s2 + $0x798] sm:$0xff]   ;;  %v6140_v62 = vld [vmem:[%s7741_s2 + $0x7e0] sm:$0xff]   ;;  %v6163_v35 = vld [vmem:[%s7741_s2 + $0x850] sm:$0xff]  }
  0xc6   :  { %4069 = vmatmul.mubr.bf16.vlgmr.msra.gmra.mrb[24].mxu0 %v1031_v61  ;;  %v6139_v61 = vld [vmem:[%s7741_s2 + $0x720] sm:$0xff]  }
  0xc7   :  { %5565 = vmatpush3.bf16.msra.mxu0 %v6093_v60  ;;  %4148 = vmatprep.mubr.bf16.mxu0 %v1081_v40  ;;  %v6138_v60 = vld [vmem:[%s7741_s2 + $0x760] sm:$0xff]   ;;  %v6168_v40 = vld [vmem:[%s7741_s2 + $0x818] sm:$0xff]  }
  0xc8   :  { %5566 = vmatprep.subr.bf16.mxu0 %v6096_v1  ;;  %5545 = vmatpush3.bf16.msra.mxu1 %v6095_v63  ;;  %v6141_v63 = vld [vmem:[%s7741_s2 + $0x7a0] sm:$0xff]   ;;  %v6142_v1 = vld [vmem:[%s7741_s2 + $0x768] sm:$0xff]  }
  0xc9   :  { %5546 = vmatprep.subr.bf16.mxu1 %v6098_v3  ;;  %v6144_v3 = vld [vmem:[%s7741_s2 + $0x7e8] sm:$0xff]  }
  0xcb   :  { %5567 = vmatpush3.bf16.msra.mxu0 %v6097_v2  ;;  %v6143_v2 = vld [vmem:[%s7741_s2 + $0x728] sm:$0xff]  }
  0xcc   :  { %5568 = vmatprep.subr.bf16.mxu0 %v6100_v5  ;;  %5547 = vmatpush3.bf16.msra.mxu1 %v6099_v4  ;;  %v6145_v4 = vld [vmem:[%s7741_s2 + $0x7a8] sm:$0xff]   ;;  %v6146_v5 = vld [vmem:[%s7741_s2 + $0x770] sm:$0xff]  }
  0xcd   :  { %5548 = vmatprep.subr.bf16.mxu1 %v6102_v7  ;;  %v6147_v7 = vld [vmem:[%s7741_s2 + $0x730] sm:$0xff]  }
  0xcf   :  { %5569 = vmatpush3.bf16.msra.mxu0 %v6101_v6 }
  0xd0   :  { %5570 = vmatprep.subr.bf16.mxu0 %v6104_v9  ;;  %5549 = vmatpush3.bf16.msra.mxu1 %v6103_v8  ;;  %v6148_v9 = vld [vmem:[%s7741_s2 + $0x7f0] sm:$0xff]  }
  0xd1   :  { %5550 = vmatprep.subr.bf16.mxu1 %v6106_v11 }
  0xd3   :  { %5571 = vmatpush3.bf16.msra.mxu0 %v6105_v10 }
  0xd4   :  { %5572 = vmatprep.subr.bf16.mxu0 %v6108_v14  ;;  %5551 = vmatpush3.bf16.msra.mxu1 %v6107_v12 }
  0xd5   :  { %5552 = vmatprep.subr.bf16.mxu1 %v6110_v18 }
  0xd7   :  { %5573 = vmatpush3.bf16.msra.mxu0 %v6109_v16  ;;  %v6149_v16 = vld [vmem:[%s7741_s2 + $0x7b0] sm:$0xff]  }
  0xd8   :  { %5574 = vmatprep.subr.bf16.mxu0 %v6112_v21  ;;  %5553 = vmatpush3.bf16.msra.mxu1 %v6111_v20  ;;  %v6151_v20 = vld [vmem:[%s7741_s2 + $0x738] sm:$0xff]  }
  0xd9   :  { %v7051_v13 = vpop.f32.mrb[0].mxu0  ;;  %5554 = vmatprep.subr.bf16.mxu1 %v6114_v23  ;;  %v6152_v21 = vld [vmem:[%s7741_s2 + $0x7f8] sm:$0xff]  }
  0xda   :  { %v5834_v15 = vpop.f32.mrb[1].mxu0 }
  0xdb   :  { %v877_v17 = vpop.f32.mrb[2].mxu0  ;;  %5575 = vmatpush3.bf16.msra.mxu0 %v6113_v22 }
  0xdc   :  { %v5835_v19 = vpop.f32.mrb[3].mxu0  ;;  %5576 = vmatprep.subr.bf16.mxu0 %v6116_v26  ;;  %5555 = vmatpush3.bf16.msra.mxu1 %v6115_v24  ;;  %v6150_v17 = vld [vmem:[%s7741_s2 + $0x778] sm:$0xff]   ;;  %v6155_v26 = vld [vmem:[%s7741_s2 + $0x840] sm:$0xff]  }
  0xdd   :  { %5556 = vmatprep.subr.bf16.mxu1 %v6118_v30  ;;  %v6154_v24 = vld [vmem:[%s7741_s2 + $0x7b8] sm:$0xff]   ;;  %v1080_v30 = vcombine.high %v1064_v25, %v1064_v25 }
  0xdf   :  { %5577 = vmatpush3.bf16.msra.mxu0 %v6117_v29  ;;  %v6158_v29 = vld [vmem:[%s7741_s2 + $0x880] sm:$0xff]  }
  0xe0   :  { %5578 = vmatprep.subr.bf16.mxu0 %v6120_v34  ;;  %5557 = vmatpush3.bf16.msra.mxu1 %v6119_v33  ;;  %v6161_v33 = vld [vmem:[%s7741_s2 + $0x8c8] sm:$0xff]  }
  0xe1   :  { %5586 = vmatprep.subr.bf16.mxu1 %v6122_v39  ;;  %v6162_v34 = vld [vmem:[%s7741_s2 + $0x888] sm:$0xff]   ;;  %v6167_v39 = vld [vmem:[%s7741_s2 + $0x858] sm:$0xff]  }
  0xe3   :  { %5579 = vmatpush3.bf16.msra.mxu0 %v6121_v37  ;;  %4109 = vmatmul.mubr.bf16.vlgmr.msra.gmra.mrb[24].mxu1 %v1057_v38  ;;  %v6165_v37 = vld [vmem:[%s7741_s2 + $0x8d0] sm:$0xff]  }
  0xe4   :  { %5608 = vmatprep.subr.bf16.mxu0 %v6124_v43  ;;  %5587 = vmatpush3.bf16.msra.mxu1 %v6123_v41  ;;  %v6166_v38 = vld [vmem:[%s7741_s2 + $0x890] sm:$0xff]   ;;  %v6169_v41 = vld [vmem:[%s7741_s2 + $0x8d8] sm:$0xff]   ;;  %v6171_v43 = vld [vmem:[%s7741_s2 + $0x860] sm:$0xff]  }
  0xe5   :  { %4188 = vmatprep.mubr.bf16.mxu1 %v1078_v42  ;;  %5588 = vmatprep.subr.bf16.mxu1 %v6126_v47  ;;  %v6170_v42 = vld [vmem:[%s7741_s2 + $0x898] sm:$0xff]   ;;  %v6174_v47 = vld [vmem:[%s7741_s2 + $0x8a0] sm:$0xff]  }
  0xe6   :  { %4149 = vmatmul.mubr.bf16.vlgmr.msra.gmra.mrb[28].mxu0 %v1079_v46  ;;  %v6173_v46 = vld [vmem:[%s7741_s2 + $0x8e0] sm:$0xff]  }
  0xe7   :  { %5609 = vmatpush3.bf16.msra.mxu0 %v6125_v44  ;;  %4228 = vmatprep.mubr.bf16.mxu0 %v1082_v49  ;;  %v6172_v44 = vld [vmem:[%s7741_s2 + $0x820] sm:$0xff]   ;;  %v6176_v49 = vld [vmem:[%s7741_s2 + $0x828] sm:$0xff]  }
  0xe8   :  { %5610 = vmatprep.subr.bf16.mxu0 %v6128_v50  ;;  %5589 = vmatpush3.bf16.msra.mxu1 %v6127_v48  ;;  %v6175_v48 = vld [vmem:[%s7741_s2 + $0x868] sm:$0xff]  }
  0xe9   :  { %5590 = vmatprep.subr.bf16.mxu1 %v6130_v52  ;;  %v6177_v50 = vld [vmem:[%s7741_s2 + $0x8e8] sm:$0xff]   ;;  %v6179_v52 = vld [vmem:[%s7741_s2 + $0x870] sm:$0xff]  }
  0xeb   :  { %5611 = vmatpush3.bf16.msra.mxu0 %v6129_v51  ;;  %v6178_v51 = vld [vmem:[%s7741_s2 + $0x8a8] sm:$0xff]  }
  0xec   :  { %5612 = vmatprep.subr.bf16.mxu0 %v6132_v54  ;;  %5591 = vmatpush3.bf16.msra.mxu1 %v6131_v53  ;;  %v6180_v54 = vld [vmem:[%s7741_s2 + $0x830] sm:$0xff]  }
  0xed   :  { %5592 = vmatprep.subr.bf16.mxu1 %v6134_v56  ;;  %v6181_v56 = vld [vmem:[%s7741_s2 + $0x8f0] sm:$0xff]  }
  0xef   :  { %5613 = vmatpush3.bf16.msra.mxu0 %v6133_v55 }
  0xf0   :  { %5614 = vmatprep.subr.bf16.mxu0 %v6136_v58  ;;  %5593 = vmatpush3.bf16.msra.mxu1 %v6135_v57  ;;  %v43_v57 = vld [vmem:[%s7743_s0 + $0x20] sm:$0xff] }
  0xf1   :  { %5594 = vmatprep.subr.bf16.mxu1 %v6138_v60 }
  0xf3   :  { %5615 = vmatpush3.bf16.msra.mxu0 %v6137_v59 }
  0xf4   :  { %5616 = vmatprep.subr.bf16.mxu0 %v6140_v62  ;;  %5595 = vmatpush3.bf16.msra.mxu1 %v6139_v61  ;;  %v6182_v61 = vld [vmem:[%s7741_s2 + $0x8b0] sm:$0xff]   ;;  %v6183_v62 = vld [vmem:[%s7741_s2 + $0x878] sm:$0xff]  }
  0xf5   :  { %5596 = vmatprep.subr.bf16.mxu1 %v6142_v1  ;;  %v1083_v1 = vcombine.high %v43_v57, %v43_v57 }
  0xf6   :  { %v5294_v6 = vpop.f32.mrb[0].mxu1 }
  0xf7   :  { %5617 = vmatpush3.bf16.msra.mxu0 %v6141_v63  ;;  %v5295_v8 = vpop.f32.mrb[1].mxu1  ;;  %v1090_v63 = vrot.slane %v43_v57, %v6482_v45  ;;  %v6215_v57 = vld [vmem:[%s7741_s2 + $0x978] sm:$0xff]  }
  0xf8   :  { %5618 = vmatprep.subr.bf16.mxu0 %v6144_v3  ;;  %v5296_v10 = vadd.f32 %v5295_v8, %v5294_v6  ;;  %v5297_v11 = vpop.f32.mrb[2].mxu1  ;;  %5597 = vmatpush3.bf16.msra.mxu1 %v6143_v2  ;;  %v6184_v6 = vld [vmem:[%s7741_s2 + $0x838] sm:$0xff]  }
  0xf9   :  { %v5316_v12 = vpop.f32.mrb[4].mxu0  ;;  %v5298_v14 = vpop.f32.mrb[3].mxu1  ;;  %5598 = vmatprep.subr.bf16.mxu1 %v6146_v5  ;;  %v7307_v11 = vrot.slane %v1083_v1, %v6482_v45 }
  0xfa   :  { %v5317_v15 = vpop.f32.mrb[5].mxu0  ;;  %v3631_v18 = vadd.f32 %v5296_v10, %v7051_v13 }
  0xfb   :  { %v5318_v19 = vadd.f32 %v5317_v15, %v5316_v12  ;;  %5619 = vmatpush3.bf16.msra.mxu0 %v6145_v4  ;;  %v5319_v22 = vpop.f32.mrb[6].mxu0  ;;  %v6186_v15 = vld [vmem:[%s7741_s2 + $0x8b8] sm:$0xff]  }
  0xfc   :  { %5620 = vmatprep.subr.bf16.mxu0 %v6148_v9  ;;  %5599 = vmatpush3.bf16.msra.mxu1 %v6147_v7  ;;  %v5320_v13 = vpop.f32.mrb[7].mxu0  ;;  %v1098_v7 = vcombine.high %v1090_v63, %v1090_v63  ;;  %v6185_v9 = vld [vmem:[%s7741_s2 + $0x8f8] sm:$0xff]  }
  0xfd   :  { %v7201_v23 = vadd.f32 %v5318_v19, %v3631_v18  ;;  %5600 = vmatprep.subr.bf16.mxu1 %v6150_v17  ;;  %v6187_v17 = vld [vmem:[%s7741_s2 + $0x940] sm:$0xff]   ;;  %v1099_v18 = vcombine.high %v7307_v11, %v7307_v11  ;;  %v6191_v13 = vld [vmem:[%s7741_s2 + $0x948] sm:$0xff]  }
  0xfe   :  { %v1120_v14 = vrot.slane %v1098_v7, %v6482_v45 }
  0xff   :  { %5621 = vmatpush3.bf16.msra.mxu0 %v6149_v16  ;;  %v1106_v16 = vrot.slane %v1090_v63, %v6482_v45  ;;  %v1127_v22 = vrot.slane %v1099_v18, %v6482_v45  ;;  %v6216_v63 = vld [vmem:[%s7741_s2 + $0x938] sm:$0xff]   ;;  %v6231_v18 = vld [vmem:[%s7741_s2 + $0xa90] sm:$0xff]  }
 0x100   :  { %5622 = vmatprep.subr.bf16.mxu0 %v6152_v21  ;;  %5601 = vmatpush3.bf16.msra.mxu1 %v6151_v20  ;;  %v1130_v19 = vcombine.high %v1120_v14, %v1120_v14  ;;  %v6188_v20 = vld [vmem:[%s7741_s2 + $0x900] sm:$0xff]  }
 0x101   :  { %5630 = vmatprep.subr.bf16.mxu1 %v6155_v26  ;;  %v6189_v21 = vld [vmem:[%s7741_s2 + $0x9c0] sm:$0xff]   ;;  %v1131_v26 = vcombine.high %v1127_v22, %v1127_v22 }
 0x103   :  { %5623 = vmatpush3.bf16.msra.mxu0 %v6154_v24  ;;  %4189 = vmatmul.mubr.bf16.vlgmr.msra.gmra.mrb[28].mxu1 %v1064_v25  ;;  %v1128_v24 = vcombine.high %v1106_v16, %v1106_v16  ;;  %v6192_v25 = vld [vmem:[%s7741_s2 + $0x908] sm:$0xff]  }
 0x104   :  { %5652 = vmatprep.subr.bf16.mxu0 %v6157_v28  ;;  %5631 = vmatpush3.bf16.msra.mxu1 %v6156_v27  ;;  %v6193_v27 = vld [vmem:[%s7741_s2 + $0x9c8] sm:$0xff]  }
 0x105   :  { %5632 = vmatprep.subr.bf16.mxu1 %v6159_v31  ;;  %4268 = vmatprep.mubr.bf16.mxu1 %v1120_v14  ;;  %v6194_v28 = vld [vmem:[%s7741_s2 + $0x988] sm:$0xff]   ;;  %v6197_v31 = vld [vmem:[%s7741_s2 + $0x9d0] sm:$0xff]  }
 0x106   :  { %4229 = vmatmul.mubr.bf16.vlgmr.msra.gmra.mrb[32].mxu0 %v1080_v30  ;;  %v6196_v30 = vld [vmem:[%s7741_s2 + $0x910] sm:$0xff]   ;;  %v6227_v14 = vld [vmem:[%s7741_s2 + $0xa88] sm:$0xff]  }
 0x107   :  { %5653 = vmatpush3.bf16.msra.mxu0 %v6158_v29  ;;  %4308 = vmatprep.mubr.bf16.mxu0 %v1130_v19  ;;  %v6195_v29 = vld [vmem:[%s7741_s2 + $0x950] sm:$0xff]   ;;  %v6234_v19 = vld [vmem:[%s7741_s2 + $0xad8] sm:$0xff]  }
 0x108   :  { %5654 = vmatprep.subr.bf16.mxu0 %v6161_v33  ;;  %5633 = vmatpush3.bf16.msra.mxu1 %v6160_v32  ;;  %v6198_v32 = vld [vmem:[%s7741_s2 + $0x990] sm:$0xff]   ;;  %v6199_v33 = vld [vmem:[%s7741_s2 + $0x958] sm:$0xff]  }
 0x109   :  { %5634 = vmatprep.subr.bf16.mxu1 %v6163_v35  ;;  %v6201_v35 = vld [vmem:[%s7741_s2 + $0x9d8] sm:$0xff]  }
 0x10b   :  { %5655 = vmatpush3.bf16.msra.mxu0 %v6162_v34  ;;  %v6200_v34 = vld [vmem:[%s7741_s2 + $0x918] sm:$0xff]  }
 0x10c   :  { %5656 = vmatprep.subr.bf16.mxu0 %v6165_v37  ;;  %5635 = vmatpush3.bf16.msra.mxu1 %v6164_v36  ;;  %v6202_v36 = vld [vmem:[%s7741_s2 + $0x998] sm:$0xff]   ;;  %v6203_v37 = vld [vmem:[%s7741_s2 + $0x960] sm:$0xff]  }
 0x10d   :  { %5636 = vmatprep.subr.bf16.mxu1 %v6167_v39  ;;  %v6205_v39 = vld [vmem:[%s7741_s2 + $0x9e0] sm:$0xff]  }
 0x10f   :  { %5657 = vmatpush3.bf16.msra.mxu0 %v6166_v38  ;;  %v6204_v38 = vld [vmem:[%s7741_s2 + $0x920] sm:$0xff]  }
 0x110   :  { %5658 = vmatprep.subr.bf16.mxu0 %v6169_v41  ;;  %5637 = vmatpush3.bf16.msra.mxu1 %v6168_v40  ;;  %v6206_v40 = vld [vmem:[%s7741_s2 + $0x9a0] sm:$0xff]   ;;  %v6207_v41 = vld [vmem:[%s7741_s2 + $0x968] sm:$0xff]  }
 0x111   :  { %5638 = vmatprep.subr.bf16.mxu1 %v6171_v43  ;;  %v6209_v43 = vld [vmem:[%s7741_s2 + $0x9e8] sm:$0xff]  }
 0x113   :  { %5659 = vmatpush3.bf16.msra.mxu0 %v6170_v42  ;;  %v6208_v42 = vld [vmem:[%s7741_s2 + $0x928] sm:$0xff]  }
 0x114   :  { %5660 = vmatprep.subr.bf16.mxu0 %v6173_v46  ;;  %5639 = vmatpush3.bf16.msra.mxu1 %v6172_v44  ;;  %v6210_v44 = vld [vmem:[%s7741_s2 + $0x9a8] sm:$0xff]   ;;  %v6211_v46 = vld [vmem:[%s7741_s2 + $0x970] sm:$0xff]  }
 0x115   :  { %5640 = vmatprep.subr.bf16.mxu1 %v6175_v48  ;;  %v6212_v48 = vld [vmem:[%s7741_s2 + $0x930] sm:$0xff]  }
 0x116   :  { %v5338_v53 = vpop.f32.mrb[4].mxu1 }
 0x117   :  { %5661 = vmatpush3.bf16.msra.mxu0 %v6174_v47  ;;  %v5339_v55 = vpop.f32.mrb[5].mxu1 }
 0x118   :  { %5662 = vmatprep.subr.bf16.mxu0 %v6177_v50  ;;  %v5340_v58 = vadd.f32 %v5339_v55, %v5338_v53  ;;  %v5341_v59 = vpop.f32.mrb[6].mxu1  ;;  %5641 = vmatpush3.bf16.msra.mxu1 %v6176_v49  ;;  %v6213_v50 = vld [vmem:[%s7741_s2 + $0x9f0] sm:$0xff]  }
 0x119   :  { %v5360_v60 = vpop.f32.mrb[8].mxu0  ;;  %v5342_v2 = vpop.f32.mrb[7].mxu1  ;;  %5642 = vmatprep.subr.bf16.mxu1 %v6179_v52 }
 0x11a   :  { %v5361_v3 = vpop.f32.mrb[9].mxu0  ;;  %v3711_v4 = vadd.f32 %v5340_v58, %v7201_v23  ;;  %v6190_v23 = vld [vmem:[%s7741_s2 + $0x980] sm:$0xff]   ;;  %v1113_v2 = vrot.slane %v7307_v11, %v6482_v45  ;;  %v6225_v11 = vld [vmem:[%s7741_s2 + $0xa08] sm:$0xff]  }
 0x11b   :  { %v5362_v5 = vadd.f32 %v5361_v3, %v5360_v60  ;;  %5663 = vmatpush3.bf16.msra.mxu0 %v6178_v51  ;;  %v5363_v8 = vpop.f32.mrb[10].mxu0  ;;  %v6217_v60 = vld [vmem:[%s7741_s2 + $0x9f8] sm:$0xff]   ;;  %v6220_v3 = vld [vmem:[%s7741_s2 + $0xa40] sm:$0xff]  }
 0x11c   :  { %5664 = vmatprep.subr.bf16.mxu0 %v6181_v56  ;;  %v5364_v10 = vpop.f32.mrb[11].mxu0  ;;  %5643 = vmatpush3.bf16.msra.mxu1 %v6180_v54  ;;  %v6214_v56 = vld [vmem:[%s7741_s2 + $0x9b0] sm:$0xff]   ;;  %v1129_v7 = vcombine.high %v1113_v2, %v1113_v2  ;;  %v6224_v8 = vld [vmem:[%s7741_s2 + $0xa48] sm:$0xff]  }
 0x11d   :  { %v7309_v12 = vadd.f32 %v5362_v5, %v3711_v4  ;;  %5644 = vmatprep.subr.bf16.mxu1 %v6183_v62  ;;  %v6219_v4 = vld [vmem:[%s7741_s2 + $0x9b8] sm:$0xff]   ;;  %v6222_v5 = vld [vmem:[%s7741_s2 + $0xac0] sm:$0xff]   ;;  %v6226_v10 = vld [vmem:[%s7741_s2 + $0xac8] sm:$0xff]  }
 0x11f   :  { %5665 = vmatpush3.bf16.msra.mxu0 %v6182_v61 }
 0x120   :  { %5666 = vmatprep.subr.bf16.mxu0 %v6185_v9  ;;  %5645 = vmatpush3.bf16.msra.mxu1 %v6184_v6  ;;  %v6221_v6 = vld [vmem:[%s7741_s2 + $0xa00] sm:$0xff]  }
 0x121   :  { %5674 = vmatprep.subr.bf16.mxu1 %v6187_v17  ;;  %v6223_v9 = vld [vmem:[%s7741_s2 + $0xa80] sm:$0xff]   ;;  %v6232_v17 = vld [vmem:[%s7741_s2 + $0xa58] sm:$0xff]  }
 0x123   :  { %5667 = vmatpush3.bf16.msra.mxu0 %v6186_v15  ;;  %4269 = vmatmul.mubr.bf16.vlgmr.msra.gmra.mrb[32].mxu1 %v1106_v16  ;;  %v6230_v15 = vld [vmem:[%s7741_s2 + $0xad0] sm:$0xff]  }
 0x124   :  { %5696 = vmatprep.subr.bf16.mxu0 %v6189_v21  ;;  %5675 = vmatpush3.bf16.msra.mxu1 %v6188_v20  ;;  %v6229_v16 = vld [vmem:[%s7741_s2 + $0xa10] sm:$0xff]   ;;  %v6233_v20 = vld [vmem:[%s7741_s2 + $0xa18] sm:$0xff]   ;;  %v6236_v21 = vld [vmem:[%s7741_s2 + $0xa60] sm:$0xff]  }
 0x125   :  { %4348 = vmatprep.mubr.bf16.mxu1 %v1127_v22  ;;  %5676 = vmatprep.subr.bf16.mxu1 %v6191_v13  ;;  %v6235_v22 = vld [vmem:[%s7741_s2 + $0xa98] sm:$0xff]   ;;  %v6240_v13 = vld [vmem:[%s7741_s2 + $0xa68] sm:$0xff]  }
 0x126   :  { %4309 = vmatmul.mubr.bf16.vlgmr.msra.gmra.mrb[36].mxu0 %v1128_v24  ;;  %v6237_v24 = vld [vmem:[%s7741_s2 + $0xa20] sm:$0xff]  }
 0x127   :  { %5697 = vmatpush3.bf16.msra.mxu0 %v6190_v23  ;;  %4388 = vmatprep.mubr.bf16.mxu0 %v1131_v26  ;;  %v6238_v23 = vld [vmem:[%s7741_s2 + $0xae0] sm:$0xff]   ;;  %v6242_v26 = vld [vmem:[%s7741_s2 + $0xae8] sm:$0xff]  }
 0x128   :  { %5698 = vmatprep.subr.bf16.mxu0 %v6193_v27  ;;  %5677 = vmatpush3.bf16.msra.mxu1 %v6192_v25  ;;  %v6239_v25 = vld [vmem:[%s7741_s2 + $0xaa0] sm:$0xff]   ;;  %v6241_v27 = vld [vmem:[%s7741_s2 + $0xa28] sm:$0xff]  }
 0x129   :  { %5678 = vmatprep.subr.bf16.mxu1 %v6195_v29 }
 0x12b   :  { %5699 = vmatpush3.bf16.msra.mxu0 %v6194_v28  ;;  %v6244_v28 = vld [vmem:[%s7741_s2 + $0xa70] sm:$0xff]  }
 0x12c   :  { %5700 = vmatprep.subr.bf16.mxu0 %v6197_v31  ;;  %5679 = vmatpush3.bf16.msra.mxu1 %v6196_v30  ;;  %v6243_v30 = vld [vmem:[%s7741_s2 + $0xaa8] sm:$0xff]  }
 0x12d   :  { %5680 = vmatprep.subr.bf16.mxu1 %v6199_v33 }
 0x12f   :  { %5701 = vmatpush3.bf16.msra.mxu0 %v6198_v32  ;;  %v6246_v32 = vld [vmem:[%s7741_s2 + $0xaf0] sm:$0xff]  }
 0x130   :  { %5702 = vmatprep.subr.bf16.mxu0 %v6201_v35  ;;  %5681 = vmatpush3.bf16.msra.mxu1 %v6200_v34 }
 0x131   :  { %5682 = vmatprep.subr.bf16.mxu1 %v6203_v37  ;;  %v44_v37 = vld [vmem:[%s7743_s0 + $0x28] sm:$0xff] }
 0x133   :  { %5703 = vmatpush3.bf16.msra.mxu0 %v6202_v36  ;;  %v6245_v36 = vld [vmem:[%s7741_s2 + $0xa30] sm:$0xff]  }
 0x134   :  { %5704 = vmatprep.subr.bf16.mxu0 %v6205_v39  ;;  %5683 = vmatpush3.bf16.msra.mxu1 %v6204_v38 }
 0x135   :  { %5684 = vmatprep.subr.bf16.mxu1 %v6207_v41  ;;  %v6248_v41 = vld [vmem:[%s7741_s2 + $0xa78] sm:$0xff]  }
 0x136   :  { %v5382_v47 = vpop.f32.mrb[8].mxu1 }
 0x137   :  { %5705 = vmatpush3.bf16.msra.mxu0 %v6206_v40  ;;  %v5383_v49 = vpop.f32.mrb[9].mxu1  ;;  %v6247_v40 = vld [vmem:[%s7741_s2 + $0xab0] sm:$0xff]  }
 0x138   :  { %5706 = vmatprep.subr.bf16.mxu0 %v6209_v43  ;;  %v5384_v51 = vadd.f32 %v5383_v49, %v5382_v47  ;;  %v5385_v52 = vpop.f32.mrb[10].mxu1  ;;  %5685 = vmatpush3.bf16.msra.mxu1 %v6208_v42  ;;  %v1139_v42 = vrot.slane %v44_v37, %v6482_v45  ;;  %v1132_v43 = vcombine.high %v44_v37, %v44_v37  ;;  %v6250_v47 = vld [vmem:[%s7741_s2 + $0xaf8] sm:$0xff]  }
 0x139   :  { %v5404_v53 = vpop.f32.mrb[12].mxu0  ;;  %v5386_v54 = vpop.f32.mrb[11].mxu1  ;;  %5686 = vmatprep.subr.bf16.mxu1 %v6211_v46  ;;  %v6249_v52 = vld [vmem:[%s7741_s2 + $0xa38] sm:$0xff]  }
 0x13a   :  { %v5405_v55 = vpop.f32.mrb[13].mxu0  ;;  %v3791_v58 = vadd.f32 %v5384_v51, %v7309_v12  ;;  %v6228_v12 = vld [vmem:[%s7741_s2 + $0xa50] sm:$0xff]  }
 0x13b   :  { %v5406_v59 = vadd.f32 %v5405_v55, %v5404_v53  ;;  %5707 = vmatpush3.bf16.msra.mxu0 %v6210_v44  ;;  %v5407_v61 = vpop.f32.mrb[14].mxu0  ;;  %v1155_v55 = vrot.slane %v1139_v42, %v6482_v45 }
 0x13c   :  { %5708 = vmatprep.subr.bf16.mxu0 %v6213_v50  ;;  %5687 = vmatpush3.bf16.msra.mxu1 %v6212_v48  ;;  %v5408_v1 = vpop.f32.mrb[15].mxu0  ;;  %v1147_v48 = vcombine.high %v1139_v42, %v1139_v42  ;;  %v7516_v50 = vrot.slane %v1132_v43, %v6482_v45  ;;  %v6284_v43 = vld [vmem:[%s7741_s2 + $0xbb8] sm:$0xff]  }
 0x13d   :  { %v7410_v62 = vadd.f32 %v5406_v59, %v3791_v58  ;;  %5688 = vmatprep.subr.bf16.mxu1 %v6215_v57  ;;  %v6251_v58 = vld [vmem:[%s7741_s2 + $0xab8] sm:$0xff]   ;;  %v6256_v1 = vld [vmem:[%s7741_s2 + $0xb48] sm:$0xff]  }
 0x13e   :  { %v1169_v54 = vrot.slane %v1147_v48, %v6482_v45  ;;  %v1148_v57 = vcombine.high %v7516_v50, %v7516_v50  ;;  %v1162_v42 = vrot.slane %v7516_v50, %v6482_v45  ;;  %v6287_v48 = vld [vmem:[%s7741_s2 + $0xc10] sm:$0xff]   ;;  %v6289_v50 = vld [vmem:[%s7741_s2 + $0xc20] sm:$0xff]  }
 0x13f   :  { %5709 = vmatpush3.bf16.msra.mxu0 %v6214_v56  ;;  %v6252_v56 = vld [vmem:[%s7741_s2 + $0xb40] sm:$0xff]  }
 0x140   :  { %5710 = vmatprep.subr.bf16.mxu0 %v6217_v60  ;;  %5689 = vmatpush3.bf16.msra.mxu1 %v6216_v63  ;;  %v1179_v59 = vcombine.high %v1169_v54, %v1169_v54  ;;  %v6254_v60 = vld [vmem:[%s7741_s2 + $0xbc0] sm:$0xff]   ;;  %v1176_v61 = vrot.slane %v1148_v57, %v6482_v45  ;;  %v1177_v63 = vcombine.high %v1155_v55, %v1155_v55  ;;  %v6291_v57 = vld [vmem:[%s7741_s2 + $0xc30] sm:$0xff]  }
 0x141   :  { %5718 = vmatprep.subr.bf16.mxu1 %v6220_v3 }
 0x142   :  { %v1180_v3 = vcombine.high %v1176_v61, %v1176_v61 }
 0x143   :  { %5711 = vmatpush3.bf16.msra.mxu0 %v6219_v4  ;;  %4349 = vmatmul.mubr.bf16.vlgmr.msra.gmra.mrb[36].mxu1 %v1113_v2  ;;  %v6255_v2 = vld [vmem:[%s7741_s2 + $0xb80] sm:$0xff]   ;;  %v6258_v4 = vld [vmem:[%s7741_s2 + $0xbc8] sm:$0xff]  }
 0x144   :  { %5740 = vmatprep.subr.bf16.mxu0 %v6222_v5  ;;  %5719 = vmatpush3.bf16.msra.mxu1 %v6221_v6  ;;  %v6257_v5 = vld [vmem:[%s7741_s2 + $0xb08] sm:$0xff]   ;;  %v6260_v6 = vld [vmem:[%s7741_s2 + $0xb50] sm:$0xff]  }
 0x145   :  { %5720 = vmatprep.subr.bf16.mxu1 %v6224_v8  ;;  %4428 = vmatprep.mubr.bf16.mxu1 %v1169_v54  ;;  %v6262_v8 = vld [vmem:[%s7741_s2 + $0xbd0] sm:$0xff]  }
 0x146   :  { %4389 = vmatmul.mubr.bf16.vlgmr.msra.gmra.mrb[40].mxu0 %v1129_v7  ;;  %v6259_v7 = vld [vmem:[%s7741_s2 + $0xb88] sm:$0xff]  }
 0x147   :  { %5741 = vmatpush3.bf16.msra.mxu0 %v6223_v9  ;;  %4468 = vmatprep.mubr.bf16.mxu0 %v1179_v59  ;;  %v6261_v9 = vld [vmem:[%s7741_s2 + $0xb10] sm:$0xff]  }
 0x148   :  { %5742 = vmatprep.subr.bf16.mxu0 %v6226_v10  ;;  %5721 = vmatpush3.bf16.msra.mxu1 %v6225_v11  ;;  %v6264_v10 = vld [vmem:[%s7741_s2 + $0xb58] sm:$0xff]   ;;  %v6263_v11 = vld [vmem:[%s7741_s2 + $0xb90] sm:$0xff]  }
 0x149   :  { %5722 = vmatprep.subr.bf16.mxu1 %v6228_v12  ;;  %v6266_v12 = vld [vmem:[%s7741_s2 + $0xbd8] sm:$0xff]  }
 0x14b   :  { %5743 = vmatpush3.bf16.msra.mxu0 %v6227_v14  ;;  %v6265_v14 = vld [vmem:[%s7741_s2 + $0xb18] sm:$0xff]  }
 0x14c   :  { %5744 = vmatprep.subr.bf16.mxu0 %v6230_v15  ;;  %5723 = vmatpush3.bf16.msra.mxu1 %v6229_v16  ;;  %v6268_v15 = vld [vmem:[%s7741_s2 + $0xb60] sm:$0xff]   ;;  %v6267_v16 = vld [vmem:[%s7741_s2 + $0xb98] sm:$0xff]  }
 0x14d   :  { %5724 = vmatprep.subr.bf16.mxu1 %v6232_v17  ;;  %v6270_v17 = vld [vmem:[%s7741_s2 + $0xbe0] sm:$0xff]  }
 0x14f   :  { %5745 = vmatpush3.bf16.msra.mxu0 %v6231_v18  ;;  %v6269_v18 = vld [vmem:[%s7741_s2 + $0xb20] sm:$0xff]  }
 0x150   :  { %5746 = vmatprep.subr.bf16.mxu0 %v6234_v19  ;;  %5725 = vmatpush3.bf16.msra.mxu1 %v6233_v20  ;;  %v6272_v19 = vld [vmem:[%s7741_s2 + $0xb68] sm:$0xff]   ;;  %v6271_v20 = vld [vmem:[%s7741_s2 + $0xba0] sm:$0xff]  }
 0x151   :  { %5726 = vmatprep.subr.bf16.mxu1 %v6236_v21  ;;  %v6274_v21 = vld [vmem:[%s7741_s2 + $0xbe8] sm:$0xff]  }
 0x153   :  { %5747 = vmatpush3.bf16.msra.mxu0 %v6235_v22  ;;  %v6273_v22 = vld [vmem:[%s7741_s2 + $0xb28] sm:$0xff]  }
 0x154   :  { %5748 = vmatprep.subr.bf16.mxu0 %v6238_v23  ;;  %5727 = vmatpush3.bf16.msra.mxu1 %v6237_v24  ;;  %v6276_v23 = vld [vmem:[%s7741_s2 + $0xb70] sm:$0xff]  }
 0x155   :  { %5728 = vmatprep.subr.bf16.mxu1 %v6240_v13  ;;  %v6275_v13 = vld [vmem:[%s7741_s2 + $0xba8] sm:$0xff]  }
 0x156   :  { %v5426_v29 = vpop.f32.mrb[12].mxu1 }
 0x157   :  { %5749 = vmatpush3.bf16.msra.mxu0 %v6239_v25  ;;  %v5427_v31 = vpop.f32.mrb[13].mxu1 }
 0x158   :  { %5750 = vmatprep.subr.bf16.mxu0 %v6242_v26  ;;  %v5428_v33 = vadd.f32 %v5427_v31, %v5426_v29  ;;  %v5429_v34 = vpop.f32.mrb[14].mxu1  ;;  %5729 = vmatpush3.bf16.msra.mxu1 %v6241_v27  ;;  %v6278_v26 = vld [vmem:[%s7741_s2 + $0xbf0] sm:$0xff]   ;;  %v6280_v31 = vld [vmem:[%s7741_s2 + $0xb78] sm:$0xff]  }
 0x159   :  { %v5448_v35 = vpop.f32.mrb[16].mxu0  ;;  %v5430_v38 = vpop.f32.mrb[15].mxu1  ;;  %5730 = vmatprep.subr.bf16.mxu1 %v6244_v28 }
 0x15a   :  { %v5449_v39 = vpop.f32.mrb[17].mxu0  ;;  %v3871_v44 = vadd.f32 %v5428_v33, %v7410_v62  ;;  %v6253_v62 = vld [vmem:[%s7741_s2 + $0xb00] sm:$0xff]   ;;  %v6282_v38 = vld [vmem:[%s7741_s2 + $0xbf8] sm:$0xff]  }
 0x15b   :  { %v5450_v46 = vadd.f32 %v5449_v39, %v5448_v35  ;;  %5751 = vmatpush3.bf16.msra.mxu0 %v6243_v30  ;;  %v5451_v49 = vpop.f32.mrb[18].mxu0  ;;  %v6277_v30 = vld [vmem:[%s7741_s2 + $0xb30] sm:$0xff]  }
 0x15c   :  { %5752 = vmatprep.subr.bf16.mxu0 %v6246_v32  ;;  %5731 = vmatpush3.bf16.msra.mxu1 %v6245_v36  ;;  %v5452_v53 = vpop.f32.mrb[19].mxu0  ;;  %v6279_v36 = vld [vmem:[%s7741_s2 + $0xbb0] sm:$0xff]   ;;  %v6288_v49 = vld [vmem:[%s7741_s2 + $0xc18] sm:$0xff]  }
 0x15d   :  { %v7518_v51 = vadd.f32 %v5450_v46, %v3871_v44  ;;  %5732 = vmatprep.subr.bf16.mxu1 %v6248_v41  ;;  %v6281_v41 = vld [vmem:[%s7741_s2 + $0xb38] sm:$0xff]   ;;  %v6285_v44 = vld [vmem:[%s7741_s2 + $0xc00] sm:$0xff]   ;;  %v1178_v46 = vcombine.high %v1162_v42, %v1162_v42 }
 0x15f   :  { %5753 = vmatpush3.bf16.msra.mxu0 %v6247_v40 }
 0x160   :  { %5754 = vmatprep.subr.bf16.mxu0 %v6250_v47  ;;  %5733 = vmatpush3.bf16.msra.mxu1 %v6249_v52  ;;  %v6286_v47 = vld [vmem:[%s7741_s2 + $0xc08] sm:$0xff]  }
 0x161   :  { %5762 = vmatprep.subr.bf16.mxu1 %v6252_v56 }
 0x163   :  { %5755 = vmatpush3.bf16.msra.mxu0 %v6251_v58  ;;  %4429 = vmatmul.mubr.bf16.vlgmr.msra.gmra.mrb[40].mxu1 %v1155_v55 }
 0x164   :  { %5784 = vmatprep.subr.bf16.mxu0 %v6254_v60  ;;  %5763 = vmatpush3.bf16.msra.mxu1 %v6253_v62 }
 0x165   :  { %4508 = vmatprep.mubr.bf16.mxu1 %v1176_v61  ;;  %5764 = vmatprep.subr.bf16.mxu1 %v6256_v1 }
 0x166   :  { %4469 = vmatmul.mubr.bf16.vlgmr.msra.gmra.mrb[44].mxu0 %v1177_v63 }
 0x167   :  { %5785 = vmatpush3.bf16.msra.mxu0 %v6255_v2  ;;  %4548 = vmatprep.mubr.bf16.mxu0 %v1180_v3  ;;  %v6292_v2 = vld [vmem:[%s7741_s2 + $0xc38] sm:$0xff]   ;;  %v4864_v3 = vld.sshfl [vmem:[%s7743_s0 + $0x30] sm:$0x1 pattern:$0x75316420] }
 0x168   :  { %5786 = vmatprep.subr.bf16.mxu0 %v6258_v4  ;;  %5765 = vmatpush3.bf16.msra.mxu1 %v6257_v5  ;;  %v1194_v4 = vrot.slane %v4864_v3, %v6482_v45 }
 0x169   :  { %5766 = vmatprep.subr.bf16.mxu1 %v6260_v6 }
 0x16b   :  { %5787 = vmatpush3.bf16.msra.mxu0 %v6259_v7 }
 0x16c   :  { %5788 = vmatprep.subr.bf16.mxu0 %v6262_v8  ;;  %5767 = vmatpush3.bf16.msra.mxu1 %v6261_v9 }
 0x16d   :  { %5768 = vmatprep.subr.bf16.mxu1 %v6264_v10 }
 0x16f   :  { %5789 = vmatpush3.bf16.msra.mxu0 %v6263_v11 }
 0x170   :  { %5790 = vmatprep.subr.bf16.mxu0 %v6266_v12  ;;  %5769 = vmatpush3.bf16.msra.mxu1 %v6265_v14 }
 0x171   :  { %5770 = vmatprep.subr.bf16.mxu1 %v6268_v15 }
 0x173   :  { %5791 = vmatpush3.bf16.msra.mxu0 %v6267_v16 }
 0x174   :  { %5792 = vmatprep.subr.bf16.mxu0 %v6270_v17  ;;  %5771 = vmatpush3.bf16.msra.mxu1 %v6269_v18 }
 0x175   :  { %5772 = vmatprep.subr.bf16.mxu1 %v6272_v19 }
 0x176   :  { %v5470_v24 = vpop.f32.mrb[16].mxu1 }
 0x177   :  { %5793 = vmatpush3.bf16.msra.mxu0 %v6271_v20  ;;  %v5471_v25 = vpop.f32.mrb[17].mxu1 }
 0x178   :  { %5794 = vmatprep.subr.bf16.mxu0 %v6274_v21  ;;  %v5472_v27 = vadd.f32 %v5471_v25, %v5470_v24  ;;  %v5473_v28 = vpop.f32.mrb[18].mxu1  ;;  %5773 = vmatpush3.bf16.msra.mxu1 %v6273_v22 }
 0x179   :  { %v5492_v29 = vpop.f32.mrb[20].mxu0  ;;  %v5474_v32 = vpop.f32.mrb[19].mxu1  ;;  %5774 = vmatprep.subr.bf16.mxu1 %v6276_v23 }
 0x17a   :  { %v5493_v33 = vpop.f32.mrb[21].mxu0  ;;  %v3951_v34 = vadd.f32 %v5472_v27, %v7518_v51  ;;  %v6290_v51 = vld [vmem:[%s7741_s2 + $0xc28] sm:$0xff]   ;;  %v6293_v27 = vld [vmem:[%s7744_s5] sm:$0xff]  }
 0x17b   :  { %v5494_v35 = vadd.f32 %v5493_v33, %v5492_v29  ;;  %5795 = vmatpush3.bf16.msra.mxu0 %v6275_v13  ;;  %v5495_v37 = vpop.f32.mrb[22].mxu0  ;;  %v6294_v29 = vld [vmem:[%s7744_s5 + $0x8] sm:$0xff]  }
 0x17c   :  { %5796 = vmatprep.subr.bf16.mxu0 %v6278_v26  ;;  %v5496_v39 = vpop.f32.mrb[23].mxu0  ;;  %5775 = vmatpush3.bf16.msra.mxu1 %v6277_v30 }
 0x17d   :  { %v3991_v40 = vadd.f32 %v5494_v35, %v3951_v34  ;;  %5776 = vmatprep.subr.bf16.mxu1 %v6280_v31  ;;  %v6295_v31 = vld [vmem:[%s7744_s5 + $0x10] sm:$0xff]  }
 0x17f   :  { %5797 = vmatpush3.bf16.msra.mxu0 %v6279_v36 }
 0x180   :  { %5798 = vmatprep.subr.bf16.mxu0 %v6282_v38  ;;  %5777 = vmatpush3.bf16.msra.mxu1 %v6281_v41  ;;  %v6296_v41 = vld [vmem:[%s7744_s5 + $0x18] sm:$0xff]  }
 0x181   :  { %5836 = vmatprep.subr.bf16.mxu1 %v6305_v0 }
 0x183   :  { %5799 = vmatpush3.bf16.msra.mxu0 %v6284_v43  ;;  %4509 = vmatmul.mubr.bf16.vlgmr.msra.gmra.mrb[44].mxu1 %v1162_v42 }
 0x184   :  { %5856 = vmatprep.subr.bf16.mxu0 %v6305_v0  ;;  %5837 = vmatpush3.bf16.msra.mxu1 %v6285_v44 }
 0x185   :  { %5852 = vmatprep.mubr.msk.bf16.mxu1 %vm6306_vm1, %v6305_v0  ;;  %5838 = vmatprep.subr.bf16.mxu1 %v6305_v0 }
 0x186   :  { %4549 = vmatmul.mubr.bf16.vlgmr.msra.gmra.mrb[48].mxu0 %v1178_v46 }
 0x187   :  { %5864 = vmatprep.mubr.msk.bf16.mxu0 %vm6306_vm1, %v6305_v0  ;;  %5857 = vmatpush3.bf16.msra.mxu0 %v6293_v27  ;;  %v6298_v27 = vld [vmem:[%s7745_s7 + $0x8] sm:$0xff]  }
 0x188   :  { %5839 = vmatpush3.bf16.msra.mxu1 %v6286_v47  ;;  %5858 = vmatprep.subr.bf16.mxu0 %v6305_v0 }
 0x189   :  { %5840 = vmatprep.subr.bf16.mxu1 %v6305_v0 }
 0x18b   :  { %5859 = vmatpush3.bf16.msra.mxu0 %v6294_v29  ;;  %v6300_v29 = vld [vmem:[%s7745_s7 + $0x18] sm:$0xff]  }
 0x18c   :  { %5841 = vmatpush3.bf16.msra.mxu1 %v6287_v48  ;;  %5860 = vmatprep.subr.bf16.mxu0 %v6305_v0 }
 0x18d   :  { %5842 = vmatprep.subr.bf16.mxu1 %v6305_v0 }
 0x18f   :  { %5861 = vmatpush3.bf16.msra.mxu0 %v6295_v31  ;;  %v6302_v31 = vld [vmem:[%s7747_s9 + $0x8] sm:$0xff]  }
 0x190   :  { %5843 = vmatpush3.bf16.msra.mxu1 %v6288_v49  ;;  %5862 = vmatprep.subr.bf16.mxu0 %v6305_v0 }
 0x191   :  { %5844 = vmatprep.subr.bf16.mxu1 %v6305_v0 }
 0x193   :  { %5863 = vmatpush3.bf16.msra.mxu0 %v6296_v41  ;;  %v6304_v41 = vld [vmem:[%s7747_s9 + $0x18] sm:$0xff]  }
 0x194   :  { %5845 = vmatpush3.bf16.msra.mxu1 %v6289_v50  ;;  %5868 = vmatprep.subr.bf16.mxu0 %v6305_v0 }
 0x195   :  { %5846 = vmatprep.subr.bf16.mxu1 %v6305_v0 }
 0x196   :  { %v5514_v52 = vpop.f32.mrb[20].mxu1 }
 0x197   :  { %v5515_v53 = vpop.f32.mrb[21].mxu1 }
 0x198   :  { %v5516_v54 = vadd.f32 %v5515_v53, %v5514_v52  ;;  %v5517_v55 = vpop.f32.mrb[22].mxu1  ;;  %5847 = vmatpush3.bf16.msra.mxu1 %v6290_v51 }
 0x199   :  { %v5536_v56 = vpop.f32.mrb[24].mxu0  ;;  %v5518_v58 = vpop.f32.mrb[23].mxu1  ;;  %5848 = vmatprep.subr.bf16.mxu1 %v6305_v0 }
 0x19a   :  { %v5537_v59 = vpop.f32.mrb[25].mxu0  ;;  %v4031_v60 = vadd.f32 %v5516_v54, %v3991_v40 }
 0x19b   :  { %v5538_v61 = vadd.f32 %v5537_v59, %v5536_v56  ;;  %v5539_v62 = vpop.f32.mrb[26].mxu0 }
 0x19c   :  { %v5540_v63 = vpop.f32.mrb[27].mxu0  ;;  %5849 = vmatpush3.bf16.msra.mxu1 %v6291_v57 }
 0x19d   :  { %v4071_v1 = vadd.f32 %v5538_v61, %v4031_v60  ;;  %5850 = vmatprep.subr.bf16.mxu1 %v6305_v0 }
 0x1a0   :  { %5851 = vmatpush3.bf16.msra.mxu1 %v6292_v2 }
 0x1a1   :  { %5880 = vmatprep.subr.bf16.mxu1 %v6305_v0 }
 0x1a3   :  { %5853 = vmatmul.mubr.bf16.vlgmr.msra.gmra.mrb[48].mxu1 %v1194_v4 }
 0x1a4   :  { %5888 = vmatprep.mubr.msk.bf16.mxu1 %vm6306_vm1, %v6305_v0 }
 0x1b6   :  { %v5558_v5 = vpop.f32.mrb[24].mxu1 }
 0x1b7   :  { %v5559_v6 = vpop.f32.mrb[25].mxu1 }
 0x1b8   :  { %v5560_v7 = vadd.f32 %v5559_v6, %v5558_v5  ;;  %v5561_v8 = vpop.f32.mrb[26].mxu1 }
 0x1b9   :  { %v5580_v9 = vpop.f32.mrb[28].mxu0  ;;  %v5562_v10 = vpop.f32.mrb[27].mxu1 }
 0x1ba   :  { %v5581_v11 = vpop.f32.mrb[29].mxu0  ;;  %v4111_v12 = vadd.f32 %v5560_v7, %v4071_v1 }
 0x1bb   :  { %v5582_v14 = vadd.f32 %v5581_v11, %v5580_v9  ;;  %v5583_v15 = vpop.f32.mrb[30].mxu0 }
 0x1bc   :  { %v5584_v16 = vpop.f32.mrb[31].mxu0 }
 0x1bd   :  { %v4151_v17 = vadd.f32 %v5582_v14, %v4111_v12 }
 0x1d6   :  { %v5602_v45 = vpop.f32.mrb[28].mxu1 }
 0x1d7   :  { %v5603_v18 = vpop.f32.mrb[29].mxu1 }
 0x1d8   :  { %v5604_v19 = vadd.f32 %v5603_v18, %v5602_v45  ;;  %v5605_v20 = vpop.f32.mrb[30].mxu1 }
 0x1d9   :  { %v5624_v21 = vpop.f32.mrb[32].mxu0  ;;  %v5606_v22 = vpop.f32.mrb[31].mxu1 }
 0x1da   :  { %v5625_v23 = vpop.f32.mrb[33].mxu0  ;;  %v4191_v24 = vadd.f32 %v5604_v19, %v4151_v17  ;;  %v5257_v19 = vld [vmem:[%s7746_s4] ss:$0 sm:$0xff] }
 0x1db   :  { %v5626_v13 = vadd.f32 %v5625_v23, %v5624_v21  ;;  %v5627_v25 = vpop.f32.mrb[34].mxu0 }
 0x1dc   :  { %v5628_v26 = vpop.f32.mrb[35].mxu0  ;;  %v6297_v25 = vld [vmem:[%s7745_s7] sm:$0xff]  }
 0x1dd   :  { %v4231_v28 = vadd.f32 %v5626_v13, %v4191_v24 }
 0x1f6   :  { %v5646_v30 = vpop.f32.mrb[32].mxu1 }
 0x1f7   :  { %v5647_v32 = vpop.f32.mrb[33].mxu1 }
 0x1f8   :  { %v5648_v33 = vadd.f32 %v5647_v32, %v5646_v30  ;;  %v5649_v34 = vpop.f32.mrb[34].mxu1  ;;  %v6301_v30 = vld [vmem:[%s7747_s9] sm:$0xff]  }
 0x1f9   :  { %v5668_v35 = vpop.f32.mrb[36].mxu0  ;;  %v5650_v36 = vpop.f32.mrb[35].mxu1  ;;  %5881 = vmatpush3.bf16.msra.mxu1 %v6301_v30  ;;  %v5258_v32 = vld [vmem:[%s7748_s6] ss:$0 sm:$0xff] }
 0x1fa   :  { %v5669_v37 = vpop.f32.mrb[37].mxu0  ;;  %v4271_v38 = vadd.f32 %v5648_v33, %v4231_v28  ;;  %v6299_v28 = vld [vmem:[%s7745_s7 + $0x10] sm:$0xff]   ;;  %5882 = vmatprep.subr.bf16.mxu1 %v6305_v0 }
 0x1fb   :  { %v5670_v39 = vadd.f32 %v5669_v37, %v5668_v35  ;;  %v5671_v40 = vpop.f32.mrb[38].mxu0 }
 0x1fc   :  { %v5672_v42 = vpop.f32.mrb[39].mxu0  ;;  %v6303_v40 = vld [vmem:[%s7747_s9 + $0x10] sm:$0xff]  }
 0x1fd   :  { %v4311_v43 = vadd.f32 %v5670_v39, %v4271_v38  ;;  %5883 = vmatpush3.bf16.msra.mxu1 %v6302_v31  ;;  %v5264_v42 = vld [vmem:[%s7749_s8] ss:$0 sm:$0xff] }
 0x1fe   :  { %5884 = vmatprep.subr.bf16.mxu1 %v6305_v0 }
 0x201   :  { %5885 = vmatpush3.bf16.msra.mxu1 %v6303_v40 }
 0x202   :  { %5886 = vmatprep.subr.bf16.mxu1 %v6305_v0 }
 0x205   :  { %5887 = vmatpush3.bf16.msra.mxu1 %v6304_v41 }
 0x216   :  { %v5690_v44 = vpop.f32.mrb[36].mxu1 }
 0x217   :  { %v5691_v46 = vpop.f32.mrb[37].mxu1 }
 0x218   :  { %v5692_v47 = vadd.f32 %v5691_v46, %v5690_v44  ;;  %v5693_v48 = vpop.f32.mrb[38].mxu1 }
 0x219   :  { %v5712_v49 = vpop.f32.mrb[40].mxu0  ;;  %v5694_v50 = vpop.f32.mrb[39].mxu1 }
 0x21a   :  { %v5713_v51 = vpop.f32.mrb[41].mxu0  ;;  %v4351_v52 = vadd.f32 %v5692_v47, %v4311_v43 }
 0x21b   :  { %v5714_v53 = vadd.f32 %v5713_v51, %v5712_v49  ;;  %v5715_v54 = vpop.f32.mrb[42].mxu0 }
 0x21c   :  { %v5716_v55 = vpop.f32.mrb[43].mxu0 }
 0x21d   :  { %v4391_v56 = vadd.f32 %v5714_v53, %v4351_v52 }
 0x236   :  { %v5734_v57 = vpop.f32.mrb[40].mxu1 }
 0x237   :  { %v5735_v58 = vpop.f32.mrb[41].mxu1 }
 0x238   :  { %v5736_v59 = vadd.f32 %v5735_v58, %v5734_v57  ;;  %v5737_v60 = vpop.f32.mrb[42].mxu1 }
 0x239   :  { %v5756_v61 = vpop.f32.mrb[44].mxu0  ;;  %v5738_v62 = vpop.f32.mrb[43].mxu1 }
 0x23a   :  { %v5757_v63 = vpop.f32.mrb[45].mxu0  ;;  %v4431_v1 = vadd.f32 %v5736_v59, %v4391_v56 }
 0x23b   :  { %v5758_v2 = vadd.f32 %v5757_v63, %v5756_v61  ;;  %v5759_v3 = vpop.f32.mrb[46].mxu0 }
 0x23c   :  { %v5760_v4 = vpop.f32.mrb[47].mxu0 }
 0x23d   :  { %v4471_v5 = vadd.f32 %v5758_v2, %v4431_v1 }
 0x256   :  { %v5778_v6 = vpop.f32.mrb[44].mxu1 }
 0x257   :  { %v5779_v7 = vpop.f32.mrb[45].mxu1 }
 0x258   :  { %v5780_v8 = vadd.f32 %v5779_v7, %v5778_v6  ;;  %v5781_v9 = vpop.f32.mrb[46].mxu1 }
 0x259   :  { %v5800_v10 = vpop.f32.mrb[48].mxu0  ;;  %v5782_v11 = vpop.f32.mrb[47].mxu1 }
 0x25a   :  { %v5801_v12 = vpop.f32.mrb[49].mxu0  ;;  %v4511_v14 = vadd.f32 %v5780_v8, %v4471_v5 }
 0x25b   :  { %v5802_v15 = vadd.f32 %v5801_v12, %v5800_v10  ;;  %v5803_v16 = vpop.f32.mrb[50].mxu0 }
 0x25c   :  { %v5804_v17 = vpop.f32.mrb[51].mxu0 }
 0x25d   :  { %v4551_v45 = vadd.f32 %v5802_v15, %v4511_v14 }
 0x276   :  { %v4590_v18 = vpop.f32.mrb[48].mxu1 }
 0x277   :  { %v4591_v20 = vadd.f32 %v4590_v18, %v4551_v45  ;;  %v5854_v21 = vpop.f32.mrb[49].mxu1 }
 0x278   :  { %v4593_v22 = vpop.f32.mrb[50].mxu1 }
 0x279   :  { %v4603_v23 = vadd.f32 %v5257_v19, %v4591_v20  ;;  %v5855_v24 = vpop.f32.mrb[51].mxu1 }
 0x27b   :  { %v4604_v13 = vmax.f32 %v4603_v23, 0.0 }
 0x27d   :  { %v4605_v26 = vpack.c.bf16 %v4604_v13, %v4604_v13 }
 0x27f   :  { %5865 = vmatmul.mubr.msk.bf16.vlgmr.msra.gmra.mrb[52].mxu0 %vm4645_vm3, %v4605_v26 }
 0x280   :  { %5869 = vmatpush3.bf16.msra.mxu0 %v6297_v25  ;;  %5876 = vmatprep.mubr.msk.bf16.mxu0 %vm6306_vm1, %v6305_v0 }
 0x281   :  { %5870 = vmatprep.subr.bf16.mxu0 %v6305_v0 }
 0x284   :  { %5871 = vmatpush3.bf16.msra.mxu0 %v6298_v27 }
 0x285   :  { %5872 = vmatprep.subr.bf16.mxu0 %v6305_v0 }
 0x288   :  { %5873 = vmatpush3.bf16.msra.mxu0 %v6299_v28 }
 0x289   :  { %5874 = vmatprep.subr.bf16.mxu0 %v6305_v0  ;;  %v5270_v0 = vld [vmem:[%s7750_s10] ss:$0 sm:$0xff] }
 0x28c   :  { %5875 = vmatpush3.bf16.msra.mxu0 %v6300_v29 }
 0x352   :  { %v4683_v33 = vpop.f32.mrb[52].mxu0 }
 0x353   :  { %v4684_v34 = vadd.f32 %v5258_v32, %v4683_v33  ;;  %v5866_v35 = vpop.f32.mrb[53].mxu0 }
 0x354   :  { %v4686_v36 = vpop.f32.mrb[54].mxu0 }
 0x355   :  { %v4689_v37 = vmax.f32 %v4684_v34, 0.0  ;;  %v5867_v38 = vpop.f32.mrb[55].mxu0 }
 0x357   :  { %v4690_v39 = vpack.c.bf16 %v4689_v37, %v4689_v37 }
 0x359   :  { %5877 = vmatmul.mubr.msk.bf16.vlgmr.msra.gmra.mrb[56].mxu0 %vm4645_vm3, %v4690_v39 }
 0x42c   :  { %v4767_v43 = vpop.f32.mrb[56].mxu0 }
 0x42d   :  { %v4768_v44 = vadd.f32 %v5264_v42, %v4767_v43  ;;  %v5878_v46 = vpop.f32.mrb[57].mxu0 }
 0x42e   :  { %v4770_v47 = vpop.f32.mrb[58].mxu0 }
 0x42f   :  { %v4773_v48 = vmax.f32 %v4768_v44, 0.0  ;;  %v5879_v49 = vpop.f32.mrb[59].mxu0 }
 0x431   :  { %v4774_v50 = vpack.c.bf16 %v4773_v48, %v4773_v48 }
 0x433   :  { %5889 = vmatmul.mubr.msk.bf16.vlgmr.msra.gmra.mrb[52].mxu1 %vm4645_vm3, %v4774_v50 }
 0x506   :  { %v4851_v51 = vpop.f32.mrb[52].mxu1 }
 0x507   :  { %v4852_v52 = vadd.f32 %v5270_v0, %v4851_v51  ;;  %v5890_v53 = vpop.f32.mrb[53].mxu1 }
 0x508   :  { %v4854_v54 = vpop.f32.mrb[54].mxu1 }
 0x509   :  { %4858 = vst.msk [vmem:[%s7751_s11] sm:$0x3] %vm4857_vm4, %v4852_v52  ;;  %v5891_v55 = vpop.f32.mrb[55].mxu1 }

</bundles_post_ra>
